<compile_context>
chip_gen: v7x
topology: tpu7x:2x2x1
jax: 0.10.0
libtpu: 0.0.40
codegen_flags: <defaults>
</compile_context>

<pallas_src>
import functools

import numpy as np
import jax
import jax.numpy as jnp
from jax.experimental import pallas as pl
from jax.experimental.pallas import tpu as pltpu

K = 16        # Conv1d kernel size
S = 4         # Conv1d stride (K == S*S, which the space-to-depth layout uses)
NLANE = 128   # lane-padded width of the classifier output


def _head_kernel(xs_ref, w1_ref, w2l_ref, bias_ref, o_ref, *, bt, m1, c):
    """One grid step: Bt samples -> (Bt, NLANE) lane-padded logits."""
    fc = S * c                      # width of one conv1-output row (4*C lanes)
    n_taps = K // S                 # 4

    # ---- conv1: one bf16 MXU matmul, N = 8C (256 lanes wide) ---------------
    # aq[:, :4C] = "a" (taps from this input row), aq[:, 4C:] = "q" (taps from
    # the next input row).  conv1 bias is folded into bias_ref.
    aq = jnp.dot(xs_ref[...], w1_ref[...], preferred_element_type=jnp.float32)
    a3 = aq[:, :fc].reshape(bt, m1, fc)
    q3 = aq[:, fc:].reshape(bt, m1, fc)

    # ---- conv2 + AdaptiveAvgPool1d(1): windowed per-sample row sums --------
    # Pooled conv2 needs, per tap group p, sum over conv1 rows [p, p+L2) with
    #   h1[row] = a[row] + q[row + 1]   (bias folded away), i.e. per sample
    #   sum_{m in [p, p+L2)} a[m]  +  sum_{m in [p+1, p+L2]} q[m].
    # Both windows stay inside the sample, so no roll / halo is needed.
    # window = full per-sample sum - leading edge rows - trailing edge rows.
    def windowed_sums(x3, starts):
        full = jnp.sum(x3, axis=1)                       # (bt, 4C) f32
        lead = {0: jnp.zeros_like(full)}
        trail = {0: jnp.zeros_like(full)}
        for i in range(1, n_taps + 1):
            lead[i] = lead[i - 1] + x3[:, i - 1, :]      # first i rows
            trail[i] = trail[i - 1] + x3[:, m1 - i, :]   # last i rows
        # window [s, s + L2) with L2 = m1 - n_taps
        return [full - lead[s] - trail[n_taps - s] for s in starts]

    ga = windowed_sums(a3, range(n_taps))                # starts 0..3
    gq = windowed_sums(q3, range(1, n_taps + 1))         # starts 1..4
    gcat = jnp.concatenate([ga[p] + gq[p] for p in range(n_taps)], axis=-1)

    # ---- conv2 taps (x) 1/L2 pool (x) Linear: one lane-dense bf16 matmul ---
    o_ref[...] = (jnp.dot(gcat.astype(jnp.bfloat16), w2l_ref[...],
                          preferred_element_type=jnp.float32)
                  + bias_ref[...])


def head_classification_forward(x_ncl, w1, b1, w2, b2, lw, lb, *, batch_tile=32):
    """x_ncl: (B, C, L) PyTorch-layout input.  Weights in PyTorch shapes:
       w1, w2: (C, C, K); b1, b2: (C,); lw: (NC, C); lb: (NC,)."""
    B, C, L = x_ncl.shape
    NC = lw.shape[0]
    assert NC <= NLANE, "num_classes must fit the lane-padded output"
    assert K == S * S
    assert L % (S * S) == 0, "sequence length must be a multiple of 16"
    M1 = L // (S * S)                       # x rows per sample (s2d layout)
    L1 = (L - K) // S + 1                   # conv1 output length
    L2 = (L1 - K) // S + 1                  # conv2 output length
    n_taps = K // S
    assert L1 == S * M1 - (S - 1) and L2 == M1 - n_taps and L2 >= 1
    Bt = min(batch_tile, B)
    assert B % Bt == 0
    assert Bt % 8 == 0 or Bt == B           # sublane-friendly output block
    R = Bt * M1                             # matmul M rows per grid step
    assert R % 8 == 0 or R == B * M1

    f32 = jnp.float32
    bf16 = jnp.bfloat16

    # ---------------- parameter re-layout / folding (wrapper, f32) ----------
    w1_t = jnp.transpose(w1, (2, 1, 0)).astype(f32)        # (K, Cin, Cout)
    w2_t = jnp.transpose(w2, (2, 1, 0)).astype(f32)

    # conv1 as one dense (16C, 8C) matrix [W1a | W1b]:
    #   col block j < 4  ("a"): k = t - 4j          (taps in this x row)
    #   col block j >= 4 ("q"): k = t - 4(j-4) + 16 (taps in the next x row)
    t_idx = np.arange(K)[:, None]                          # (16, 1)
    j_idx = np.arange(2 * S)[None, :]                      # (1, 8)
    k_idx = t_idx - S * (j_idx % S) + K * (j_idx // S)     # (16, 8)
    valid = (k_idx >= 0) & (k_idx < K)
    blocks = jnp.where(jnp.asarray(valid)[:, :, None, None],
                       w1_t[np.clip(k_idx, 0, K - 1)], 0.0)   # (16, 8, C, C)
    W1ab = jnp.transpose(blocks, (0, 2, 1, 3)).reshape(K * C, 2 * S * C)

    # conv2 tap weights in s2d form: w2s[p, r*C+ci, co] = w2[co, ci, 4p+r]
    w2s = w2_t.reshape(n_taps, S, C, C).reshape(n_taps, S * C, C)

    # Fold conv2 taps * (1/L2) pooling * classifier into one (16C, 128) matrix
    lw_padT = jnp.zeros((C, NLANE), f32).at[:, :NC].set(lw.T.astype(f32))
    W2L_cat = ((w2s @ lw_padT) * (1.0 / L2)).reshape(K * C, NLANE)

    # Combined bias: lb + lw . (b2 + conv2 applied to the constant b1 input)
    b1_tile = jnp.tile(b1.astype(f32), S)                  # (4C,)
    conv2_of_b1 = b1_tile @ w2s.sum(axis=0)                # (C,)
    lb_pad = jnp.zeros((NLANE,), f32).at[:NC].set(lb.astype(f32))
    bias_comb = (lb_pad
                 + (b2.astype(f32) + conv2_of_b1) @ lw_padT).reshape(1, NLANE)

    # -------- input re-layout: (B, C, L) -> (B*M1, 16C), bf16 ---------------
    # TODO(synk): fuse into the upstream producer (channel-last activations)
    #             to avoid this extra HBM round-trip in the full model.
    x_rows = (jnp.transpose(x_ncl, (0, 2, 1))              # (B, L, C)
              .reshape(B * M1, K * C)
              .astype(bf16))

    kernel = functools.partial(_head_kernel, bt=Bt, m1=M1, c=C)
    out = pl.pallas_call(
        kernel,
        out_shape=jax.ShapeDtypeStruct((B, NLANE), f32),
        grid=(B // Bt,),
        in_specs=[
            pl.BlockSpec((R, K * C), lambda i: (i, 0)),          # x rows
            pl.BlockSpec((K * C, 2 * S * C), lambda i: (0, 0)),  # [W1a|W1b]
            pl.BlockSpec((K * C, NLANE), lambda i: (0, 0)),      # folded w2*lw
            pl.BlockSpec((1, NLANE), lambda i: (0, 0)),          # folded bias
        ],
        out_specs=pl.BlockSpec((Bt, NLANE), lambda i: (i, 0)),
        compiler_params=pltpu.CompilerParams(
            dimension_semantics=("parallel",)),
    )(x_rows, W1ab.astype(bf16), W2L_cat.astype(bf16), bias_comb)
    return out[:, :NC]


def ref_forward(x_ncl, w1, b1, w2, b2, lw, lb):
    """Pure-JAX reference matching the PyTorch module (out_act = Identity)."""
    def conv1d(x, w, b):
        y = jax.lax.conv_general_dilated(
            x, w, window_strides=(S,), padding="VALID",
            dimension_numbers=("NCH", "OIH", "NCH"),
            precision=jax.lax.Precision.HIGHEST)
        return y + b[None, :, None]
    h = conv1d(x_ncl, w1, b1)
    h = conv1d(h, w2, b2)
    h = jnp.mean(h, axis=-1)                    # AdaptiveAvgPool1d(1) + Flatten
    return h @ lw.T + lb                        # Linear; Identity out_act


if __name__ == "__main__":
    B, C, L = 64, 32, 128       # batch, feature_channels, sequence length
    NC = 4                      # num_classes

    key = jax.random.PRNGKey(0)
    k_x, k_w1, k_b1, k_w2, k_b2, k_lw, k_lb = jax.random.split(key, 7)

    x_ncl = jax.random.normal(k_x, (B, C, L), jnp.float32)     # PyTorch NCL
    w1 = 0.05 * jax.random.normal(k_w1, (C, C, K), jnp.float32)
    b1 = 0.05 * jax.random.normal(k_b1, (C,), jnp.float32)
    w2 = 0.05 * jax.random.normal(k_w2, (C, C, K), jnp.float32)
    b2 = 0.05 * jax.random.normal(k_b2, (C,), jnp.float32)
    lw = 0.05 * jax.random.normal(k_lw, (NC, C), jnp.float32)
    lb = 0.05 * jax.random.normal(k_lb, (NC,), jnp.float32)

    # Bt=32 -> R = 256 matmul rows per step, grid = 2 "parallel" steps.
    out = head_classification_forward(x_ncl, w1, b1, w2, b2, lw, lb,
                                      batch_tile=32)
    out = jax.block_until_ready(out)

    ref = ref_forward(x_ncl, w1, b1, w2, b2, lw, lb)
    # bf16 MXU operands with f32 accumulation -> slightly looser tolerance.
    np.testing.assert_allclose(np.asarray(out), np.asarray(ref),
                               rtol=2e-2, atol=1e-2)
    print("KERNEL_OK")
</pallas_src>

<mosaic_0001>
module attributes {stable_mosaic.version = 11 : i64} {
  func.func @_head_kernel(%arg0: i32, %arg1: memref<256x512xbf16, #tpu.memory_space<vmem>>, %arg2: memref<512x256xbf16, #tpu.memory_space<vmem>>, %arg3: memref<512x128xbf16, #tpu.memory_space<vmem>>, %arg4: memref<1x128xf32, #tpu.memory_space<vmem>>, %arg5: memref<32x128xf32, #tpu.memory_space<vmem>>) attributes {dimension_semantics = [#tpu.dimension_semantics<parallel>], iteration_bounds = array<i64: 2>, scalar_prefetch = 0 : i64, scratch_operands = 0 : i64, tpu.core_type = #tpu.core_type<tc>, window_params = [{transform_indices = @transform_0, window_bounds = array<i64: 256, 512>}, {pipeline_mode = #tpu.pipeline_mode<synchronous>, transform_indices = @transform_1, window_bounds = array<i64: 512, 256>}, {pipeline_mode = #tpu.pipeline_mode<synchronous>, transform_indices = @transform_2, window_bounds = array<i64: 512, 128>}, {pipeline_mode = #tpu.pipeline_mode<synchronous>, transform_indices = @transform_3, window_bounds = array<i64: 1, 128>}, {transform_indices = @transform_4, window_bounds = array<i64: 32, 128>}]} {
    %c0 = arith.constant 0 : index
    %c0_0 = arith.constant 0 : index
    %0 = vector.load %arg1[%c0, %c0_0] : memref<256x512xbf16, #tpu.memory_space<vmem>>, vector<256x512xbf16>
    %c0_1 = arith.constant 0 : index
    %c0_2 = arith.constant 0 : index
    %1 = vector.load %arg2[%c0_1, %c0_2] : memref<512x256xbf16, #tpu.memory_space<vmem>>, vector<512x256xbf16>
    %cst = arith.constant dense<0.000000e+00> : vector<256x256xf32>
    %2 = tpu.matmul %0, %1, %cst {dimension_numbers = #tpu.dot_dimension_numbers<[1], [0], [0], [1], [0, 0, 1, 1], [], []>} : vector<256x512xbf16>, vector<512x256xbf16>, vector<256x256xf32> -> vector<256x256xf32>
    %3 = vector.extract_strided_slice %2 {offsets = [0, 0], sizes = [256, 128], strides = [1, 1]} : vector<256x256xf32> to vector<256x128xf32>
    %4 = vector.shape_cast %3 : vector<256x128xf32> to vector<32x8x128xf32>
    %5 = vector.extract_strided_slice %2 {offsets = [0, 128], sizes = [256, 128], strides = [1, 1]} : vector<256x256xf32> to vector<256x128xf32>
    %6 = vector.shape_cast %5 : vector<256x128xf32> to vector<32x8x128xf32>
    %cst_3 = arith.constant dense<0.000000e+00> : vector<32x128xf32>
    %7 = vector.multi_reduction <add>, %4, %cst_3 [1] : vector<32x8x128xf32> to vector<32x128xf32>
    %cst_4 = arith.constant 0.000000e+00 : f32
    %8 = vector.broadcast %cst_4 : f32 to vector<32x128xf32>
    %cst_5 = arith.constant 0.000000e+00 : f32
    %9 = vector.broadcast %cst_5 : f32 to vector<32x128xf32>
    %10 = vector.extract_strided_slice %4 {offsets = [0, 0, 0], sizes = [32, 1, 128], strides = [1, 1, 1]} : vector<32x8x128xf32> to vector<32x1x128xf32>
    %11 = vector.shape_cast %10 : vector<32x1x128xf32> to vector<32x128xf32>
    %12 = arith.addf %8, %11 : vector<32x128xf32>
    %13 = vector.extract_strided_slice %4 {offsets = [0, 7, 0], sizes = [32, 1, 128], strides = [1, 1, 1]} : vector<32x8x128xf32> to vector<32x1x128xf32>
    %14 = vector.shape_cast %13 : vector<32x1x128xf32> to vector<32x128xf32>
    %15 = arith.addf %9, %14 : vector<32x128xf32>
    %16 = vector.extract_strided_slice %4 {offsets = [0, 1, 0], sizes = [32, 1, 128], strides = [1, 1, 1]} : vector<32x8x128xf32> to vector<32x1x128xf32>
    %17 = vector.shape_cast %16 : vector<32x1x128xf32> to vector<32x128xf32>
    %18 = arith.addf %12, %17 : vector<32x128xf32>
    %19 = vector.extract_strided_slice %4 {offsets = [0, 6, 0], sizes = [32, 1, 128], strides = [1, 1, 1]} : vector<32x8x128xf32> to vector<32x1x128xf32>
    %20 = vector.shape_cast %19 : vector<32x1x128xf32> to vector<32x128xf32>
    %21 = arith.addf %15, %20 : vector<32x128xf32>
    %22 = vector.extract_strided_slice %4 {offsets = [0, 2, 0], sizes = [32, 1, 128], strides = [1, 1, 1]} : vector<32x8x128xf32> to vector<32x1x128xf32>
    %23 = vector.shape_cast %22 : vector<32x1x128xf32> to vector<32x128xf32>
    %24 = arith.addf %18, %23 : vector<32x128xf32>
    %25 = vector.extract_strided_slice %4 {offsets = [0, 5, 0], sizes = [32, 1, 128], strides = [1, 1, 1]} : vector<32x8x128xf32> to vector<32x1x128xf32>
    %26 = vector.shape_cast %25 : vector<32x1x128xf32> to vector<32x128xf32>
    %27 = arith.addf %21, %26 : vector<32x128xf32>
    %28 = vector.extract_strided_slice %4 {offsets = [0, 4, 0], sizes = [32, 1, 128], strides = [1, 1, 1]} : vector<32x8x128xf32> to vector<32x1x128xf32>
    %29 = vector.shape_cast %28 : vector<32x1x128xf32> to vector<32x128xf32>
    %30 = arith.addf %27, %29 : vector<32x128xf32>
    %31 = arith.subf %7, %8 : vector<32x128xf32>
    %32 = arith.subf %31, %30 : vector<32x128xf32>
    %33 = arith.subf %7, %12 : vector<32x128xf32>
    %34 = arith.subf %33, %27 : vector<32x128xf32>
    %35 = arith.subf %7, %18 : vector<32x128xf32>
    %36 = arith.subf %35, %21 : vector<32x128xf32>
    %37 = arith.subf %7, %24 : vector<32x128xf32>
    %38 = arith.subf %37, %15 : vector<32x128xf32>
    %cst_6 = arith.constant dense<0.000000e+00> : vector<32x128xf32>
    %39 = vector.multi_reduction <add>, %6, %cst_6 [1] : vector<32x8x128xf32> to vector<32x128xf32>
    %cst_7 = arith.constant 0.000000e+00 : f32
    %40 = vector.broadcast %cst_7 : f32 to vector<32x128xf32>
    %cst_8 = arith.constant 0.000000e+00 : f32
    %41 = vector.broadcast %cst_8 : f32 to vector<32x128xf32>
    %42 = vector.extract_strided_slice %6 {offsets = [0, 0, 0], sizes = [32, 1, 128], strides = [1, 1, 1]} : vector<32x8x128xf32> to vector<32x1x128xf32>
    %43 = vector.shape_cast %42 : vector<32x1x128xf32> to vector<32x128xf32>
    %44 = arith.addf %40, %43 : vector<32x128xf32>
    %45 = vector.extract_strided_slice %6 {offsets = [0, 7, 0], sizes = [32, 1, 128], strides = [1, 1, 1]} : vector<32x8x128xf32> to vector<32x1x128xf32>
    %46 = vector.shape_cast %45 : vector<32x1x128xf32> to vector<32x128xf32>
    %47 = arith.addf %41, %46 : vector<32x128xf32>
    %48 = vector.extract_strided_slice %6 {offsets = [0, 1, 0], sizes = [32, 1, 128], strides = [1, 1, 1]} : vector<32x8x128xf32> to vector<32x1x128xf32>
    %49 = vector.shape_cast %48 : vector<32x1x128xf32> to vector<32x128xf32>
    %50 = arith.addf %44, %49 : vector<32x128xf32>
    %51 = vector.extract_strided_slice %6 {offsets = [0, 6, 0], sizes = [32, 1, 128], strides = [1, 1, 1]} : vector<32x8x128xf32> to vector<32x1x128xf32>
    %52 = vector.shape_cast %51 : vector<32x1x128xf32> to vector<32x128xf32>
    %53 = arith.addf %47, %52 : vector<32x128xf32>
    %54 = vector.extract_strided_slice %6 {offsets = [0, 2, 0], sizes = [32, 1, 128], strides = [1, 1, 1]} : vector<32x8x128xf32> to vector<32x1x128xf32>
    %55 = vector.shape_cast %54 : vector<32x1x128xf32> to vector<32x128xf32>
    %56 = arith.addf %50, %55 : vector<32x128xf32>
    %57 = vector.extract_strided_slice %6 {offsets = [0, 5, 0], sizes = [32, 1, 128], strides = [1, 1, 1]} : vector<32x8x128xf32> to vector<32x1x128xf32>
    %58 = vector.shape_cast %57 : vector<32x1x128xf32> to vector<32x128xf32>
    %59 = arith.addf %53, %58 : vector<32x128xf32>
    %60 = vector.extract_strided_slice %6 {offsets = [0, 3, 0], sizes = [32, 1, 128], strides = [1, 1, 1]} : vector<32x8x128xf32> to vector<32x1x128xf32>
    %61 = vector.shape_cast %60 : vector<32x1x128xf32> to vector<32x128xf32>
    %62 = arith.addf %56, %61 : vector<32x128xf32>
    %63 = arith.subf %39, %44 : vector<32x128xf32>
    %64 = arith.subf %63, %59 : vector<32x128xf32>
    %65 = arith.subf %39, %50 : vector<32x128xf32>
    %66 = arith.subf %65, %53 : vector<32x128xf32>
    %67 = arith.subf %39, %56 : vector<32x128xf32>
    %68 = arith.subf %67, %47 : vector<32x128xf32>
    %69 = arith.subf %39, %62 : vector<32x128xf32>
    %70 = arith.subf %69, %41 : vector<32x128xf32>
    %71 = arith.addf %32, %64 : vector<32x128xf32>
    %72 = arith.addf %34, %66 : vector<32x128xf32>
    %73 = arith.addf %36, %68 : vector<32x128xf32>
    %74 = arith.addf %38, %70 : vector<32x128xf32>
    %75 = tpu.concatenate %71, %72, %73, %74 in 1 : vector<32x128xf32>, vector<32x128xf32>, vector<32x128xf32>, vector<32x128xf32> -> vector<32x512xf32>
    %76 = arith.truncf %75 : vector<32x512xf32> to vector<32x512xbf16>
    %c0_9 = arith.constant 0 : index
    %c0_10 = arith.constant 0 : index
    %77 = vector.load %arg3[%c0_9, %c0_10] : memref<512x128xbf16, #tpu.memory_space<vmem>>, vector<512x128xbf16>
    %cst_11 = arith.constant dense<0.000000e+00> : vector<32x128xf32>
    %78 = tpu.matmul %76, %77, %cst_11 {dimension_numbers = #tpu.dot_dimension_numbers<[1], [0], [0], [1], [0, 0, 1, 1], [], []>} : vector<32x512xbf16>, vector<512x128xbf16>, vector<32x128xf32> -> vector<32x128xf32>
    %c0_12 = arith.constant 0 : index
    %c0_13 = arith.constant 0 : index
    %79 = vector.load %arg4[%c0_12, %c0_13] : memref<1x128xf32, #tpu.memory_space<vmem>>, vector<1x128xf32>
    %80 = vector.broadcast %79 : vector<1x128xf32> to vector<32x128xf32>
    %81 = arith.addf %78, %80 : vector<32x128xf32>
    %c0_14 = arith.constant 0 : index
    %c0_15 = arith.constant 0 : index
    %82 = vector.load %arg5[%c0_14, %c0_15] : memref<32x128xf32, #tpu.memory_space<vmem>>, vector<32x128xf32>
    tpu.vector_store %arg5[%c0_14, %c0_15], %81 {strides = array<i32>} : memref<32x128xf32, #tpu.memory_space<vmem>>, vector<32x128xf32>,
    return
  }
  func.func @transform_0(%arg0: i32) -> (i32, i32) {
    %c0_i32 = arith.constant 0 : i32
    %c0_i32_0 = arith.constant 0 : i32
    return %arg0, %c0_i32 : i32, i32
  }
  func.func @transform_1(%arg0: i32) -> (i32, i32) {
    %c0_i32 = arith.constant 0 : i32
    %c0_i32_0 = arith.constant 0 : i32
    %c0_i32_1 = arith.constant 0 : i32
    return %c0_i32, %c0_i32_0 : i32, i32
  }
  func.func @transform_2(%arg0: i32) -> (i32, i32) {
    %c0_i32 = arith.constant 0 : i32
    %c0_i32_0 = arith.constant 0 : i32
    %c0_i32_1 = arith.constant 0 : i32
    return %c0_i32, %c0_i32_0 : i32, i32
  }
  func.func @transform_3(%arg0: i32) -> (i32, i32) {
    %c0_i32 = arith.constant 0 : i32
    %c0_i32_0 = arith.constant 0 : i32
    %c0_i32_1 = arith.constant 0 : i32
    return %c0_i32, %c0_i32_0 : i32, i32
  }
  func.func @transform_4(%arg0: i32) -> (i32, i32) {
    %c0_i32 = arith.constant 0 : i32
    %c0_i32_0 = arith.constant 0 : i32
    return %arg0, %c0_i32 : i32, i32
  }
}

</mosaic_0001>

<bundles_post_ra>
// kernel: tpu_custom_call.1
= control target key start
LH: loop header
LB: loop body
LE: loop exit
PB: predicated region body
PF: predicated region fallthrough
CT: control target
= control target key end

     0   :  { %9 = vsyncpa [#allocation3], 0  ;;  %s9374_s0 = inlined_call_operand.hbm [shape: bf16[512,512], index: 0, kind: input, shape index: {}]   ;;  %s9375_s1 = inlined_call_operand.hbm [shape: bf16[512,256], index: 1, kind: input, shape index: {}]   ;;  %s9376_s2 = inlined_call_operand.hbm [shape: bf16[512,128], index: 2, kind: input, shape index: {}]   ;;  %s9377_s3 = inlined_call_operand.vmem [shape: f32[1,128], index: 3, kind: input, shape index: {}]   ;;  %s9378_s4 = inlined_call_operand.hbm [shape: f32[64,128], index: 4, kind: output, shape index: {}]  }
   0x1   :  { %11 = vsyncpa [#allocation3 + $0x1], 0 }
   0x2   :  { %12 = vsyncpa [#allocation6], 0 }
   0x3   :  { %13 = vsyncpa [#allocation4], 0 }
   0x4   :  { %15 = vsyncpa [#allocation4 + $0x1], 0  ;;  %s5923_s15 = smov 0   ;;  %s5925_s16 = smov 0  }
   0x5   :  { %s5927_s17 = smov 0   ;;  %s5929_s18 = smov 0  }
   0x6 LB: > { %s5944_s19 = sadd.s32 4294967295, %s5884_s18   ;;  %s5094_s20 = sadd.s32 4294967294, %s5884_s18   ;;  %s5884_s18 = sphi %s5929_s18, %s10931_s18   ;;  %s5880_s17 = sphi %s5927_s17, %s10930_s17   ;;  %s5876_s16 = sphi %s5925_s16, %s10929_s16   ;;  %s5872_s15 = sphi %s5923_s15, %s10928_s15  }
   0x7   : > { %p41_p0 = scmp.ne.s32.totalorder %s5876_s16, %s5872_s15  ;;  %p9379_p1 = scmp.eq.s32.totalorder %s5944_s19, 0 }
   0x8   : > { %p134_p3 = scmp.eq.s32.totalorder %s5094_s20, 1  ;;  %p5095_p5 = scmp.ge.s32.totalorder %s5884_s18, 1 }
   0x9   : > { %p5953_p4 = por %p9379_p1, %p41_p0  ;;  %p141_p7 = scmp.lt.s32.totalorder %s5884_s18, 3 }
   0xa   : > { %p5958_p6 = por %p134_p3, %p41_p0  ;;  %s5886_s24 = smov [#allocation5]  }
   0xb   : > { %s9836_s21 = scalar_select %p5953_p4, 1, 0 }
   0xc   : > { %s9837_s22 = scalar_select %p5958_p6, 1, 0 }
   0xd   : > { %p5963_p8 = pnand %p5095_p5, %p141_p7  ;;  %s153_s25 = sshll.u32 %s5886_s24, 4  ;;  %s5967_s25 = int_to_ptr.vmem [resolvable:$true] %s153_s25 }
   0xe   : > { %s5887_s27 = smov [#allocation7]   ;;  %s5728_s5 = scalar_lea.hbm %s9375_s1, 8192 }
   0xf   : > { %p5441_p9 = pneg %p5963_p8  ;;  %s166_s28 = sshll.u32 %s5887_s27, 4  ;;  %s5978_s28 = int_to_ptr.vmem [resolvable:$true] %s166_s28 }
  0x10   : > { %p5729_p12 = scmp.ne.s32.totalorder %s9375_s1, %s5728_s5  ;;  %p5735_p5 = scmp.lt.u32.totalorder %s5728_s5, %s9375_s1 }
  0x11   : > { %p5974_p11 = pnand %p5441_p9, %p9379_p1 }
  0x13   : > { %p5730_p13 = pneg %p5974_p11 }
  0x15   : > { %p5731_p0 = pnand %p5730_p13, %p5729_p12 }
  0x17   : > { %p5732_p3 = pneg %p5731_p0 }
  0x19   : > { %p5737_p7 = pnand %p5735_p5, %p5732_p3 }
  0x1b   : > { %5740 = shalt.err (!%p5737_p7)
}
  0x1c   : > { %s5741_s10 = scalar_lea.vmem %s5967_s25, 8192  ;;  %p5749_p2 = scmp.lt.s32.totalorder %s5967_s25, %s5967_s25 }
  0x1d   : > { %p5742_p9 = scmp.ne.s32.totalorder %s5967_s25, %s5741_s10  ;;  %p5750_p12 = scmp.lt.s32.totalorder %s5741_s10, %s5741_s10 }
  0x1f   : > { %p5744_p10 = pnand %p5742_p9, %p5730_p13  ;;  %p5751_p0 = por %p5750_p12, %p5749_p2 }
  0x21   : > { %p5745_p1 = pneg %p5744_p10 }
  0x23   : > { %p5752_p6 = pnand %p5751_p0, %p5745_p1 }
  0x25   : > { %5755 = shalt.err (!%p5752_p6)
}
  0x26   : > { %s5888_s11 = smov 128   ;;  %s5889_s12 = smov 8  }
  0x27   : > { %5444 = dma.hbm_to_vmem [thread:$0]  (!%p5974_p11), %s9375_s1, 8192, %s5967_s25, [#allocation6], %s5888_s11, %s5888_s11, %s5889_s12  }
  0x28   : > { %s5756_s27 = scalar_lea.hbm %s9376_s2, 4096 }
  0x29   : > { %p5757_p2 = scmp.ne.s32.totalorder %s9376_s2, %s5756_s27  ;;  %p5763_p10 = scmp.lt.u32.totalorder %s5756_s27, %s9376_s2 }
  0x2b   : > { %p5759_p1 = pnand %p5757_p2, %p5730_p13 }
  0x2d   : > { %p5760_p6 = pneg %p5759_p1 }
  0x2f   : > { %p5765_p3 = pnand %p5763_p10, %p5760_p6 }
  0x31   : > { %5768 = shalt.err (!%p5765_p3)
}
  0x32   : > { %s5769_s25 = scalar_lea.vmem %s5978_s28, 4096  ;;  %p5777_p12 = scmp.lt.s32.totalorder %s5978_s28, %s5978_s28 }
  0x33   : > { %p5770_p5 = scmp.ne.s32.totalorder %s5978_s28, %s5769_s25  ;;  %p5778_p0 = scmp.lt.s32.totalorder %s5769_s25, %s5769_s25 }
  0x35   : > { %p5772_p7 = pnand %p5770_p5, %p5730_p13  ;;  %p5779_p2 = por %p5778_p0, %p5777_p12 }
  0x37   : > { %p5773_p9 = pneg %p5772_p7 }
  0x39   : > { %p5780_p1 = pnand %p5779_p2, %p5773_p9 }
  0x3b   : > { %5783 = shalt.err (!%p5780_p1)
}
  0x3c   : > { %s5890_s7 = smov 64   ;;  %s5891_s8 = smov 4  }
  0x3d   : > { %5447 = dma.hbm_to_vmem [thread:$0]  (!%p5974_p11), %s9376_s2, 4096, %s5978_s28, [#allocation6], %s5890_s7, %s5890_s7, %s5891_s8  }
  0x3e   : > { %s6033_s11 = sadd.s32 1, %s5884_s18   ;;  %s28_s13 = sadd.s32 1, %s5880_s17 }
  0x3f   : > { %s25_s12 = ssub.s32 %s5884_s18, %s6033_s11  ;;  %p35_p6 = scmp.ne.s32.totalorder %s5880_s17, %s5876_s16 }
  0x40   : > { %p26_p13 = scmp.eq.s32.totalorder %s25_s12, 0  ;;  %p36_p10 = scmp.eq.s32.totalorder %s5884_s18, 0 }
  0x41   : > { %p9840_p5 = scmp.eq.s32.totalorder %s5944_s19, 1  ;;  %p5458_p9 = scmp.lt.s32.totalorder %s5884_s18, 2 }
  0x42   : > { %s6042_s14 = scalar_select %p26_p13, %s5880_s17, %s28_s13  }
  0x43   : > { %p37_p3 = por %p36_p10, %p35_p6  ;;  %p6046_p7 = por %p9840_p5, %p35_p6 }
  0x44   : > { %s183_s26 = sand.u32 1, %s5880_s17   ;;  %s5275_s28 = sshll.u32 %s5884_s18, 13 }
  0x45   : > { %s9841_s20 = scalar_select %p6046_p7, 1, 0 }
  0x46   : > { %s5099_s24 = sshll.u32 %s183_s26, 9  ;;  %s6056_s30 = scalar_lea.hbm %s9374_s0, %s5275_s28 }
  0x47   : > { %s187_s5 = scalar_lea.vmem [#allocation2], %s5099_s24  ;;  %p6060_p11 = pnand %p5458_p9, %p37_p3 }
  0x48   : > { %s195_s6 = sshll.u32 %s187_s5, 4  ;;  %s6064_s7 = scalar_lea.sflag [#allocation3], %s183_s26  ;;  %s6058_s6 = int_to_ptr.vmem [resolvable:$true] %s195_s6 }
  0x49   : > { %s5784_s8 = scalar_lea.hbm %s6056_s30, 8192  ;;  %p5786_p0 = pneg %p6060_p11 }
  0x4a   : > { %p5785_p12 = scmp.ne.s32.totalorder %s6056_s30, %s5784_s8  ;;  %s5789_s12 = scalar_lea.hbm %s9374_s0, 16384 }
  0x4b   : > { %p5790_p13 = scmp.lt.u32.totalorder %s6056_s30, %s9374_s0  ;;  %p5791_p6 = scmp.lt.u32.totalorder %s5789_s12, %s5784_s8 }
  0x4c   : > { %p5787_p2 = pnand %p5786_p0, %p5785_p12  ;;  %p5793_p3 = scmp.lt.u32.totalorder %s5784_s8, %s6056_s30 }
  0x4d   : > { %p5792_p10 = por %p5791_p6, %p5790_p13 }
  0x4e   : > { %p5788_p1 = pneg %p5787_p2 }
  0x4f   : > { %p5794_p5 = por %p5793_p3, %p5792_p10 }
  0x51   : > { %p5795_p9 = pnand %p5794_p5, %p5788_p1 }
  0x53   : > { %5798 = shalt.err (!%p5795_p9)
}
  0x54   : > { %s5799_s26 = scalar_lea.vmem %s6058_s6, 8192  ;;  %s5892_s28 = smov [#allocation2]  }
  0x55   : > { %p5800_p12 = scmp.ne.s32.totalorder %s6058_s6, %s5799_s26  ;;  %s5804_s27 = sshll.u32 %s5892_s28, 4  ;;  %s5805_s27 = int_to_ptr.vmem [resolvable:$false] %s5804_s27 }
  0x56   : > { %s5806_s29 = scalar_lea.vmem %s5805_s27, 16384  ;;  %p5807_p4 = scmp.lt.s32.totalorder %s6058_s6, %s5805_s27 }
  0x57   : > { %p5802_p2 = pnand %p5800_p12, %p5786_p0  ;;  %p5808_p13 = scmp.lt.s32.totalorder %s5806_s29, %s5799_s26 }
  0x59   : > { %p5803_p7 = pneg %p5802_p2  ;;  %p5809_p6 = por %p5808_p13, %p5807_p4 }
  0x5b   : > { %p5810_p10 = pnand %p5809_p6, %p5803_p7 }
  0x5d   : > { %5813 = shalt.err (!%p5810_p10)
}
  0x5e   : > { %s5893_s5 = smov 256   ;;  %s5894_s8 = smov 16  }
  0x5f   : > { %5451 = dma.hbm_to_vmem [thread:$0]  (!%p6060_p11), %s6056_s30, 8192, %s6058_s6, %s6064_s7, %s5893_s5, %s5893_s5, %s5894_s8  }
  0x60   : > { %207 = sbr.rel (%p5963_p8) target bundleno = 1222 (0x4c6), region = 36 }
  0x67   : > { %s6095_s9 = sand.u32 1, %s5876_s16   ;;  %p9843_p4 = scmp.ne.s32.totalorder %s9836_s21, 0 }
  0x68   : > { %s5104_s10 = sshll.u32 %s6095_s9, 9  ;;  %s210_s12 = scalar_lea.sflag [#allocation3], %s6095_s9 }
  0x69   : > { %s6099_s13 = scalar_lea.vmem [#allocation2], %s5104_s10 }
  0x6a   : > { %5859 = dma.done.wait (%p9843_p4), %s210_s12, 8192  }
  0x6b   : > { %5861 = vsyncadd (%p9843_p4), %s210_s12, 4294959104  ;;  %p9844_p7 = scmp.eq.s32.totalorder %s5944_s19, 0 }
  0x6d   : > { %5863 = dma.done.wait (%p9844_p7), [#allocation6], 12288   ;;  %p9845_p8 = pmov %p9844_p7 }
  0x6e   : > { %v5504_v0 = vld [vmem:[#allocation5 + $0x4] ss:$8 sps:$4 sm:$0xff]   ;;  %v5506_v1 = vld [vmem:[#allocation5] ss:$8 sps:$4 sm:$0xff]   ;;  %v5507_v2 = vld [vmem:[#allocation5 + $0x14] ss:$8 sps:$4 sm:$0xff]  }
  0x6f   : > { %5865 = vsyncadd (%p9845_p8), [#allocation6], 4294955008  ;;  %1017 = vmatprep.subr.bf16.mxu0 %v5504_v0  ;;  %v5509_v3 = vld [vmem:[#allocation5 + $0x10] ss:$8 sps:$4 sm:$0xff]   ;;  %v5510_v4 = vld [vmem:[#allocation5 + $0x24] ss:$8 sps:$4 sm:$0xff]  }
  0x70   : > { %1018 = vmatpush1.bf16.msra.mxu0 %v5506_v1  ;;  %v5512_v5 = vld [vmem:[#allocation5 + $0x20] ss:$8 sps:$4 sm:$0xff]   ;;  %v5513_v6 = vld [vmem:[#allocation5 + $0x34] ss:$8 sps:$4 sm:$0xff]   ;;  %v6109_v7 = vld [vmem:[#allocation5 + $0x104] ss:$8 sps:$4 sm:$0xff]  }
  0x71   : > { %1019 = vmatprep.subr.bf16.mxu0 %v5507_v2  ;;  %v6111_v8 = vld [vmem:[#allocation5 + $0x100] ss:$8 sps:$4 sm:$0xff]   ;;  %v5515_v9 = vld [vmem:[#allocation5 + $0x30] ss:$8 sps:$4 sm:$0xff]   ;;  %5333 = vmatprep.subr.bf16.mxu1 %v6109_v7  ;;  %v5516_v10 = vld [vmem:[#allocation5 + $0x44] ss:$8 sps:$4 sm:$0xff]  }
  0x72   : > { %5349 = vmatpush1.bf16.msra.mxu1 %v6111_v8  ;;  %v6115_v11 = vld [vmem:[#allocation5 + $0x114] ss:$8 sps:$4 sm:$0xff]   ;;  %v6117_v12 = vld [vmem:[#allocation5 + $0x110] ss:$8 sps:$4 sm:$0xff]   ;;  %v5518_v13 = vld [vmem:[#allocation5 + $0x40] ss:$8 sps:$4 sm:$0xff]  }
  0x73   : > { %5334 = vmatprep.subr.bf16.mxu1 %v6115_v11  ;;  %v5519_v14 = vld [vmem:[#allocation5 + $0x54] ss:$8 sps:$4 sm:$0xff]   ;;  %v6120_v15 = vld [vmem:[#allocation5 + $0x124] ss:$8 sps:$4 sm:$0xff]   ;;  %v6123_v16 = vld [vmem:[#allocation5 + $0x120] ss:$8 sps:$4 sm:$0xff]  }
  0x74   : > { %1020 = vmatpush1.bf16.msra.mxu0 %v5509_v3  ;;  %v6126_v17 = vld [vmem:[#allocation5 + $0x134] ss:$8 sps:$4 sm:$0xff]   ;;  %v5521_v18 = vld [vmem:[#allocation5 + $0x50] ss:$8 sps:$4 sm:$0xff]   ;;  %v5522_v19 = vld [vmem:[#allocation5 + $0x64] ss:$8 sps:$4 sm:$0xff]  }
  0x75   : > { %1021 = vmatprep.subr.bf16.mxu0 %v5510_v4  ;;  %v6129_v20 = vld [vmem:[#allocation5 + $0x130] ss:$8 sps:$4 sm:$0xff]   ;;  %v6132_v21 = vld [vmem:[#allocation5 + $0x144] ss:$8 sps:$4 sm:$0xff]   ;;  %v5526_v22 = vld [vmem:[#allocation5 + $0x60] ss:$8 sps:$4 sm:$0xff]  }
  0x76   : > { %5350 = vmatpush1.bf16.msra.mxu1 %v6117_v12  ;;  %v5528_v23 = vld [vmem:[#allocation5 + $0x74] ss:$8 sps:$4 sm:$0xff]   ;;  %v6135_v24 = vld [vmem:[#allocation5 + $0x140] ss:$8 sps:$4 sm:$0xff]   ;;  %v5532_v26 = vld [vmem:[#allocation5 + $0x70] ss:$8 sps:$4 sm:$0xff]  }
  0x77   : > { %5335 = vmatprep.subr.bf16.mxu1 %v6120_v15  ;;  %v6138_v25 = vld [vmem:[#allocation5 + $0x154] ss:$8 sps:$4 sm:$0xff]   ;;  %v5534_v27 = vld [vmem:[#allocation5 + $0x84] ss:$8 sps:$4 sm:$0xff]   ;;  %v6141_v28 = vld [vmem:[#allocation5 + $0x150] ss:$8 sps:$4 sm:$0xff]  }
  0x78   : > { %1022 = vmatpush1.bf16.msra.mxu0 %v5512_v5  ;;  %v6144_v29 = vld [vmem:[#allocation5 + $0x164] ss:$8 sps:$4 sm:$0xff]   ;;  %v5538_v30 = vld [vmem:[#allocation5 + $0x80] ss:$8 sps:$4 sm:$0xff]   ;;  %v5540_v31 = vld [vmem:[#allocation5 + $0x94] ss:$8 sps:$4 sm:$0xff]  }
  0x79   : > { %1023 = vmatprep.subr.bf16.mxu0 %v5513_v6  ;;  %v6147_v32 = vld [vmem:[#allocation5 + $0x160] ss:$8 sps:$4 sm:$0xff]   ;;  %v6150_v33 = vld [vmem:[#allocation5 + $0x174] ss:$8 sps:$4 sm:$0xff]   ;;  %v5544_v34 = vld [vmem:[#allocation5 + $0x90] ss:$8 sps:$4 sm:$0xff]  }
  0x7a   : > { %5351 = vmatpush1.bf16.msra.mxu1 %v6123_v16  ;;  %v5546_v35 = vld [vmem:[#allocation5 + $0xa4] ss:$8 sps:$4 sm:$0xff]   ;;  %v6154_v37 = vld [vmem:[#allocation5 + $0x170] ss:$8 sps:$4 sm:$0xff]   ;;  %v5550_v39 = vld [vmem:[#allocation5 + $0xa0] ss:$8 sps:$4 sm:$0xff]  }
  0x7b   : > { %5336 = vmatprep.subr.bf16.mxu1 %v6126_v17  ;;  %v5584_v36 = vld [vmem:[%s6099_s13 + $0x4] ss:$16 sps:$4 sm:$0xff]   ;;  %v6160_v41 = vld [vmem:[#allocation5 + $0x180] ss:$8 sps:$4 sm:$0xff]   ;;  %v5556_v43 = vld [vmem:[#allocation5 + $0xb0] ss:$8 sps:$4 sm:$0xff]  }
  0x7c   : > { %1024 = vmatpush1.bf16.msra.mxu0 %v5515_v9  ;;  %v6157_v38 = vld [vmem:[#allocation5 + $0x184] ss:$8 sps:$4 sm:$0xff]   ;;  %1049 = vmatprep.mubr.bf16.mxu0 %v5584_v36  ;;  %v5552_v40 = vld [vmem:[#allocation5 + $0xb4] ss:$8 sps:$4 sm:$0xff]   ;;  %v6166_v45 = vld [vmem:[#allocation5 + $0x190] ss:$8 sps:$4 sm:$0xff]  }
  0x7d   : > { %1025 = vmatprep.subr.bf16.mxu0 %v5516_v10  ;;  %v6163_v42 = vld [vmem:[#allocation5 + $0x194] ss:$8 sps:$4 sm:$0xff]   ;;  %v5558_v44 = vld [vmem:[#allocation5 + $0xc4] ss:$8 sps:$4 sm:$0xff]   ;;  %v5562_v47 = vld [vmem:[#allocation5 + $0xc0] ss:$8 sps:$4 sm:$0xff]  }
  0x7e   : > { %5352 = vmatpush1.bf16.msra.mxu1 %v6129_v20  ;;  %v6169_v46 = vld [vmem:[#allocation5 + $0x1a4] ss:$8 sps:$4 sm:$0xff]   ;;  %v5564_v48 = vld [vmem:[#allocation5 + $0xd4] ss:$8 sps:$4 sm:$0xff]   ;;  %v6172_v49 = vld [vmem:[#allocation5 + $0x1a0] ss:$8 sps:$4 sm:$0xff]  }
  0x7f   : > { %5337 = vmatprep.subr.bf16.mxu1 %v6132_v21  ;;  %v5613_v50 = vld [vmem:[%s6099_s13 + $0x6c] ss:$16 sps:$4 sm:$0xff]   ;;  %v5568_v52 = vld [vmem:[#allocation5 + $0xd0] ss:$8 sps:$4 sm:$0xff]   ;;  %v5574_v56 = vld [vmem:[#allocation5 + $0xe0] ss:$8 sps:$4 sm:$0xff]  }
  0x80   : > { %1026 = vmatpush1.bf16.msra.mxu0 %v5518_v13  ;;  %v6176_v51 = vld [vmem:[#allocation5 + $0x1b4] ss:$8 sps:$4 sm:$0xff]   ;;  %1272 = vmatprep.mubr.bf16.mxu1 %v5613_v50  ;;  %v5570_v53 = vld [vmem:[#allocation5 + $0xe4] ss:$8 sps:$4 sm:$0xff]   ;;  %v6179_v54 = vld [vmem:[#allocation5 + $0x1b0] ss:$8 sps:$4 sm:$0xff]  }
  0x81   : > { %1027 = vmatprep.subr.bf16.mxu0 %v5519_v14  ;;  %v6182_v55 = vld [vmem:[#allocation5 + $0x1c4] ss:$8 sps:$4 sm:$0xff]   ;;  %v5576_v57 = vld [vmem:[#allocation5 + $0xf4] ss:$8 sps:$4 sm:$0xff]   ;;  %v6185_v58 = vld [vmem:[#allocation5 + $0x1c0] ss:$8 sps:$4 sm:$0xff]  }
  0x82   : > { %5353 = vmatpush1.bf16.msra.mxu1 %v6135_v24  ;;  %v6188_v59 = vld [vmem:[#allocation5 + $0x1d4] ss:$8 sps:$4 sm:$0xff]   ;;  %v5580_v60 = vld [vmem:[#allocation5 + $0xf0] ss:$8 sps:$4 sm:$0xff]   ;;  %v6194_v62 = vld [vmem:[#allocation5 + $0x1e4] ss:$8 sps:$4 sm:$0xff]  }
  0x83   : > { %5338 = vmatprep.subr.bf16.mxu1 %v6138_v25  ;;  %v6191_v61 = vld [vmem:[#allocation5 + $0x1d0] ss:$8 sps:$4 sm:$0xff]   ;;  %v5591_v0 = vld [vmem:[%s6099_s13 + $0x24] ss:$16 sps:$4 sm:$0xff]   ;;  %v6200_v1 = vld [vmem:[#allocation5 + $0x1e0] ss:$8 sps:$4 sm:$0xff]  }
  0x84   : > { %1028 = vmatpush1.bf16.msra.mxu0 %v5521_v18  ;;  %v5582_v63 = vld [vmem:[%s6099_s13] ss:$16 sps:$4 sm:$0xff]   ;;  %v6203_v2 = vld [vmem:[#allocation5 + $0x1f4] ss:$8 sps:$4 sm:$0xff]   ;;  %v5611_v6 = vld [vmem:[%s6099_s13 + $0x68] ss:$16 sps:$4 sm:$0xff]  }
  0x85   : > { %1029 = vmatprep.subr.bf16.mxu0 %v5522_v19  ;;  %v6208_v3 = vld [vmem:[#allocation5 + $0x1f0] ss:$8 sps:$4 sm:$0xff]   ;;  %v5600_v5 = vld [vmem:[%s6099_s13 + $0x44] ss:$16 sps:$4 sm:$0xff]   ;;  %v5635_v19 = vld [vmem:[%s6099_s13 + $0xec] ss:$16 sps:$4 sm:$0xff]  }
  0x86   : > { %5354 = vmatpush1.bf16.msra.mxu1 %v6141_v28  ;;  %v5593_v4 = vld [vmem:[%s6099_s13 + $0x20] ss:$16 sps:$4 sm:$0xff]   ;;  %v5609_v9 = vld [vmem:[%s6099_s13 + $0x64] ss:$16 sps:$4 sm:$0xff]   ;;  %v5620_v10 = vld [vmem:[%s6099_s13 + $0x88] ss:$16 sps:$4 sm:$0xff]  }
  0x87   : > { %5339 = vmatprep.subr.bf16.mxu1 %v6144_v29  ;;  %v5615_v13 = vld [vmem:[%s6099_s13 + $0x84] ss:$16 sps:$4 sm:$0xff]   ;;  %v5626_v14 = vld [vmem:[%s6099_s13 + $0xa8] ss:$16 sps:$4 sm:$0xff]   ;;  %v5649_v36 = vld [vmem:[%s6099_s13 + $0x120] ss:$16 sps:$4 sm:$0xff]  }
  0x88   : > { %1030 = vmatpush1.bf16.msra.mxu0 %v5526_v22  ;;  %v5632_v18 = vld [vmem:[%s6099_s13 + $0xc8] ss:$16 sps:$4 sm:$0xff]   ;;  %vm4157_vm0 = vcmask 1041409   ;;  %vm4160_vm1 = vcmask 1042434   ;;  %vm4163_vm2 = vcmask 1043459   ;;  %vm4166_vm3 = vcmask 1044484  }
  0x89   : > { %1031 = vmatprep.subr.bf16.mxu0 %v5528_v23  ;;  %v5638_v22 = vld [vmem:[%s6099_s13 + $0xe8] ss:$16 sps:$4 sm:$0xff]   ;;  %v5641_v23 = vld [vmem:[%s6099_s13 + $0x10c] ss:$16 sps:$4 sm:$0xff]   ;;  %vm4169_vm4 = vcmask 1045509   ;;  %vm4172_vm5 = vcmask 1046534  }
  0x8a   : > { %5355 = vmatpush1.bf16.msra.mxu1 %v6147_v32  ;;  %v5680_v50 = vld [vmem:[%s6099_s13 + $0x1c8] ss:$16 sps:$4 sm:$0xff]   ;;  %vm4174_vm6 = vcmask 1047559   ;;  %vm4581_vm7 = vsmask.f32 4352  ;;  %s5107_s30 = sshll.u32 %s6095_s9, 5 }
  0x8b   : > { %5340 = vmatprep.subr.bf16.mxu1 %v6150_v33  ;;  %s245_s6 = scalar_lea.vmem [#allocation8], %s5107_s30  ;;  %s5276_s7 = sshll.u32 %s5944_s19, 9 }
  0x8c   : > { %1032 = vmatpush1.bf16.msra.mxu0 %v5532_v26  ;;  %v5644_v26 = vld [vmem:[%s6099_s13 + $0x108] ss:$16 sps:$4 sm:$0xff]   ;;  %s5002_s25 = sshll.u32 %s245_s6, 4  ;;  %s9330_s28 = scalar_lea.hbm %s9378_s4, %s5276_s7  ;;  %s9325_s25 = int_to_ptr.vmem [resolvable:$true] %s5002_s25 }
  0x8d   : > { %1033 = vmatprep.subr.bf16.mxu0 %v5534_v27  ;;  %v5647_v27 = vld [vmem:[%s6099_s13 + $0x12c] ss:$16 sps:$4 sm:$0xff]   ;;  %s4989_s27 = scalar_lea.sflag [#allocation4], %s6095_s9  ;;  %s5814_s29 = scalar_lea.vmem %s9325_s25, 512 }
  0x8e   : > { %5356 = vmatpush1.bf16.msra.mxu1 %v6154_v37  ;;  %p5815_p11 = scmp.ne.s32.totalorder %s9325_s25, %s5814_s29  ;;  %p10925_p0 = scmp.ne.s32.totalorder %s9841_s20, 0 }
  0x8f   : > { %5341 = vmatprep.subr.bf16.mxu1 %v6157_v38  ;;  %s5895_s19 = smov [#allocation8]  }
  0x90   : > { %1034 = vmatpush1.bf16.msra.mxu0 %v5538_v30  ;;  %v5650_v30 = vld [vmem:[%s6099_s13 + $0x128] ss:$16 sps:$4 sm:$0xff]   ;;  %p5816_p1 = pnand %p5815_p11, %p10925_p0  ;;  %s5818_s5 = sshll.u32 %s5895_s19, 4  ;;  %s5819_s5 = int_to_ptr.vmem [resolvable:$false] %s5818_s5 }
  0x91   : > { %1035 = vmatprep.subr.bf16.mxu0 %v5540_v31  ;;  %v5653_v31 = vld [vmem:[%s6099_s13 + $0x14c] ss:$16 sps:$4 sm:$0xff]   ;;  %s5820_s8 = scalar_lea.vmem %s5819_s5, 1024  ;;  %p5821_p5 = scmp.lt.s32.totalorder %s9325_s25, %s5819_s5 }
  0x92   : > { %5357 = vmatpush1.bf16.msra.mxu1 %v6160_v41  ;;  %p5817_p3 = pneg %p5816_p1  ;;  %p5822_p9 = scmp.lt.s32.totalorder %s5820_s8, %s5814_s29 }
  0x93   : > { %5342 = vmatprep.subr.bf16.mxu1 %v6163_v42 }
  0x94   : > { %1036 = vmatpush1.bf16.msra.mxu0 %v5544_v34  ;;  %v5656_v34 = vld [vmem:[%s6099_s13 + $0x148] ss:$16 sps:$4 sm:$0xff]   ;;  %p5823_p12 = por %p5822_p9, %p5821_p5 }
  0x95   : > { %1037 = vmatprep.subr.bf16.mxu0 %v5546_v35  ;;  %v5659_v35 = vld [vmem:[%s6099_s13 + $0x16c] ss:$16 sps:$4 sm:$0xff]  }
  0x96   : > { %5358 = vmatpush1.bf16.msra.mxu1 %v6166_v45  ;;  %p5824_p2 = pnand %p5823_p12, %p5817_p3 }
  0x97   : > { %5343 = vmatprep.subr.bf16.mxu1 %v6169_v46 }
  0x98   : > { %1038 = vmatpush1.bf16.msra.mxu0 %v5550_v39  ;;  %v5665_v39 = vld [vmem:[%s6099_s13 + $0x18c] ss:$16 sps:$4 sm:$0xff]  }
  0x99   : > { %1039 = vmatprep.subr.bf16.mxu0 %v5552_v40  ;;  %v5655_v40 = vld [vmem:[%s6099_s13 + $0x140] ss:$16 sps:$4 sm:$0xff]  }
  0x9a   : > { %5359 = vmatpush1.bf16.msra.mxu1 %v6172_v49 }
  0x9b   : > { %5344 = vmatprep.subr.bf16.mxu1 %v6176_v51 }
  0x9c   : > { %1040 = vmatpush1.bf16.msra.mxu0 %v5556_v43  ;;  %v5671_v43 = vld [vmem:[%s6099_s13 + $0x1ac] ss:$16 sps:$4 sm:$0xff]  }
  0x9d   : > { %1041 = vmatprep.subr.bf16.mxu0 %v5558_v44  ;;  %v5661_v44 = vld [vmem:[%s6099_s13 + $0x160] ss:$16 sps:$4 sm:$0xff]  }
  0x9e   : > { %5360 = vmatpush1.bf16.msra.mxu1 %v6179_v54 }
  0x9f   : > { %5345 = vmatprep.subr.bf16.mxu1 %v6182_v55 }
  0xa0   : > { %1042 = vmatpush1.bf16.msra.mxu0 %v5562_v47  ;;  %v5677_v47 = vld [vmem:[%s6099_s13 + $0x1cc] ss:$16 sps:$4 sm:$0xff]  }
  0xa1   : > { %1043 = vmatprep.subr.bf16.mxu0 %v5564_v48  ;;  %v5667_v48 = vld [vmem:[%s6099_s13 + $0x180] ss:$16 sps:$4 sm:$0xff]  }
  0xa2   : > { %5361 = vmatpush1.bf16.msra.mxu1 %v6185_v58 }
  0xa3   : > { %5346 = vmatprep.subr.bf16.mxu1 %v6188_v59 }
  0xa4   : > { %1044 = vmatpush1.bf16.msra.mxu0 %v5568_v52  ;;  %v5673_v52 = vld [vmem:[%s6099_s13 + $0x1a0] ss:$16 sps:$4 sm:$0xff]  }
  0xa5   : > { %1045 = vmatprep.subr.bf16.mxu0 %v5570_v53  ;;  %v5675_v53 = vld [vmem:[%s6099_s13 + $0x1c4] ss:$16 sps:$4 sm:$0xff]  }
  0xa6   : > { %5362 = vmatpush1.bf16.msra.mxu1 %v6191_v61 }
  0xa7   : > { %5347 = vmatprep.subr.bf16.mxu1 %v6194_v62 }
  0xa8   : > { %1046 = vmatpush1.bf16.msra.mxu0 %v5574_v56  ;;  %v5681_v56 = vld [vmem:[%s6099_s13 + $0x1e4] ss:$16 sps:$4 sm:$0xff]  }
  0xa9   : > { %1047 = vmatprep.subr.bf16.mxu0 %v5576_v57  ;;  %v5685_v57 = vld [vmem:[%s6099_s13 + $0x1e0] ss:$16 sps:$4 sm:$0xff]  }
  0xaa   : > { %5363 = vmatpush1.bf16.msra.mxu1 %v6200_v1 }
  0xab   : > { %5348 = vmatprep.subr.bf16.mxu1 %v6203_v2 }
  0xac   : > { %1048 = vmatpush1.bf16.msra.mxu0 %v5580_v60  ;;  %v5690_v60 = vld [vmem:[%s6099_s13 + $0x2c] ss:$16 sps:$4 sm:$0xff]  }
  0xad   : > { %1210 = vmatprep.subr.bf16.mxu0 %v6109_v7  ;;  %v5617_v7 = vld [vmem:[%s6099_s13 + $0x8c] ss:$16 sps:$4 sm:$0xff]  }
  0xae   : > { %5364 = vmatpush1.bf16.msra.mxu1 %v6208_v3 }
  0xaf   : > { %1050 = vmatmul.mubr.bf16.vlgmr.msra.gmra.mrb[0].mxu0 %v5582_v63  ;;  %v5695_v63 = vld [vmem:[%s6099_s13 + $0x48] ss:$16 sps:$4 sm:$0xff]  }
  0xb0   : > { %1211 = vmatpush1.bf16.msra.mxu0 %v6111_v8  ;;  %1059 = vmatprep.mubr.bf16.mxu0 %v5591_v0  ;;  %v5602_v8 = vld [vmem:[%s6099_s13 + $0x40] ss:$16 sps:$4 sm:$0xff]  }
  0xb1   : > { %1212 = vmatprep.subr.bf16.mxu0 %v6115_v11  ;;  %1273 = vmatmul.mubr.bf16.vlgmr.msra.gmra.mrb[0].mxu1 %v5611_v6  ;;  %v5623_v11 = vld [vmem:[%s6099_s13 + $0xac] ss:$16 sps:$4 sm:$0xff]   ;;  %v5696_v0 = vld [vmem:[#allocation7 + $0x40] sm:$0xff]  }
  0xb2   : > { %1282 = vmatprep.mubr.bf16.mxu1 %v5617_v7  ;;  %5277 = vmatprep.subr.bf16.mxu1 %v5696_v0  ;;  %v5702_v6 = vld [vmem:[#allocation7 + $0x58] sm:$0xff]  }
  0xb3   : > { %v5703_v7 = vld [vmem:[#allocation7 + $0x18] sm:$0xff]  }
  0xb4   : > { %1213 = vmatpush1.bf16.msra.mxu0 %v6117_v12  ;;  %v5614_v12 = vld [vmem:[%s6099_s13 + $0x60] ss:$16 sps:$4 sm:$0xff]  }
  0xb5   : > { %1214 = vmatprep.subr.bf16.mxu0 %v6120_v15  ;;  %v5629_v15 = vld [vmem:[%s6099_s13 + $0xcc] ss:$16 sps:$4 sm:$0xff]  }
  0xb7   : > { %1060 = vmatmul.mubr.bf16.gmra.mrb[4].mxu0 %v5593_v4  ;;  %v5700_v4 = vld [vmem:[#allocation7 + $0x50] sm:$0xff]  }
  0xb8   : > { %1069 = vmatprep.mubr.bf16.mxu0 %v5600_v5  ;;  %1215 = vmatpush1.bf16.msra.mxu0 %v6123_v16  ;;  %v5619_v16 = vld [vmem:[%s6099_s13 + $0x80] ss:$16 sps:$4 sm:$0xff]  }
  0xb9   : > { %1216 = vmatprep.subr.bf16.mxu0 %v6126_v17  ;;  %1283 = vmatmul.mubr.bf16.gmra.mrb[4].mxu1 %v5620_v10  ;;  %v5621_v17 = vld [vmem:[%s6099_s13 + $0xa4] ss:$16 sps:$4 sm:$0xff]  }
  0xba   : > { %1292 = vmatprep.mubr.bf16.mxu1 %v5623_v11  ;;  %v5701_v5 = vld [vmem:[#allocation7 + $0x10] sm:$0xff]  }
  0xbc   : > { %1217 = vmatpush1.bf16.msra.mxu0 %v6129_v20  ;;  %v5625_v20 = vld [vmem:[%s6099_s13 + $0xa0] ss:$16 sps:$4 sm:$0xff]  }
  0xbd   : > { %1218 = vmatprep.subr.bf16.mxu0 %v6132_v21  ;;  %v5627_v21 = vld [vmem:[%s6099_s13 + $0xc4] ss:$16 sps:$4 sm:$0xff]  }
  0xbf   : > { %1070 = vmatmul.mubr.bf16.gmra.mrb[8].mxu0 %v5602_v8 }
  0xc0   : > { %1079 = vmatprep.mubr.bf16.mxu0 %v5609_v9  ;;  %1219 = vmatpush1.bf16.msra.mxu0 %v6135_v24  ;;  %v5631_v24 = vld [vmem:[%s6099_s13 + $0xc0] ss:$16 sps:$4 sm:$0xff]  }
  0xc1   : > { %1220 = vmatprep.subr.bf16.mxu0 %v6138_v25  ;;  %1293 = vmatmul.mubr.bf16.gmra.mrb[8].mxu1 %v5626_v14  ;;  %v5633_v25 = vld [vmem:[%s6099_s13 + $0xe4] ss:$16 sps:$4 sm:$0xff]  }
  0xc2   : > { %1302 = vmatprep.mubr.bf16.mxu1 %v5629_v15  ;;  %v5704_v15 = vld [vmem:[#allocation7 + $0x60] sm:$0xff]  }
  0xc4   : > { %1221 = vmatpush1.bf16.msra.mxu0 %v6141_v28  ;;  %v5637_v28 = vld [vmem:[%s6099_s13 + $0xe0] ss:$16 sps:$4 sm:$0xff]  }
  0xc5   : > { %1222 = vmatprep.subr.bf16.mxu0 %v6144_v29  ;;  %v5639_v29 = vld [vmem:[%s6099_s13 + $0x104] ss:$16 sps:$4 sm:$0xff]  }
  0xc7   : > { %1080 = vmatmul.mubr.bf16.gmra.mrb[12].mxu0 %v5614_v12 }
  0xc8   : > { %1089 = vmatprep.mubr.bf16.mxu0 %v5615_v13  ;;  %1223 = vmatpush1.bf16.msra.mxu0 %v6147_v32  ;;  %v5643_v32 = vld [vmem:[%s6099_s13 + $0x100] ss:$16 sps:$4 sm:$0xff]  }
  0xc9   : > { %1224 = vmatprep.subr.bf16.mxu0 %v6150_v33  ;;  %1303 = vmatmul.mubr.bf16.gmra.mrb[12].mxu1 %v5632_v18  ;;  %v5645_v33 = vld [vmem:[%s6099_s13 + $0x124] ss:$16 sps:$4 sm:$0xff]  }
  0xca   : > { %1312 = vmatprep.mubr.bf16.mxu1 %v5635_v19 }
  0xcc   : > { %1225 = vmatpush1.bf16.msra.mxu0 %v6154_v37  ;;  %v5651_v37 = vld [vmem:[%s6099_s13 + $0x144] ss:$16 sps:$4 sm:$0xff]  }
  0xcd   : > { %1226 = vmatprep.subr.bf16.mxu0 %v6157_v38  ;;  %v5662_v38 = vld [vmem:[%s6099_s13 + $0x168] ss:$16 sps:$4 sm:$0xff]  }
  0xcf   : > { %1090 = vmatmul.mubr.bf16.gmra.mrb[16].mxu0 %v5619_v16  ;;  %v5705_v16 = vld [vmem:[#allocation7 + $0x20] sm:$0xff]  }
  0xd0   : > { %1099 = vmatprep.mubr.bf16.mxu0 %v5621_v17  ;;  %1227 = vmatpush1.bf16.msra.mxu0 %v6160_v41  ;;  %v5657_v41 = vld [vmem:[%s6099_s13 + $0x164] ss:$16 sps:$4 sm:$0xff]  }
  0xd1   : > { %1228 = vmatprep.subr.bf16.mxu0 %v6163_v42  ;;  %1313 = vmatmul.mubr.bf16.gmra.mrb[16].mxu1 %v5638_v22  ;;  %v5668_v42 = vld [vmem:[%s6099_s13 + $0x188] ss:$16 sps:$4 sm:$0xff]  }
  0xd2   : > { %1322 = vmatprep.mubr.bf16.mxu1 %v5641_v23 }
  0xd4   : > { %1229 = vmatpush1.bf16.msra.mxu0 %v6166_v45  ;;  %v5663_v45 = vld [vmem:[%s6099_s13 + $0x184] ss:$16 sps:$4 sm:$0xff]  }
  0xd5   : > { %1230 = vmatprep.subr.bf16.mxu0 %v6169_v46  ;;  %v5674_v46 = vld [vmem:[%s6099_s13 + $0x1a8] ss:$16 sps:$4 sm:$0xff]  }
  0xd7   : > { %1100 = vmatmul.mubr.bf16.gmra.mrb[20].mxu0 %v5625_v20 }
  0xd8   : > { %1109 = vmatprep.mubr.bf16.mxu0 %v5627_v21  ;;  %1231 = vmatpush1.bf16.msra.mxu0 %v6172_v49  ;;  %v5669_v49 = vld [vmem:[%s6099_s13 + $0x1a4] ss:$16 sps:$4 sm:$0xff]  }
  0xd9   : > { %1232 = vmatprep.subr.bf16.mxu0 %v6176_v51  ;;  %1323 = vmatmul.mubr.bf16.gmra.mrb[20].mxu1 %v5644_v26  ;;  %v5683_v51 = vld [vmem:[%s6099_s13 + $0x1ec] ss:$16 sps:$4 sm:$0xff]  }
  0xda   : > { %1332 = vmatprep.mubr.bf16.mxu1 %v5647_v27 }
  0xdc   : > { %1233 = vmatpush1.bf16.msra.mxu0 %v6179_v54  ;;  %v5686_v54 = vld [vmem:[%s6099_s13 + $0x1e8] ss:$16 sps:$4 sm:$0xff]  }
  0xdd   : > { %1234 = vmatprep.subr.bf16.mxu0 %v6182_v55  ;;  %v5679_v55 = vld [vmem:[%s6099_s13 + $0x1c0] ss:$16 sps:$4 sm:$0xff]  }
  0xdf   : > { %1110 = vmatmul.mubr.bf16.gmra.mrb[24].mxu0 %v5631_v24 }
  0xe0   : > { %1119 = vmatprep.mubr.bf16.mxu0 %v5633_v25  ;;  %1235 = vmatpush1.bf16.msra.mxu0 %v6185_v58  ;;  %v5689_v58 = vld [vmem:[%s6099_s13 + $0xc] ss:$16 sps:$4 sm:$0xff]  }
  0xe1   : > { %1236 = vmatprep.subr.bf16.mxu0 %v6188_v59  ;;  %1333 = vmatmul.mubr.bf16.gmra.mrb[24].mxu1 %v5650_v30  ;;  %v5687_v59 = vld [vmem:[%s6099_s13 + $0x8] ss:$16 sps:$4 sm:$0xff]  }
  0xe2   : > { %1342 = vmatprep.mubr.bf16.mxu1 %v5653_v31 }
  0xe4   : > { %1237 = vmatpush1.bf16.msra.mxu0 %v6191_v61  ;;  %v5692_v61 = vld [vmem:[%s6099_s13 + $0x28] ss:$16 sps:$4 sm:$0xff]  }
  0xe5   : > { %1238 = vmatprep.subr.bf16.mxu0 %v6194_v62  ;;  %v5693_v62 = vld [vmem:[%s6099_s13 + $0x4c] ss:$16 sps:$4 sm:$0xff]  }
  0xe7   : > { %1120 = vmatmul.mubr.bf16.gmra.mrb[28].mxu0 %v5637_v28 }
  0xe8   : > { %1129 = vmatprep.mubr.bf16.mxu0 %v5639_v29  ;;  %1239 = vmatpush1.bf16.msra.mxu0 %v6200_v1  ;;  %v5697_v1 = vld [vmem:[#allocation7] sm:$0xff]  }
  0xe9   : > { %1240 = vmatprep.subr.bf16.mxu0 %v6203_v2  ;;  %1343 = vmatmul.mubr.bf16.gmra.mrb[28].mxu1 %v5656_v34  ;;  %v5698_v2 = vld [vmem:[#allocation7 + $0x48] sm:$0xff]  }
  0xea   : > { %1352 = vmatprep.mubr.bf16.mxu1 %v5659_v35  ;;  %5278 = vmatpush3.bf16.msra.mxu1 %v5697_v1 }
  0xeb   : > { %5279 = vmatprep.subr.bf16.mxu1 %v5698_v2 }
  0xec   : > { %1241 = vmatpush1.bf16.msra.mxu0 %v6208_v3  ;;  %v5699_v3 = vld [vmem:[#allocation7 + $0x8] sm:$0xff]  }
  0xee   : > { %5280 = vmatpush3.bf16.msra.mxu1 %v5699_v3 }
  0xef   : > { %1130 = vmatmul.mubr.bf16.gmra.mrb[32].mxu0 %v5643_v32  ;;  %5281 = vmatprep.subr.bf16.mxu1 %v5700_v4 }
  0xf0   : > { %1139 = vmatprep.mubr.bf16.mxu0 %v5645_v33 }
  0xf1   : > { %1353 = vmatmul.mubr.bf16.gmra.mrb[32].mxu1 %v5662_v38 }
  0xf2   : > { %1362 = vmatprep.mubr.bf16.mxu1 %v5665_v39  ;;  %5282 = vmatpush3.bf16.msra.mxu1 %v5701_v5 }
  0xf3   : > { %5283 = vmatprep.subr.bf16.mxu1 %v5702_v6 }
  0xf6   : > { %5284 = vmatpush3.bf16.msra.mxu1 %v5703_v7 }
  0xf7   : > { %1140 = vmatmul.mubr.bf16.gmra.mrb[36].mxu0 %v5649_v36  ;;  %5285 = vmatprep.subr.bf16.mxu1 %v5704_v15 }
  0xf8   : > { %1149 = vmatprep.mubr.bf16.mxu0 %v5651_v37 }
  0xf9   : > { %1363 = vmatmul.mubr.bf16.gmra.mrb[36].mxu1 %v5668_v42 }
  0xfa   : > { %1372 = vmatprep.mubr.bf16.mxu1 %v5671_v43  ;;  %5286 = vmatpush3.bf16.msra.mxu1 %v5705_v16 }
  0xff   : > { %1150 = vmatmul.mubr.bf16.gmra.mrb[40].mxu0 %v5655_v40 }
 0x100   : > { %1159 = vmatprep.mubr.bf16.mxu0 %v5657_v41 }
 0x101   : > { %1373 = vmatmul.mubr.bf16.gmra.mrb[40].mxu1 %v5674_v46 }
 0x102   : > { %1382 = vmatprep.mubr.bf16.mxu1 %v5677_v47 }
 0x107   : > { %1160 = vmatmul.mubr.bf16.gmra.mrb[44].mxu0 %v5661_v44 }
 0x108   : > { %1169 = vmatprep.mubr.bf16.mxu0 %v5663_v45 }
 0x109   : > { %1383 = vmatmul.mubr.bf16.gmra.mrb[44].mxu1 %v5680_v50 }
 0x10a   : > { %1392 = vmatprep.mubr.bf16.mxu1 %v5683_v51 }
 0x10f   : > { %1170 = vmatmul.mubr.bf16.gmra.mrb[48].mxu0 %v5667_v48 }
 0x110   : > { %1179 = vmatprep.mubr.bf16.mxu0 %v5669_v49 }
 0x111   : > { %1393 = vmatmul.mubr.bf16.gmra.mrb[48].mxu1 %v5686_v54 }
 0x117   : > { %1180 = vmatmul.mubr.bf16.gmra.mrb[52].mxu0 %v5673_v52 }
 0x118   : > { %1189 = vmatprep.mubr.bf16.mxu0 %v5675_v53 }
 0x11f   : > { %1190 = vmatmul.mubr.bf16.gmra.mrb[56].mxu0 %v5679_v55 }
 0x120   : > { %1199 = vmatprep.mubr.bf16.mxu0 %v5681_v56 }
 0x127   : > { %1200 = vmatmul.mubr.bf16.gmra.mrb[60].mxu0 %v5685_v57 }
 0x128   : > { %1242 = vmatprep.mubr.bf16.mxu0 %v5689_v58 }
 0x12f   : > { %1243 = vmatmul.mubr.bf16.vlgmr.msra.gmra.mrb[0].mxu0 %v5687_v59 }
 0x130   : > { %1252 = vmatprep.mubr.bf16.mxu0 %v5690_v60 }
 0x137   : > { %1253 = vmatmul.mubr.bf16.gmra.mrb[4].mxu0 %v5692_v61 }
 0x138   : > { %1262 = vmatprep.mubr.bf16.mxu0 %v5693_v62 }
 0x13f   : > { %1263 = vmatmul.mubr.bf16.gmra.mrb[8].mxu0 %v5695_v63 }
 0x184   : > { %v1274_v8 = vpop.f32.mrb[0].mxu1 }
 0x185   : > { %v1276_v9 = vpop.f32.mrb[1].mxu1 }
 0x186   : > { %v1278_v10 = vpop.f32.mrb[2].mxu1 }
 0x187   : > { %v1280_v11 = vpop.f32.mrb[3].mxu1 }
 0x18c   : > { %v1284_v12 = vpop.f32.mrb[4].mxu1 }
 0x18d   : > { %v1286_v13 = vpop.f32.mrb[5].mxu1 }
 0x18e   : > { %v1288_v14 = vpop.f32.mrb[6].mxu1 }
 0x18f   : > { %v1290_v17 = vpop.f32.mrb[7].mxu1 }
 0x194   : > { %v6305_v23 = vpop.f32.mrb[8].mxu1 }
 0x195   : > { %v6309_v26 = vpop.f32.mrb[9].mxu1 }
 0x196   : > { %v6315_v30 = vpop.f32.mrb[10].mxu1 }
 0x197   : > { %v6319_v33 = vpop.f32.mrb[11].mxu1 }
 0x19a   : > { %v1081_v18 = vpop.f32.mrb[12].mxu0 }
 0x19b   : > { %v6301_v19 = vadd.f32 %v1274_v8, %v1081_v18  ;;  %v1083_v20 = vpop.f32.mrb[13].mxu0 }
 0x19c   : > { %v6303_v21 = vadd.f32 %v1276_v9, %v1083_v20  ;;  %v1085_v22 = vpop.f32.mrb[14].mxu0  ;;  %v6348_v56 = vpop.f32.mrb[12].mxu1 }
 0x19d   : > { %9846 = vst [vmem:[#allocation12_spill] sm:$0xff] %v6301_v19  ;;  %v6307_v24 = vadd.f32 %v1278_v10, %v1085_v22  ;;  %v1087_v25 = vpop.f32.mrb[15].mxu0  ;;  %v1439_v27 = vrot.slane %v6301_v19, 4  ;;  %v9387_v28 = vrot.slane %v6301_v19, 7  ;;  %v1953_v31 = vrot.slane %v6301_v19, 6  ;;  %v6358_v62 = vpop.f32.mrb[13].mxu1 }
 0x19e   : > { %9847 = vst [vmem:[#allocation13_spill] sm:$0xff] %v6303_v21  ;;  %v6313_v29 = vadd.f32 %v1280_v11, %v1087_v25  ;;  %v2687_v32 = vrot.slane %v6303_v21, 4  ;;  %v6363_v3 = vpop.f32.mrb[14].mxu1 }
 0x19f   : > { %9848 = vst [vmem:[#allocation14_spill] sm:$0xff] %v6307_v24  ;;  %v1440_v34 = vadd.f32 %v1439_v27, %v6301_v19  ;;  %v1445_v35 = vrot.slane %v6307_v24, 4  ;;  %v9386_v36 = vrot.slane %v6307_v24, 7  ;;  %v6327_v37 = vadd.f32 %v9387_v28, %v6301_v19  ;;  %v6367_v7 = vpop.f32.mrb[15].mxu1 }
 0x1a0   : > { %9849 = vst [vmem:[#allocation15_spill] sm:$0xff] %v6313_v29  ;;  %v2688_v38 = vadd.f32 %v2687_v32, %v6303_v21  ;;  %v2693_v39 = vrot.slane %v6313_v29, 4  ;;  %v1954_v45 = vrot.slane %v6307_v24, 6 }
 0x1a1   : > { %9850 = vst [vmem:[#allocation16_spill] sm:$0xff] %v6327_v37  ;;  %v1441_v40 = vrot.slane %v1440_v34, 2  ;;  %v1446_v41 = vadd.f32 %v1445_v35, %v6307_v24  ;;  %v6335_v42 = vadd.f32 %v9386_v36, %v6307_v24  ;;  %v6338_v43 = vadd.f32 %v1953_v31, %v6327_v37 }
 0x1a2   : > { %v1091_v44 = vpop.f32.mrb[16].mxu0  ;;  %v2689_v46 = vrot.slane %v2688_v38, 2  ;;  %v2694_v47 = vadd.f32 %v2693_v39, %v6313_v29 }
 0x1a3   : > { %9851 = vst [vmem:[#allocation17_spill] sm:$0xff] %v6335_v42  ;;  %9852 = vst [vmem:[#allocation18_spill] sm:$0xff] %v6338_v43  ;;  %v6343_v49 = vadd.f32 %v1284_v12, %v1091_v44  ;;  %v1093_v50 = vpop.f32.mrb[17].mxu0  ;;  %v1442_v51 = vadd.f32 %v1441_v40, %v1440_v34  ;;  %v1447_v52 = vrot.slane %v1446_v41, 2  ;;  %v6351_v57 = vadd.f32 %v1954_v45, %v6335_v42 }
 0x1a4   : > { %v6346_v54 = vadd.f32 %v1286_v13, %v1093_v50  ;;  %v1095_v55 = vpop.f32.mrb[18].mxu0  ;;  %v2241_v58 = vrot.slane %v6338_v43, 7  ;;  %v6354_v59 = vadd.f32 %v2689_v46, %v2688_v38  ;;  %v2695_v6 = vrot.slane %v2694_v47, 2  ;;  %v6404_v45 = vpop.f32.mrb[16].mxu1 }
 0x1a5   : > { %9853 = vst [vmem:[#allocation19_spill] sm:$0xff] %v6343_v49  ;;  %9855 = vst [vmem:[#allocation21_spill] sm:$0xff] %v6351_v57  ;;  %v6356_v60 = vadd.f32 %v1288_v14, %v1095_v55  ;;  %v1097_v61 = vpop.f32.mrb[19].mxu0  ;;  %v1443_v63 = vrot.slane %v1442_v51, 1  ;;  %v1448_v0 = vadd.f32 %v1447_v52, %v1446_v41  ;;  %v1451_v1 = vrot.slane %v6343_v49, 4 }
 0x1a6   : > { %9854 = vst [vmem:[#allocation20_spill] sm:$0xff] %v6346_v54  ;;  %v6361_v2 = vadd.f32 %v1290_v17, %v1097_v61  ;;  %v9385_v4 = vrot.slane %v6343_v49, 7  ;;  %v1955_v5 = vrot.slane %v6343_v49, 6  ;;  %v2242_v15 = vrot.slane %v6351_v57, 7 }
 0x1a7   : > { %9856 = vst [vmem:[#allocation22_spill] sm:$0xff] %v6356_v60  ;;  %v6369_v8 = vadd.f32 %v1443_v63, %v1442_v51  ;;  %v1449_v9 = vrot.slane %v1448_v0, 1  ;;  %v1452_v10 = vadd.f32 %v1451_v1, %v6343_v49  ;;  %v1457_v11 = vrot.slane %v6356_v60, 4 }
 0x1a8   : > { %9857 = vst [vmem:[#allocation23_spill] sm:$0xff] %v6361_v2  ;;  %v9384_v12 = vrot.slane %v6356_v60, 7  ;;  %v6377_v13 = vadd.f32 %v9385_v4, %v6343_v49  ;;  %v1956_v14 = vrot.slane %v6356_v60, 6  ;;  %v2052_v20 = vrot.slane %v6356_v60, 5 }
 0x1a9   : > { %9858 = vst [vmem:[#allocation24_spill] sm:$0xff] %v6369_v8  ;;  %v6381_v16 = vadd.f32 %v1449_v9, %v1448_v0  ;;  %v1453_v17 = vrot.slane %v1452_v10, 2  ;;  %v1458_v18 = vadd.f32 %v1457_v11, %v6356_v60  ;;  %v2177_v31 = vsub.f32 %v6369_v8, %v6301_v19  ;;  %v5709_v8 = vld [vmem:[#allocation7 + $0x30] sm:$0xff]  }
 0x1aa   : > { %9859 = vst [vmem:[#allocation25_spill] sm:$0xff] %v6377_v13  ;;  %v1101_v22 = vpop.f32.mrb[20].mxu0  ;;  %v6388_v25 = vadd.f32 %v9384_v12, %v6356_v60  ;;  %v6391_v27 = vadd.f32 %v1955_v5, %v6377_v13  ;;  %v2691_v32 = vrot.slane %v6354_v59, 1  ;;  %v6399_v40 = vadd.f32 %v2695_v6, %v2694_v47  ;;  %v6415_v47 = vpop.f32.mrb[17].mxu1 }
 0x1ab   : > { %9860 = vst [vmem:[#allocation26_spill] sm:$0xff] %v6381_v16  ;;  %v6397_v34 = vadd.f32 %v6305_v23, %v1101_v22  ;;  %v1103_v35 = vpop.f32.mrb[21].mxu0  ;;  %v1454_v38 = vadd.f32 %v1453_v17, %v1452_v10  ;;  %v1459_v39 = vrot.slane %v1458_v18, 2  ;;  %v2178_v50 = vsub.f32 %v6381_v16, %v6307_v24  ;;  %v6421_v0 = vpop.f32.mrb[18].mxu1  ;;  %v5706_v17 = vld [vmem:[#allocation7 + $0x68] sm:$0xff]   ;;  %v5708_v16 = vld [vmem:[#allocation7 + $0x70] sm:$0xff]  }
 0x1ac   : > { %9861 = vst [vmem:[#allocation27_spill] sm:$0xff] %v6388_v25  ;;  %9862 = vst [vmem:[#allocation28_spill] sm:$0xff] %v6391_v27  ;;  %v6402_v41 = vadd.f32 %v6309_v26, %v1103_v35  ;;  %v1105_v44 = vpop.f32.mrb[22].mxu0  ;;  %v6407_v46 = vadd.f32 %v1956_v14, %v6388_v25  ;;  %v2243_v23 = vrot.slane %v6391_v27, 7  ;;  %v6425_v6 = vsub.f32 %v2177_v31, %v2241_v58 }
 0x1ad   : > { %9863 = vst [vmem:[#allocation29_spill] sm:$0xff] %v6397_v34  ;;  %v6413_v51 = vadd.f32 %v6315_v30, %v1105_v44  ;;  %v1107_v52 = vpop.f32.mrb[23].mxu0  ;;  %v1455_v55 = vrot.slane %v1454_v38, 1  ;;  %v1460_v26 = vadd.f32 %v1459_v39, %v1458_v18  ;;  %v1463_v61 = vrot.slane %v6397_v34, 4  ;;  %v6427_v30 = vpop.f32.mrb[19].mxu1  ;;  %5287 = vmatprep.subr.bf16.mxu1 %v5706_v17 }
 0x1ae   : > { %9864 = vst [vmem:[#allocation30_spill] sm:$0xff] %v6402_v41  ;;  %v6419_v63 = vadd.f32 %v6319_v33, %v1107_v52  ;;  %v9383_v1 = vrot.slane %v6397_v34, 7  ;;  %v1957_v5 = vrot.slane %v6397_v34, 6  ;;  %9867 = vst [vmem:[#allocation33_spill] sm:$0xff] %v6425_v6  ;;  %v6441_v22 = vadd.f32 %v2052_v20, %v6407_v46 }
 0x1af   : > { %9865 = vst [vmem:[#allocation31_spill] sm:$0xff] %v6413_v51  ;;  %v6429_v9 = vadd.f32 %v1455_v55, %v1454_v38  ;;  %v1461_v10 = vrot.slane %v1460_v26, 1  ;;  %v1464_v11 = vadd.f32 %v1463_v61, %v6397_v34  ;;  %v1469_v14 = vrot.slane %v6413_v51, 4 }
 0x1b0   : > { %9866 = vst [vmem:[#allocation32_spill] sm:$0xff] %v6419_v63  ;;  %v9382_v33 = vrot.slane %v6413_v51, 7  ;;  %v6437_v18 = vadd.f32 %v9383_v1, %v6397_v34  ;;  %v1958_v58 = vrot.slane %v6413_v51, 6  ;;  %9870 = vst [vmem:[#allocation36_spill] sm:$0xff] %v6441_v22  ;;  %v2244_v39 = vrot.slane %v6407_v46, 7 }
 0x1b1   : > { %9868 = vst [vmem:[#allocation34_spill] sm:$0xff] %v6429_v9  ;;  %v6443_v31 = vadd.f32 %v1461_v10, %v1460_v26  ;;  %v1465_v35 = vrot.slane %v1464_v11, 2  ;;  %v1470_v38 = vadd.f32 %v1469_v14, %v6413_v51  ;;  %v2179_v20 = vsub.f32 %v6429_v9, %v6343_v49 }
 0x1b2   : > { %9869 = vst [vmem:[#allocation35_spill] sm:$0xff] %v6437_v18  ;;  %v1111_v44 = vpop.f32.mrb[24].mxu0  ;;  %v6450_v52 = vadd.f32 %v9382_v33, %v6413_v51  ;;  %v6453_v55 = vadd.f32 %v1957_v5, %v6437_v18  ;;  %v6457_v26 = vsub.f32 %v2178_v50, %v2242_v15  ;;  %v6463_v17 = vadd.f32 %v2691_v32, %v6354_v59  ;;  %v6468_v5 = vpop.f32.mrb[20].mxu1 }
 0x1b3   : > { %9871 = vst [vmem:[#allocation37_spill] sm:$0xff] %v6443_v31  ;;  %v6460_v61 = vadd.f32 %v6348_v56, %v1111_v44  ;;  %v1113_v10 = vpop.f32.mrb[25].mxu0  ;;  %v1466_v46 = vadd.f32 %v1465_v35, %v1464_v11  ;;  %v1471_v14 = vrot.slane %v1470_v38, 2  ;;  %v2180_v15 = vsub.f32 %v6443_v31, %v6356_v60  ;;  %v6479_v59 = vpop.f32.mrb[21].mxu1 }
 0x1b4   : > { %9872 = vst [vmem:[#allocation38_spill] sm:$0xff] %v6450_v52  ;;  %9873 = vst [vmem:[#allocation39_spill] sm:$0xff] %v6453_v55  ;;  %v6466_v33 = vadd.f32 %v6358_v62, %v1113_v10  ;;  %v1115_v1 = vpop.f32.mrb[26].mxu0  ;;  %v6471_v12 = vadd.f32 %v1958_v58, %v6450_v52  ;;  %v2245_v56 = vrot.slane %v6453_v55, 7  ;;  %v6485_v58 = vpop.f32.mrb[22].mxu1  ;;  %v5707_v10 = vld [vmem:[#allocation7 + $0x28] sm:$0xff]   ;;  %v6489_v28 = vsub.f32 %v2179_v20, %v2243_v23 }
 0x1b5   : > { %9874 = vst [vmem:[#allocation40_spill] sm:$0xff] %v6457_v26  ;;  %9875 = vst [vmem:[#allocation41_spill] sm:$0xff] %v6460_v61  ;;  %v6477_v50 = vadd.f32 %v6363_v3, %v1115_v1  ;;  %v1117_v11 = vpop.f32.mrb[27].mxu0  ;;  %v1467_v32 = vrot.slane %v1466_v46, 1  ;;  %v1472_v62 = vadd.f32 %v1471_v14, %v1470_v38  ;;  %v1475_v35 = vrot.slane %v6460_v61, 4  ;;  %v6491_v3 = vpop.f32.mrb[23].mxu1  ;;  %5288 = vmatpush3.bf16.msra.mxu1 %v5707_v10 }
 0x1b6   : > { %9876 = vst [vmem:[#allocation42_spill] sm:$0xff] %v6463_v17  ;;  %9877 = vst [vmem:[#allocation43_spill] sm:$0xff] %v6466_v33  ;;  %v6483_v44 = vadd.f32 %v6367_v7, %v1117_v11  ;;  %v9389_v4 = vrot.slane %v6460_v61, 7  ;;  %v1959_v36 = vrot.slane %v6460_v61, 6  ;;  %v2246_v20 = vrot.slane %v6471_v12, 7  ;;  %v6528_v42 = vpop.f32.mrb[24].mxu1  ;;  %5289 = vmatprep.subr.bf16.mxu1 %v5708_v16 }
 0x1b7   : > { %9878 = vst [vmem:[#allocation44_spill] sm:$0xff] %v6471_v12  ;;  %9879 = vst [vmem:[#allocation45_spill] sm:$0xff] %v6477_v50  ;;  %v6493_v1 = vadd.f32 %v1467_v32, %v1466_v46  ;;  %v1473_v53 = vrot.slane %v1472_v62, 1  ;;  %v1476_v38 = vadd.f32 %v1475_v35, %v6460_v61  ;;  %v1481_v14 = vrot.slane %v6477_v50, 4 }
 0x1b8   : > { %9880 = vst [vmem:[#allocation46_spill] sm:$0xff] %v6483_v44  ;;  %9881 = vst [vmem:[#allocation47_spill] sm:$0xff] %v6489_v28  ;;  %v9393_v7 = vrot.slane %v6477_v50, 7  ;;  %v6501_v11 = vadd.f32 %v9389_v4, %v6460_v61  ;;  %v1960_v23 = vrot.slane %v6477_v50, 6  ;;  %v6508_v35 = vsub.f32 %v2180_v15, %v2244_v39 }
 0x1b9   : > { %9882 = vst [vmem:[#allocation48_spill] sm:$0xff] %v6493_v1  ;;  %v6505_v48 = vadd.f32 %v1473_v53, %v1472_v62  ;;  %v1477_v46 = vrot.slane %v1476_v38, 2  ;;  %v1482_v32 = vadd.f32 %v1481_v14, %v6477_v50  ;;  %v2181_v18 = vsub.f32 %v6493_v1, %v6397_v34  ;;  %5290 = vmatpush3.bf16.msra.mxu1 %v5709_v8 }
 0x1ba   : > { %9883 = vst [vmem:[#allocation49_spill] sm:$0xff] %v6501_v11  ;;  %9885 = vst [vmem:[#allocation51_spill] sm:$0xff] %v6508_v35  ;;  %v1121_v52 = vpop.f32.mrb[28].mxu0  ;;  %v6513_v10 = vadd.f32 %v9393_v7, %v6477_v50  ;;  %v6516_v4 = vadd.f32 %v1959_v36, %v6501_v11  ;;  %v2697_v53 = vrot.slane %v6399_v40, 1  ;;  %v2699_v25 = vrot.slane %v6346_v54, 4 }
 0x1bb   : > { %9884 = vst [vmem:[#allocation50_spill] sm:$0xff] %v6505_v48  ;;  %v6522_v62 = vadd.f32 %v6404_v45, %v1121_v52  ;;  %v1123_v14 = vpop.f32.mrb[29].mxu0  ;;  %v1478_v39 = vadd.f32 %v1477_v46, %v1476_v38  ;;  %v1483_v15 = vrot.slane %v1482_v32, 2  ;;  %v2182_v11 = vsub.f32 %v6505_v48, %v6413_v51  ;;  %v6539_v46 = vpop.f32.mrb[25].mxu1 }
 0x1bc   : > { %9886 = vst [vmem:[#allocation52_spill] sm:$0xff] %v6513_v10  ;;  %9887 = vst [vmem:[#allocation53_spill] sm:$0xff] %v6516_v4  ;;  %v6526_v13 = vadd.f32 %v6415_v47, %v1123_v14  ;;  %v1125_v7 = vpop.f32.mrb[30].mxu0  ;;  %v6531_v36 = vadd.f32 %v1960_v23, %v6513_v10  ;;  %v2247_v45 = vrot.slane %v6516_v4, 7  ;;  %v6545_v23 = vpop.f32.mrb[26].mxu1  ;;  %v6549_v1 = vsub.f32 %v2181_v18, %v2245_v56 }
 0x1bd   : > { %9888 = vst [vmem:[#allocation54_spill] sm:$0xff] %v6522_v62  ;;  %v6537_v52 = vadd.f32 %v6421_v0, %v1125_v7  ;;  %v1127_v38 = vpop.f32.mrb[31].mxu0  ;;  %v1479_v37 = vrot.slane %v1478_v39, 1  ;;  %v1484_v47 = vadd.f32 %v1483_v15, %v1482_v32  ;;  %v1487_v14 = vrot.slane %v6522_v62, 4  ;;  %v6551_v0 = vpop.f32.mrb[27].mxu1 }
 0x1be   : > { %9889 = vst [vmem:[#allocation55_spill] sm:$0xff] %v6526_v13  ;;  %9890 = vst [vmem:[#allocation56_spill] sm:$0xff] %v6531_v36  ;;  %v6543_v60 = vadd.f32 %v6427_v30, %v1127_v38  ;;  %v9414_v10 = vrot.slane %v6522_v62, 7  ;;  %v1961_v48 = vrot.slane %v6522_v62, 6  ;;  %v2248_v18 = vrot.slane %v6531_v36, 7  ;;  %v5710_v30 = vld [vmem:[#allocation7 + $0x78] sm:$0xff]  }
 0x1bf   : > { %9891 = vst [vmem:[#allocation57_spill] sm:$0xff] %v6537_v52  ;;  %9893 = vst [vmem:[#allocation59_spill] sm:$0xff] %v6549_v1  ;;  %v6553_v7 = vadd.f32 %v1479_v37, %v1478_v39  ;;  %v1485_v31 = vrot.slane %v1484_v47, 1  ;;  %v1488_v32 = vadd.f32 %v1487_v14, %v6522_v62  ;;  %v1493_v15 = vrot.slane %v6537_v52, 4  ;;  %5291 = vmatprep.subr.bf16.mxu1 %v5710_v30 }
 0x1c0   : > { %9892 = vst [vmem:[#allocation58_spill] sm:$0xff] %v6543_v60  ;;  %v6561_v38 = vadd.f32 %v9414_v10, %v6522_v62  ;;  %v1962_v22 = vrot.slane %v6537_v52, 6  ;;  %v6568_v9 = vsub.f32 %v2182_v11, %v2246_v20  ;;  %v9898_v4 = vrot.slane %v6537_v52, 7 }
 0x1c1   : > { %9894 = vst [vmem:[#allocation60_spill] sm:$0xff] %v6553_v7  ;;  %v6565_v56 = vadd.f32 %v1485_v31, %v1484_v47  ;;  %v1489_v37 = vrot.slane %v1488_v32, 2  ;;  %v1494_v39 = vadd.f32 %v1493_v15, %v6537_v52  ;;  %v2183_v31 = vsub.f32 %v6553_v7, %v6460_v61 }
 0x1c2   : > { %9895 = vst [vmem:[#allocation61_spill] sm:$0xff] %v6561_v38  ;;  %9897 = vst [vmem:[#allocation63_spill] sm:$0xff] %v6568_v9  ;;  %v1131_v14 = vpop.f32.mrb[32].mxu0  ;;  %v6573_v10 = vadd.f32 %v9898_v4, %v6537_v52  ;;  %v6576_v12 = vadd.f32 %v1961_v48, %v6561_v38  ;;  %v6581_v47 = vadd.f32 %v2697_v53, %v6399_v40  ;;  %v6592_v38 = vpop.f32.mrb[28].mxu1 }
 0x1c3   : > { %9896 = vst [vmem:[#allocation62_spill] sm:$0xff] %v6565_v56  ;;  %v6584_v11 = vadd.f32 %v6468_v5, %v1131_v14  ;;  %v1133_v20 = vpop.f32.mrb[33].mxu0  ;;  %v1490_v15 = vadd.f32 %v1489_v37, %v1488_v32  ;;  %v1495_v36 = vrot.slane %v1494_v39, 2  ;;  %v6587_v55 = vadd.f32 %v2699_v25, %v6346_v54  ;;  %v6603_v32 = vpop.f32.mrb[29].mxu1 }
 0x1c4   : > { %9899 = vst [vmem:[#allocation64_spill] sm:$0xff] %v6573_v10  ;;  %9900 = vst [vmem:[#allocation65_spill] sm:$0xff] %v6576_v12  ;;  %v6590_v4 = vadd.f32 %v6479_v59, %v1133_v20  ;;  %v1135_v48 = vpop.f32.mrb[34].mxu0  ;;  %v6595_v7 = vadd.f32 %v1962_v22, %v6573_v10  ;;  %v2184_v40 = vsub.f32 %v6565_v56, %v6477_v50  ;;  %v2249_v5 = vrot.slane %v6576_v12, 7  ;;  %v5711_v59 = vld [vmem:[#allocation7 + $0x38] sm:$0xff]   ;;  %v6609_v20 = vpop.f32.mrb[30].mxu1 }
 0x1c5   : > { %9901 = vst [vmem:[#allocation66_spill] sm:$0xff] %v6581_v47  ;;  %9902 = vst [vmem:[#allocation67_spill] sm:$0xff] %v6584_v11  ;;  %v6601_v53 = vadd.f32 %v6485_v58, %v1135_v48  ;;  %v1137_v25 = vpop.f32.mrb[35].mxu0  ;;  %v1491_v37 = vrot.slane %v1490_v15, 1  ;;  %v1496_v14 = vadd.f32 %v1495_v36, %v1494_v39  ;;  %v1499_v16 = vrot.slane %v6584_v11, 4  ;;  %v6615_v56 = vpop.f32.mrb[31].mxu1  ;;  %5292 = vmatpush3.bf16.msra.mxu1 %v5711_v59 }
 0x1c6   : > { %9903 = vst [vmem:[#allocation68_spill] sm:$0xff] %v6590_v4  ;;  %9904 = vst [vmem:[#allocation69_spill] sm:$0xff] %v6595_v7  ;;  %v6607_v22 = vadd.f32 %v6491_v3, %v1137_v25  ;;  %v9427_v10 = vrot.slane %v6584_v11, 7  ;;  %v1963_v58 = vrot.slane %v6584_v11, 6  ;;  %v6613_v48 = vsub.f32 %v2183_v31, %v2247_v45  ;;  %v6652_v51 = vpop.f32.mrb[32].mxu1 }
 0x1c7   : > { %9905 = vst [vmem:[#allocation70_spill] sm:$0xff] %v6601_v53  ;;  %v6617_v8 = vadd.f32 %v1491_v37, %v1490_v15  ;;  %v1497_v12 = vrot.slane %v1496_v14, 1  ;;  %v1500_v36 = vadd.f32 %v1499_v16, %v6584_v11  ;;  %v1505_v39 = vrot.slane %v6601_v53, 4 }
 0x1c8   : > { %9906 = vst [vmem:[#allocation71_spill] sm:$0xff] %v6607_v22  ;;  %9907 = vst [vmem:[#allocation72_spill] sm:$0xff] %v6613_v48  ;;  %v9434_v3 = vrot.slane %v6601_v53, 7  ;;  %v6625_v30 = vadd.f32 %v9427_v10, %v6584_v11  ;;  %v1964_v25 = vrot.slane %v6601_v53, 6  ;;  %v2250_v45 = vrot.slane %v6595_v7, 7 }
 0x1c9   : > { %9908 = vst [vmem:[#allocation73_spill] sm:$0xff] %v6617_v8  ;;  %v6629_v31 = vadd.f32 %v1497_v12, %v1496_v14  ;;  %v1501_v15 = vrot.slane %v1500_v36, 2  ;;  %v1506_v37 = vadd.f32 %v1505_v39, %v6601_v53  ;;  %v2060_v16 = vrot.slane %v6601_v53, 5 }
 0x1ca   : > { %9909 = vst [vmem:[#allocation74_spill] sm:$0xff] %v6625_v30  ;;  %v1141_v27 = vpop.f32.mrb[36].mxu0  ;;  %v6636_v57 = vadd.f32 %v9434_v3, %v6601_v53  ;;  %v6639_v10 = vadd.f32 %v1963_v58, %v6625_v30  ;;  %v2185_v7 = vsub.f32 %v6617_v8, %v6522_v62  ;;  %v6643_v59 = vsub.f32 %v2184_v40, %v2248_v18 }
 0x1cb   : > { %9910 = vst [vmem:[#allocation75_spill] sm:$0xff] %v6629_v31  ;;  %v6646_v12 = vadd.f32 %v6528_v42, %v1141_v27  ;;  %v1143_v14 = vpop.f32.mrb[37].mxu0  ;;  %v1502_v39 = vadd.f32 %v1501_v15, %v1500_v36  ;;  %v1507_v43 = vrot.slane %v1506_v37, 2  ;;  %v2701_v50 = vrot.slane %v6587_v55, 2  ;;  %v6663_v36 = vpop.f32.mrb[33].mxu1 }
 0x1cc   : > { %9911 = vst [vmem:[#allocation76_spill] sm:$0xff] %v6636_v57  ;;  %9912 = vst [vmem:[#allocation77_spill] sm:$0xff] %v6639_v10  ;;  %v6650_v61 = vadd.f32 %v6539_v46, %v1143_v14  ;;  %v1145_v3 = vpop.f32.mrb[38].mxu0  ;;  %v6655_v58 = vadd.f32 %v1964_v25, %v6636_v57  ;;  %v2186_v18 = vsub.f32 %v6629_v31, %v6537_v52  ;;  %v2251_v42 = vrot.slane %v6639_v10, 7  ;;  %v6669_v25 = vpop.f32.mrb[34].mxu1 }
 0x1cd   : > { %9913 = vst [vmem:[#allocation78_spill] sm:$0xff] %v6643_v59  ;;  %9914 = vst [vmem:[#allocation79_spill] sm:$0xff] %v6646_v12  ;;  %v6661_v27 = vadd.f32 %v6545_v23, %v1145_v3  ;;  %v1147_v40 = vpop.f32.mrb[39].mxu0  ;;  %v1503_v15 = vrot.slane %v1502_v39, 1  ;;  %v1508_v46 = vadd.f32 %v1507_v43, %v1506_v37  ;;  %v1511_v14 = vrot.slane %v6646_v12, 4  ;;  %v6675_v23 = vpop.f32.mrb[35].mxu1 }
 0x1ce   : > { %9915 = vst [vmem:[#allocation80_spill] sm:$0xff] %v6650_v61  ;;  %v6667_v30 = vadd.f32 %v6551_v0, %v1147_v40  ;;  %v9450_v57 = vrot.slane %v6646_v12, 7  ;;  %v1965_v31 = vrot.slane %v6646_v12, 6  ;;  %v6673_v8 = vsub.f32 %v2185_v7, %v2249_v5 }
 0x1cf   : > { %9916 = vst [vmem:[#allocation81_spill] sm:$0xff] %v6661_v27  ;;  %v6677_v3 = vadd.f32 %v1503_v15, %v1502_v39  ;;  %v1509_v10 = vrot.slane %v1508_v46, 1  ;;  %v1512_v43 = vadd.f32 %v1511_v14, %v6646_v12  ;;  %v1517_v37 = vrot.slane %v6661_v27, 4 }
 0x1d0   : > { %9917 = vst [vmem:[#allocation82_spill] sm:$0xff] %v6667_v30  ;;  %9918 = vst [vmem:[#allocation83_spill] sm:$0xff] %v6673_v8  ;;  %v9454_v0 = vrot.slane %v6661_v27, 7  ;;  %v6685_v40 = vadd.f32 %v9450_v57, %v6646_v12  ;;  %v1966_v52 = vrot.slane %v6661_v27, 6  ;;  %v6689_v7 = vadd.f32 %v2060_v16, %v6655_v58 }
 0x1d1   : > { %9919 = vst [vmem:[#allocation84_spill] sm:$0xff] %v6677_v3  ;;  %v6691_v5 = vadd.f32 %v1509_v10, %v1508_v46  ;;  %v1513_v39 = vrot.slane %v1512_v43, 2  ;;  %v1518_v15 = vadd.f32 %v1517_v37, %v6661_v27  ;;  %v2252_v14 = vrot.slane %v6655_v58, 7 }
 0x1d2   : > { %9920 = vst [vmem:[#allocation85_spill] sm:$0xff] %v6685_v40  ;;  %9921 = vst [vmem:[#allocation86_spill] sm:$0xff] %v6689_v7  ;;  %v1151_v62 = vpop.f32.mrb[40].mxu0  ;;  %v6698_v34 = vadd.f32 %v9454_v0, %v6661_v27  ;;  %v6701_v57 = vadd.f32 %v1965_v31, %v6685_v40  ;;  %v2187_v16 = vsub.f32 %v6677_v3, %v6584_v11  ;;  %v6716_v31 = vpop.f32.mrb[36].mxu1 }
 0x1d3   : > { %9922 = vst [vmem:[#allocation87_spill] sm:$0xff] %v6691_v5  ;;  %v6705_v7 = vsub.f32 %v2186_v18, %v2250_v45  ;;  %v6708_v10 = vadd.f32 %v6592_v38, %v1151_v62  ;;  %v1153_v46 = vpop.f32.mrb[41].mxu0  ;;  %v1514_v37 = vadd.f32 %v1513_v39, %v1512_v43  ;;  %v1519_v58 = vrot.slane %v1518_v15, 2 }
 0x1d4   : > { %9923 = vst [vmem:[#allocation88_spill] sm:$0xff] %v6698_v34  ;;  %9924 = vst [vmem:[#allocation89_spill] sm:$0xff] %v6701_v57  ;;  %v6711_v49 = vadd.f32 %v2701_v50, %v6587_v55  ;;  %v6714_v0 = vadd.f32 %v6603_v32, %v1153_v46  ;;  %v1155_v24 = vpop.f32.mrb[42].mxu0  ;;  %v6719_v40 = vadd.f32 %v1966_v52, %v6698_v34  ;;  %v2253_v62 = vrot.slane %v6701_v57, 7  ;;  %v6727_v55 = vpop.f32.mrb[37].mxu1 }
 0x1d5   : > { %9925 = vst [vmem:[#allocation90_spill] sm:$0xff] %v6705_v7  ;;  %9926 = vst [vmem:[#allocation91_spill] sm:$0xff] %v6708_v10  ;;  %v2188_v45 = vsub.f32 %v6691_v5, %v6601_v53  ;;  %v6725_v38 = vadd.f32 %v6609_v20, %v1155_v24  ;;  %v1157_v18 = vpop.f32.mrb[43].mxu0  ;;  %v1515_v50 = vrot.slane %v1514_v37, 1  ;;  %v1520_v32 = vadd.f32 %v1519_v58, %v1518_v15  ;;  %v6733_v52 = vpop.f32.mrb[38].mxu1 }
 0x1d6   : > { %9927 = vst [vmem:[#allocation92_spill] sm:$0xff] %v6714_v0  ;;  %9928 = vst [vmem:[#allocation93_spill] sm:$0xff] %v6719_v40  ;;  %v1523_v43 = vrot.slane %v6708_v10, 4  ;;  %v6731_v39 = vadd.f32 %v6615_v56, %v1157_v18  ;;  %v9468_v46 = vrot.slane %v6708_v10, 7  ;;  %v1967_v34 = vrot.slane %v6708_v10, 6  ;;  %v6739_v24 = vpop.f32.mrb[39].mxu1 }
 0x1d7   : > { %9929 = vst [vmem:[#allocation94_spill] sm:$0xff] %v6725_v38  ;;  %v6737_v53 = vsub.f32 %v2187_v16, %v2251_v42  ;;  %v6741_v20 = vadd.f32 %v1515_v50, %v1514_v37  ;;  %v1521_v5 = vrot.slane %v1520_v32, 1  ;;  %v1529_v58 = vrot.slane %v6725_v38, 4 }
 0x1d8   : > { %9930 = vst [vmem:[#allocation95_spill] sm:$0xff] %v6731_v39  ;;  %v1524_v15 = vadd.f32 %v1523_v43, %v6708_v10  ;;  %v9472_v56 = vrot.slane %v6725_v38, 7  ;;  %v6749_v18 = vadd.f32 %v9468_v46, %v6708_v10  ;;  %v1968_v3 = vrot.slane %v6725_v38, 6 }
 0x1d9   : > { %9931 = vst [vmem:[#allocation96_spill] sm:$0xff] %v6737_v53  ;;  %9932 = vst [vmem:[#allocation97_spill] sm:$0xff] %v6741_v20  ;;  %v2254_v42 = vrot.slane %v6719_v40, 7  ;;  %v6753_v16 = vadd.f32 %v1521_v5, %v1520_v32  ;;  %v1530_v50 = vadd.f32 %v1529_v58, %v6725_v38  ;;  %v6756_v57 = vsub.f32 %v2188_v45, %v2252_v14  ;;  %v6776_v53 = vpop.f32.mrb[40].mxu1 }
 0x1da   : > { %9933 = vst [vmem:[#allocation98_spill] sm:$0xff] %v6749_v18  ;;  %v1525_v37 = vrot.slane %v1524_v15, 2  ;;  %v1161_v43 = vpop.f32.mrb[44].mxu0  ;;  %v6761_v11 = vadd.f32 %v9472_v56, %v6725_v38  ;;  %v6764_v46 = vadd.f32 %v1967_v34, %v6749_v18  ;;  %v2189_v19 = vsub.f32 %v6741_v20, %v6646_v12 }
 0x1db   : > { %9934 = vst [vmem:[#allocation99_spill] sm:$0xff] %v6753_v16  ;;  %9935 = vst [vmem:[#allocation100_spill] sm:$0xff] %v6756_v57  ;;  %v2703_v5 = vrot.slane %v6711_v49, 1  ;;  %v6770_v32 = vadd.f32 %v6652_v51, %v1161_v43  ;;  %v1163_v58 = vpop.f32.mrb[45].mxu0  ;;  %v1531_v45 = vrot.slane %v1530_v50, 2  ;;  %v2705_v40 = vrot.slane %v6361_v2, 4 }
 0x1dc   : > { %9936 = vst [vmem:[#allocation101_spill] sm:$0xff] %v6761_v11  ;;  %9937 = vst [vmem:[#allocation102_spill] sm:$0xff] %v6764_v46  ;;  %v1526_v14 = vadd.f32 %v1525_v37, %v1524_v15  ;;  %v6774_v57 = vadd.f32 %v6663_v36, %v1163_v58  ;;  %v1165_v56 = vpop.f32.mrb[46].mxu0  ;;  %v6779_v34 = vadd.f32 %v1968_v3, %v6761_v11  ;;  %v2255_v51 = vrot.slane %v6764_v46, 7  ;;  %v6787_v37 = vpop.f32.mrb[41].mxu1 }
 0x1dd   : > { %9938 = vst [vmem:[#allocation103_spill] sm:$0xff] %v6770_v32  ;;  %v2190_v18 = vsub.f32 %v6753_v16, %v6661_v27  ;;  %v6785_v43 = vadd.f32 %v6669_v25, %v1165_v56  ;;  %v1167_v15 = vpop.f32.mrb[47].mxu0  ;;  %v1532_v36 = vadd.f32 %v1531_v45, %v1530_v50  ;;  %v1535_v58 = vrot.slane %v6770_v32, 4  ;;  %v6793_v3 = vpop.f32.mrb[42].mxu1 }
 0x1de   : > { %9939 = vst [vmem:[#allocation104_spill] sm:$0xff] %v6774_v57  ;;  %9940 = vst [vmem:[#allocation105_spill] sm:$0xff] %v6779_v34  ;;  %v1527_v20 = vrot.slane %v1526_v14, 1  ;;  %v6791_v12 = vadd.f32 %v6675_v23, %v1167_v15  ;;  %v9484_v11 = vrot.slane %v6770_v32, 7  ;;  %v1969_v16 = vrot.slane %v6770_v32, 6  ;;  %v6799_v25 = vpop.f32.mrb[43].mxu1 }
 0x1df   : > { %9941 = vst [vmem:[#allocation106_spill] sm:$0xff] %v6785_v43  ;;  %v6797_v46 = vsub.f32 %v2189_v19, %v2253_v62  ;;  %v1533_v27 = vrot.slane %v1532_v36, 1  ;;  %v1536_v50 = vadd.f32 %v1535_v58, %v6770_v32  ;;  %v1541_v45 = vrot.slane %v6785_v43, 4 }
 0x1e0   : > { %9942 = vst [vmem:[#allocation107_spill] sm:$0xff] %v6791_v12  ;;  %v6801_v56 = vadd.f32 %v1527_v20, %v1526_v14  ;;  %v9486_v23 = vrot.slane %v6785_v43, 7  ;;  %v6809_v15 = vadd.f32 %v9484_v11, %v6770_v32  ;;  %v1970_v7 = vrot.slane %v6785_v43, 6 }
 0x1e1   : > { %9943 = vst [vmem:[#allocation108_spill] sm:$0xff] %v6797_v46  ;;  %v2256_v19 = vrot.slane %v6779_v34, 7  ;;  %v6813_v62 = vadd.f32 %v1533_v27, %v1532_v36  ;;  %v1537_v20 = vrot.slane %v1536_v50, 2  ;;  %v1542_v14 = vadd.f32 %v1541_v45, %v6785_v43 }
 0x1e2   : > { %9944 = vst [vmem:[#allocation109_spill] sm:$0xff] %v6801_v56  ;;  %9945 = vst [vmem:[#allocation110_spill] sm:$0xff] %v6809_v15  ;;  %v6816_v46 = vsub.f32 %v2190_v18, %v2254_v42  ;;  %v1171_v58 = vpop.f32.mrb[48].mxu0  ;;  %v6821_v8 = vadd.f32 %v9486_v23, %v6785_v43  ;;  %v6824_v11 = vadd.f32 %v1969_v16, %v6809_v15  ;;  %v6838_v16 = vpop.f32.mrb[44].mxu1 }
 0x1e3   : > { %9946 = vst [vmem:[#allocation111_spill] sm:$0xff] %v6813_v62  ;;  %v2191_v59 = vsub.f32 %v6801_v56, %v6708_v10  ;;  %v6829_v27 = vadd.f32 %v2703_v5, %v6711_v49  ;;  %v6832_v36 = vadd.f32 %v6716_v31, %v1171_v58  ;;  %v1173_v18 = vpop.f32.mrb[49].mxu0  ;;  %v1538_v42 = vadd.f32 %v1537_v20, %v1536_v50  ;;  %v6849_v20 = vpop.f32.mrb[45].mxu1 }
 0x1e4   : > { %9947 = vst [vmem:[#allocation112_spill] sm:$0xff] %v6816_v46  ;;  %9948 = vst [vmem:[#allocation113_spill] sm:$0xff] %v6821_v8  ;;  %v1543_v45 = vrot.slane %v1542_v14, 2  ;;  %v2706_v34 = vadd.f32 %v2705_v40, %v6361_v2  ;;  %v6836_v23 = vadd.f32 %v6727_v55, %v1173_v18  ;;  %v1175_v46 = vpop.f32.mrb[50].mxu0  ;;  %v6841_v15 = vadd.f32 %v1970_v7, %v6821_v8  ;;  %v6855_v7 = vpop.f32.mrb[46].mxu1 }
 0x1e5   : > { %9949 = vst [vmem:[#allocation114_spill] sm:$0xff] %v6824_v11  ;;  %9950 = vst [vmem:[#allocation115_spill] sm:$0xff] %v6829_v27  ;;  %v2192_v49 = vsub.f32 %v6813_v62, %v6725_v38  ;;  %v2257_v31 = vrot.slane %v6824_v11, 7  ;;  %v6847_v5 = vadd.f32 %v6733_v52, %v1175_v46  ;;  %v1177_v50 = vpop.f32.mrb[51].mxu0  ;;  %v1539_v40 = vrot.slane %v1538_v42, 1  ;;  %v6861_v52 = vpop.f32.mrb[47].mxu1 }
 0x1e6   : > { %9951 = vst [vmem:[#allocation116_spill] sm:$0xff] %v6832_v36  ;;  %9952 = vst [vmem:[#allocation117_spill] sm:$0xff] %v6836_v23  ;;  %v1544_v55 = vadd.f32 %v1543_v45, %v1542_v14  ;;  %v1547_v58 = vrot.slane %v6832_v36, 4  ;;  %v6853_v18 = vadd.f32 %v6739_v24, %v1177_v50  ;;  %v9499_v8 = vrot.slane %v6832_v36, 7 }
 0x1e7   : > { %9953 = vst [vmem:[#allocation118_spill] sm:$0xff] %v6841_v15  ;;  %9954 = vst [vmem:[#allocation119_spill] sm:$0xff] %v6847_v5  ;;  %v1971_v62 = vrot.slane %v6832_v36, 6  ;;  %v6859_v56 = vsub.f32 %v2191_v59, %v2255_v51  ;;  %v6863_v46 = vadd.f32 %v1539_v40, %v1538_v42  ;;  %v2258_v45 = vrot.slane %v6841_v15, 7 }
 0x1e8   : > { %9955 = vst [vmem:[#allocation120_spill] sm:$0xff] %v6853_v18  ;;  %v1545_v5 = vrot.slane %v1544_v55, 1  ;;  %v1548_v14 = vadd.f32 %v1547_v58, %v6832_v36  ;;  %v6870_v24 = vadd.f32 %v9499_v8, %v6832_v36  ;;  %v2707_v50 = vrot.slane %v2706_v34, 2 }
 0x1e9   : > { %9956 = vst [vmem:[#allocation121_spill] sm:$0xff] %v6859_v56  ;;  %9957 = vst [vmem:[#allocation122_spill] sm:$0xff] %v6863_v46  ;;  %v2711_v18 = vrot.slane %v6402_v41, 4  ;;  %v2717_v59 = vrot.slane %v6419_v63, 4  ;;  %v2193_v42 = vsub.f32 %v6863_v46, %v6770_v32  ;;  %v2723_v40 = vrot.slane %v6466_v33, 4 }
 0x1ea   : > { %9958 = vst [vmem:[#allocation123_spill] sm:$0xff] %v6870_v24  ;;  %v6874_v51 = vadd.f32 %v1545_v5, %v1544_v55  ;;  %v1549_v11 = vrot.slane %v1548_v14, 2  ;;  %v1181_v58 = vpop.f32.mrb[52].mxu0  ;;  %v6880_v15 = vadd.f32 %v1971_v62, %v6870_v24  ;;  %v2708_v38 = vadd.f32 %v2707_v50, %v2706_v34  ;;  %v6894_v24 = vpop.f32.mrb[48].mxu1 }
 0x1eb   : > { %v2712_v8 = vadd.f32 %v2711_v18, %v6402_v41  ;;  %v2718_v10 = vadd.f32 %v2717_v59, %v6419_v63  ;;  %v6885_v56 = vadd.f32 %v6776_v53, %v1181_v58  ;;  %v1183_v5 = vpop.f32.mrb[53].mxu0  ;;  %v6889_v46 = vsub.f32 %v2192_v49, %v2256_v19 }
 0x1ec   : > { %9959 = vst [vmem:[#allocation124_spill] sm:$0xff] %v6874_v51  ;;  %9960 = vst [vmem:[#allocation125_spill] sm:$0xff] %v6880_v15  ;;  %v1550_v55 = vadd.f32 %v1549_v11, %v1548_v14  ;;  %v2194_v48 = vsub.f32 %v6874_v51, %v6785_v43  ;;  %v6892_v32 = vadd.f32 %v6787_v37, %v1183_v5  ;;  %v1185_v62 = vpop.f32.mrb[54].mxu0  ;;  %v2259_v34 = vrot.slane %v6880_v15, 7  ;;  %v6902_v14 = vpop.f32.mrb[49].mxu1 }
 0x1ed   : > { %9961 = vst [vmem:[#allocation126_spill] sm:$0xff] %v6885_v56  ;;  %9962 = vst [vmem:[#allocation127_spill] sm:$0xff] %v6889_v46  ;;  %v6897_v18 = vsub.f32 %v2193_v42, %v2257_v31  ;;  %v2713_v50 = vrot.slane %v2712_v8, 2  ;;  %v6900_v53 = vadd.f32 %v6793_v3, %v1185_v62  ;;  %v1187_v11 = vpop.f32.mrb[55].mxu0  ;;  %v2709_v19 = vrot.slane %v2708_v38, 1  ;;  %v6907_v58 = vpop.f32.mrb[50].mxu1 }
 0x1ee   : > { %9963 = vst [vmem:[#allocation128_spill] sm:$0xff] %v6892_v32  ;;  %v1551_v59 = vrot.slane %v1550_v55, 1  ;;  %v2719_v49 = vrot.slane %v2718_v10, 2  ;;  %v6905_v37 = vadd.f32 %v6799_v25, %v1187_v11  ;;  %v6909_v5 = vsub.f32 %v2194_v48, %v2258_v45  ;;  %v6912_v42 = vpop.f32.mrb[51].mxu1 }
 0x1ef   : > { %9964 = vst [vmem:[#allocation129_spill] sm:$0xff] %v6897_v18  ;;  %9965 = vst [vmem:[#allocation130_spill] sm:$0xff] %v6900_v53  ;;  %v2714_v32 = vadd.f32 %v2713_v50, %v2712_v8  ;;  %v2724_v31 = vadd.f32 %v2723_v40, %v6466_v33  ;;  %v2729_v53 = vrot.slane %v6483_v44, 4  ;;  %v2735_v56 = vrot.slane %v6526_v13, 4 }
 0x1f0   : > { %9966 = vst [vmem:[#allocation131_spill] sm:$0xff] %v6905_v37  ;;  %9967 = vst [vmem:[#allocation132_spill] sm:$0xff] %v6909_v5  ;;  %v6914_v3 = vadd.f32 %v1551_v59, %v1550_v55  ;;  %v2720_v62 = vadd.f32 %v2719_v49, %v2718_v10  ;;  %v2741_v25 = vrot.slane %v6543_v60, 4  ;;  %v2747_v11 = vrot.slane %v6590_v4, 4 }
 0x1f1   : > { %v2715_v51 = vrot.slane %v2714_v32, 1  ;;  %v2725_v15 = vrot.slane %v2724_v31, 2  ;;  %v6922_v8 = vadd.f32 %v2709_v19, %v2708_v38  ;;  %v2730_v45 = vadd.f32 %v2729_v53, %v6483_v44 }
 0x1f2   : > { %9968 = vst [vmem:[#allocation133_spill] sm:$0xff] %v6914_v3  ;;  %v2195_v48 = vsub.f32 %v6914_v3, %v6832_v36  ;;  %v2736_v40 = vadd.f32 %v2735_v56, %v6526_v13  ;;  %v1191_v10 = vpop.f32.mrb[56].mxu0  ;;  %v2721_v55 = vrot.slane %v2720_v62, 1  ;;  %v2742_v59 = vadd.f32 %v2741_v25, %v6543_v60 }
 0x1f3   : > { %9969 = vst [vmem:[#allocation134_spill] sm:$0xff] %v6922_v8  ;;  %v2726_v50 = vadd.f32 %v2725_v15, %v2724_v31  ;;  %v2748_v49 = vadd.f32 %v2747_v11, %v6590_v4  ;;  %v6929_v37 = vadd.f32 %v6838_v16, %v1191_v10  ;;  %v1193_v43 = vpop.f32.mrb[57].mxu0  ;;  %v6933_v3 = vadd.f32 %v2715_v51, %v2714_v32 }
 0x1f4   : > { %v6931_v5 = vsub.f32 %v2195_v48, %v2259_v34  ;;  %v2731_v38 = vrot.slane %v2730_v45, 2  ;;  %v6936_v53 = vadd.f32 %v6849_v20, %v1193_v43  ;;  %v1195_v56 = vpop.f32.mrb[58].mxu0  ;;  %v2737_v36 = vrot.slane %v2736_v40, 2 }
 0x1f5   : > { %9970 = vst [vmem:[#allocation135_spill] sm:$0xff] %v6929_v37  ;;  %9972 = vst [vmem:[#allocation137_spill] sm:$0xff] %v6933_v3  ;;  %v2727_v19 = vrot.slane %v2726_v50, 1  ;;  %v2743_v15 = vrot.slane %v2742_v59, 2  ;;  %v6939_v31 = vadd.f32 %v6855_v7, %v1195_v56  ;;  %v1197_v25 = vpop.f32.mrb[59].mxu0  ;;  %v2749_v16 = vrot.slane %v2748_v49, 2 }
 0x1f6   : > { %9971 = vst [vmem:[#allocation136_spill] sm:$0xff] %v6931_v5  ;;  %9973 = vst [vmem:[#allocation138_spill] sm:$0xff] %v6936_v53  ;;  %v2732_v11 = vadd.f32 %v2731_v38, %v2730_v45  ;;  %v2753_v10 = vrot.slane %v6607_v22, 4  ;;  %v6943_v34 = vadd.f32 %v6861_v52, %v1197_v25  ;;  %v6945_v32 = vadd.f32 %v2721_v55, %v2720_v62 }
 0x1f7   : > { %9974 = vst [vmem:[#allocation139_spill] sm:$0xff] %v6939_v31  ;;  %v2738_v51 = vadd.f32 %v2737_v36, %v2736_v40  ;;  %v2744_v43 = vadd.f32 %v2743_v15, %v2742_v59  ;;  %v2750_v48 = vadd.f32 %v2749_v16, %v2748_v49  ;;  %v2759_v37 = vrot.slane %v6650_v61, 4 }
 0x1f8   : > { %9975 = vst [vmem:[#allocation140_spill] sm:$0xff] %v6943_v34  ;;  %9976 = vst [vmem:[#allocation141_spill] sm:$0xff] %v6945_v32  ;;  %v2733_v20 = vrot.slane %v2732_v11, 1  ;;  %v2754_v53 = vadd.f32 %v2753_v10, %v6607_v22  ;;  %v2765_v45 = vrot.slane %v6667_v30, 4  ;;  %v2771_v38 = vrot.slane %v6714_v0, 4 }
 0x1f9   : > { %v2739_v7 = vrot.slane %v2738_v51, 1  ;;  %v2745_v56 = vrot.slane %v2744_v43, 1  ;;  %v6951_v31 = vadd.f32 %v2727_v19, %v2726_v50  ;;  %v2760_v36 = vadd.f32 %v2759_v37, %v6650_v61 }
 0x1fa   : > { %v6953_v52 = vadd.f32 %v2733_v20, %v2732_v11  ;;  %v2755_v62 = vrot.slane %v2754_v53, 2  ;;  %v1201_v40 = vpop.f32.mrb[60].mxu0  ;;  %v2751_v59 = vrot.slane %v2750_v48, 1  ;;  %v2766_v49 = vadd.f32 %v2765_v45, %v6667_v30 }
 0x1fb   : > { %9977 = vst [vmem:[#allocation142_spill] sm:$0xff] %v6951_v31  ;;  %v6956_v55 = vadd.f32 %v2739_v7, %v2738_v51  ;;  %v2772_v15 = vadd.f32 %v2771_v38, %v6714_v0  ;;  %v6961_v25 = vadd.f32 %v6894_v24, %v1201_v40  ;;  %v1203_v16 = vpop.f32.mrb[61].mxu0  ;;  %v6963_v10 = vadd.f32 %v2745_v56, %v2744_v43 }
 0x1fc   : > { %9978 = vst [vmem:[#allocation143_spill] sm:$0xff] %v6953_v52  ;;  %v2756_v50 = vadd.f32 %v2755_v62, %v2754_v53  ;;  %v2761_v19 = vrot.slane %v2760_v36, 2  ;;  %v6966_v11 = vadd.f32 %v6902_v14, %v1203_v16  ;;  %v1205_v37 = vpop.f32.mrb[62].mxu0  ;;  %v2767_v20 = vrot.slane %v2766_v49, 2 }
 0x1fd   : > { %9979 = vst [vmem:[#allocation144_spill] sm:$0xff] %v6956_v55  ;;  %9980 = vst [vmem:[#allocation145_spill] sm:$0xff] %v6961_v25  ;;  %v2773_v51 = vrot.slane %v2772_v15, 2  ;;  %v2777_v7 = vrot.slane %v6731_v39, 4  ;;  %v6970_v45 = vadd.f32 %v6907_v58, %v1205_v37  ;;  %v1207_v38 = vpop.f32.mrb[63].mxu0  ;;  %v2783_v40 = vrot.slane %v6774_v57, 4 }
 0x1fe   : > { %9981 = vst [vmem:[#allocation146_spill] sm:$0xff] %v6963_v10  ;;  %9982 = vst [vmem:[#allocation147_spill] sm:$0xff] %v6966_v11  ;;  %v2757_v34 = vrot.slane %v2756_v50, 1  ;;  %v2762_v24 = vadd.f32 %v2761_v19, %v2760_v36  ;;  %v6974_v43 = vadd.f32 %v6912_v42, %v1207_v38  ;;  %v2768_v53 = vadd.f32 %v2767_v20, %v2766_v49 }
 0x1ff   : > { %9983 = vst [vmem:[#allocation148_spill] sm:$0xff] %v6970_v45  ;;  %v2774_v56 = vadd.f32 %v2773_v51, %v2772_v15  ;;  %v2778_v14 = vadd.f32 %v2777_v7, %v6731_v39  ;;  %v6977_v62 = vadd.f32 %v2751_v59, %v2750_v48  ;;  %v2784_v11 = vadd.f32 %v2783_v40, %v6774_v57 }
 0x200   : > { %9984 = vst [vmem:[#allocation149_spill] sm:$0xff] %v6974_v43  ;;  %v2763_v16 = vrot.slane %v2762_v24, 1  ;;  %v2789_v58 = vrot.slane %v6791_v12, 4  ;;  %v2769_v37 = vrot.slane %v2768_v53, 1  ;;  %v2795_v36 = vrot.slane %v6836_v23, 4 }
 0x201   : > { %9985 = vst [vmem:[#allocation150_spill] sm:$0xff] %v6977_v62  ;;  %v2775_v45 = vrot.slane %v2774_v56, 1  ;;  %v2779_v25 = vrot.slane %v2778_v14, 2  ;;  %v6982_v19 = vadd.f32 %v2757_v34, %v2756_v50  ;;  %v2785_v49 = vrot.slane %v2784_v11, 2 }
 0x202   : > { %v6984_v42 = vadd.f32 %v2763_v16, %v2762_v24  ;;  %v6987_v15 = vadd.f32 %v2789_v58, %v6791_v12  ;;  %v6989_v48 = vpop.f32.mrb[0].mxu0  ;;  %v6991_v59 = vadd.f32 %v2769_v37, %v2768_v53  ;;  %v6996_v51 = vadd.f32 %v2795_v36, %v6836_v23 }
 0x203   : > { %9986 = vst [vmem:[#allocation151_spill] sm:$0xff] %v6982_v19  ;;  %9988 = vst [vmem:[#allocation153_spill] sm:$0xff] %v6989_v48  ;;  %v6993_v20 = vadd.f32 %v2779_v25, %v2778_v14  ;;  %v7000_v50 = vpop.f32.mrb[1].mxu0  ;;  %v7004_v40 = vadd.f32 %v2775_v45, %v2774_v56  ;;  %v7010_v14 = vadd.f32 %v2785_v49, %v2784_v11 }
 0x204   : > { %9987 = vst [vmem:[#allocation152_spill] sm:$0xff] %v6984_v42  ;;  %9989 = vst [vmem:[#allocation154_spill] sm:$0xff] %v6991_v59  ;;  %v7007_v16 = vpop.f32.mrb[2].mxu0 }
 0x205   : > { %9990 = vst [vmem:[#allocation155_spill] sm:$0xff] %v7000_v50  ;;  %9991 = vst [vmem:[#allocation156_spill] sm:$0xff] %v7004_v40  ;;  %v1409_v37 = vrot.slane %v7007_v16, 4  ;;  %v1660_v36 = vrot.slane %v7007_v16, 1  ;;  %v9528_v7 = vrot.slane %v7007_v16, 7  ;;  %v7016_v38 = vpop.f32.mrb[3].mxu0 }
 0x206   : > { %9992 = vst [vmem:[#allocation157_spill] sm:$0xff] %v7007_v16  ;;  %v1852_v56 = vrot.slane %v7007_v16, 2  ;;  %v1948_v53 = vrot.slane %v7007_v16, 6  ;;  %v2657_v25 = vrot.slane %v7016_v38, 4  ;;  %v2908_v11 = vrot.slane %v7016_v38, 1 }
 0x207   : > { %v1410_v49 = vadd.f32 %v1409_v37, %v7007_v16  ;;  %v1724_v58 = vadd.f32 %v1660_v36, %v7007_v16  ;;  %v1820_v24 = vadd.f32 %v9528_v7, %v7007_v16  ;;  %v3004_v34 = vrot.slane %v7016_v38, 7 }
 0x208   : > { %v2044_v45 = vrot.slane %v7007_v16, 5  ;;  %v2658_v43 = vadd.f32 %v2657_v25, %v7016_v38  ;;  %v7032_v5 = vadd.f32 %v2908_v11, %v7016_v38  ;;  %v3100_v18 = vrot.slane %v7016_v38, 2 }
 0x209   : > { %v1411_v46 = vrot.slane %v1410_v49, 2  ;;  %v7035_v9 = vadd.f32 %v1852_v56, %v1724_v58  ;;  %v7037_v37 = vadd.f32 %v1948_v53, %v1820_v24  ;;  %v3196_v36 = vrot.slane %v7016_v38, 6 }
 0x20a   : > { %9993 = vst [vmem:[#allocation158_spill] sm:$0xff] %v7032_v5  ;;  %v2659_v1 = vrot.slane %v2658_v43, 2  ;;  %v7041_v7 = vadd.f32 %v3004_v34, %v7016_v38  ;;  %v3164_v35 = vadd.f32 %v3100_v18, %v7032_v5  ;;  %v3292_v25 = vrot.slane %v7016_v38, 3  ;;  %v7045_v28 = vpop.f32.mrb[4].mxu0 }
 0x20b   : > { %9994 = vst [vmem:[#allocation159_spill] sm:$0xff] %v7035_v9  ;;  %v1412_v11 = vadd.f32 %v1411_v46, %v1410_v49  ;;  %v2396_v26 = vrot.slane %v1820_v24, 7  ;;  %v1415_v6 = vrot.slane %v7045_v28, 4  ;;  %v1661_v56 = vrot.slane %v7045_v28, 1  ;;  %v7049_v53 = vpop.f32.mrb[5].mxu0 }
 0x20c   : > { %9995 = vst [vmem:[#allocation160_spill] sm:$0xff] %v7041_v7  ;;  %v7052_v9 = vadd.f32 %v2044_v45, %v7037_v37  ;;  %v2660_v40 = vadd.f32 %v2659_v1, %v2658_v43  ;;  %v3260_v59 = vadd.f32 %v3196_v36, %v7041_v7  ;;  %v7055_v42 = vadd.f32 %v3292_v25, %v3164_v35  ;;  %v7057_v18 = vpop.f32.mrb[6].mxu0 }
 0x20d   : > { %9998 = vst [vmem:[#allocation163_spill] sm:$0xff] %v7057_v18  ;;  %v1413_v19 = vrot.slane %v1412_v11, 1  ;;  %v1416_v46 = vadd.f32 %v1415_v6, %v7045_v28  ;;  %v1725_v24 = vadd.f32 %v1661_v56, %v7045_v28  ;;  %v1757_v49 = vrot.slane %v7045_v28, 7  ;;  %v7062_v62 = vpop.f32.mrb[7].mxu0  ;;  %v5712_v6 = vld [vmem:[#allocation7 + $0xc0] sm:$0xff]  }
 0x20e   : > { %9996 = vst [vmem:[#allocation161_spill] sm:$0xff] %v7052_v9  ;;  %9997 = vst [vmem:[#allocation162_spill] sm:$0xff] %v7055_v42  ;;  %v2661_v10 = vrot.slane %v2660_v40, 1  ;;  %v3452_v55 = vrot.slane %v3260_v59, 7  ;;  %v1853_v1 = vrot.slane %v7045_v28, 2  ;;  %v1949_v42 = vrot.slane %v7045_v28, 6  ;;  %5305 = vmatprep.subr.bf16.mxu1 %v5712_v6 }
 0x20f   : > { %v7066_v43 = vadd.f32 %v1413_v19, %v1412_v11  ;;  %v1417_v36 = vrot.slane %v1416_v46, 2  ;;  %v1821_v25 = vadd.f32 %v1757_v49, %v7045_v28  ;;  %v2045_v31 = vrot.slane %v7045_v28, 5 }
 0x210   : > { %v7070_v52 = vadd.f32 %v2661_v10, %v2660_v40  ;;  %v1917_v56 = vadd.f32 %v1853_v1, %v1725_v24  ;;  %v2663_v32 = vrot.slane %v7049_v53, 4  ;;  %v2909_v11 = vrot.slane %v7049_v53, 1 }
 0x211   : > { %9999 = vst [vmem:[#allocation164_spill] sm:$0xff] %v7066_v43  ;;  %v2332_v45 = vsub.f32 %v7066_v43, %v1724_v58  ;;  %v1418_v19 = vadd.f32 %v1417_v36, %v1416_v46  ;;  %v2013_v1 = vadd.f32 %v1949_v42, %v1821_v25  ;;  %v3005_v58 = vrot.slane %v7049_v53, 7 }
 0x212   : > { %10000 = vst [vmem:[#allocation165_spill] sm:$0xff] %v7070_v52  ;;  %v3388_v10 = vsub.f32 %v7070_v52, %v7016_v38  ;;  %v3708_v40 = vsub.f32 %v7070_v52, %v3164_v35  ;;  %v7083_v3 = vpop.f32.mrb[8].mxu0  ;;  %v2664_v36 = vadd.f32 %v2663_v32, %v7049_v53  ;;  %v2397_v35 = vrot.slane %v1821_v25, 7 }
 0x213   : > { %10001 = vst [vmem:[#allocation166_spill] sm:$0xff] %v7083_v3  ;;  %v7085_v8 = vsub.f32 %v2332_v45, %v2396_v26  ;;  %v1419_v46 = vrot.slane %v1418_v19, 1  ;;  %v7090_v6 = vpop.f32.mrb[9].mxu0  ;;  %v7096_v38 = vadd.f32 %v2045_v31, %v2013_v1  ;;  %v7103_v45 = vadd.f32 %v2909_v11, %v7049_v53 }
 0x214   : > { %10003 = vst [vmem:[#allocation168_spill] sm:$0xff] %v7090_v6  ;;  %v7092_v59 = vsub.f32 %v3388_v10, %v3452_v55  ;;  %v7094_v7 = vsub.f32 %v3708_v40, %v3004_v34  ;;  %v7098_v42 = vpop.f32.mrb[10].mxu0  ;;  %v2665_v26 = vrot.slane %v2664_v36, 2  ;;  %v2237_v10 = vrot.slane %v2013_v1, 7 }
 0x215   : > { %10002 = vst [vmem:[#allocation167_spill] sm:$0xff] %v7085_v8  ;;  %10006 = vst [vmem:[#allocation171_spill] sm:$0xff] %v7096_v38  ;;  %v7100_v9 = vadd.f32 %v1419_v46, %v1418_v19  ;;  %v7106_v32 = vpop.f32.mrb[11].mxu0  ;;  %v3101_v34 = vrot.slane %v7049_v53, 2  ;;  %v3197_v31 = vrot.slane %v7049_v53, 6  ;;  %v3293_v11 = vrot.slane %v7049_v53, 3 }
 0x216   : > { %10004 = vst [vmem:[#allocation169_spill] sm:$0xff] %v7092_v59  ;;  %10005 = vst [vmem:[#allocation170_spill] sm:$0xff] %v7094_v7  ;;  %v2666_v46 = vadd.f32 %v2665_v26, %v2664_v36  ;;  %v7117_v7 = vadd.f32 %v3005_v58, %v7049_v53  ;;  %v1421_v1 = vrot.slane %v7057_v18, 4  ;;  %v9548_v8 = vrot.slane %v7057_v18, 7 }
 0x217   : > { %10007 = vst [vmem:[#allocation172_spill] sm:$0xff] %v7098_v42  ;;  %10008 = vst [vmem:[#allocation173_spill] sm:$0xff] %v7100_v9  ;;  %v2173_v25 = vsub.f32 %v7100_v9, %v7045_v28  ;;  %v2333_v19 = vsub.f32 %v7100_v9, %v1725_v24  ;;  %v2493_v40 = vsub.f32 %v7100_v9, %v1917_v56  ;;  %v1662_v28 = vrot.slane %v7057_v18, 1 }
 0x218   : > { %10009 = vst [vmem:[#allocation174_spill] sm:$0xff] %v7103_v45  ;;  %10010 = vst [vmem:[#allocation175_spill] sm:$0xff] %v7117_v7  ;;  %v3165_v55 = vadd.f32 %v3101_v34, %v7103_v45  ;;  %v2667_v56 = vrot.slane %v2666_v46, 1  ;;  %v3261_v36 = vadd.f32 %v3197_v31, %v7117_v7  ;;  %v1422_v34 = vadd.f32 %v1421_v1, %v7057_v18 }
 0x219   : > { %v2461_v59 = vsub.f32 %v2333_v19, %v2397_v35  ;;  %v7123_v5 = vsub.f32 %v2493_v40, %v1757_v49  ;;  %v7126_v24 = vsub.f32 %v2173_v25, %v2237_v10  ;;  %v1726_v27 = vadd.f32 %v1662_v28, %v7057_v18 }
 0x21a   : > { %v7129_v26 = vadd.f32 %v3293_v11, %v3165_v55  ;;  %v7135_v35 = vadd.f32 %v2667_v56, %v2666_v46  ;;  %v3453_v49 = vrot.slane %v3261_v36, 7  ;;  %v1854_v19 = vrot.slane %v7057_v18, 2 }
 0x21b   : > { %10011 = vst [vmem:[#allocation176_spill] sm:$0xff] %v7123_v5  ;;  %10012 = vst [vmem:[#allocation177_spill] sm:$0xff] %v7126_v24  ;;  %v1950_v10 = vrot.slane %v7057_v18, 6  ;;  %v1423_v25 = vrot.slane %v1422_v34, 2  ;;  %v1822_v31 = vadd.f32 %v9548_v8, %v7057_v18  ;;  %v2046_v40 = vrot.slane %v7057_v18, 5 }
 0x21c   : > { %10013 = vst [vmem:[#allocation178_spill] sm:$0xff] %v7129_v26  ;;  %10014 = vst [vmem:[#allocation179_spill] sm:$0xff] %v7135_v35  ;;  %v2669_v11 = vrot.slane %v7062_v62, 4  ;;  %v3389_v1 = vsub.f32 %v7135_v35, %v7049_v53  ;;  %v3709_v46 = vsub.f32 %v7135_v35, %v3165_v55  ;;  %v7147_v28 = vadd.f32 %v1854_v19, %v1726_v27 }
 0x21d   : > { %v2910_v56 = vrot.slane %v7062_v62, 1  ;;  %v1424_v52 = vadd.f32 %v1423_v25, %v1422_v34  ;;  %v7152_v5 = vadd.f32 %v1950_v10, %v1822_v31  ;;  %v3006_v53 = vrot.slane %v7062_v62, 7 }
 0x21e   : > { %10015 = vst [vmem:[#allocation180_spill] sm:$0xff] %v7147_v28  ;;  %v2670_v8 = vadd.f32 %v2669_v11, %v7062_v62  ;;  %v7155_v26 = vsub.f32 %v3389_v1, %v3453_v49  ;;  %v3837_v38 = vsub.f32 %v3709_v46, %v3005_v58  ;;  %v2398_v19 = vrot.slane %v1822_v31, 7 }
 0x21f   : > { %v7158_v9 = vadd.f32 %v2910_v56, %v7062_v62  ;;  %v1425_v55 = vrot.slane %v1424_v52, 1  ;;  %v3102_v24 = vrot.slane %v7062_v62, 2  ;;  %v7165_v34 = vadd.f32 %v2046_v40, %v7152_v5 }
 0x220   : > { %10016 = vst [vmem:[#allocation181_spill] sm:$0xff] %v7155_v26  ;;  %v2671_v28 = vrot.slane %v2670_v8, 2  ;;  %v7162_v7 = vadd.f32 %v3837_v38, %v2461_v59  ;;  %v7168_v10 = vadd.f32 %v3006_v53, %v7062_v62  ;;  %v3198_v58 = vrot.slane %v7062_v62, 6 }
 0x221   : > { %10017 = vst [vmem:[#allocation182_spill] sm:$0xff] %v7158_v9  ;;  %10019 = vst [vmem:[#allocation184_spill] sm:$0xff] %v7165_v34  ;;  %v7172_v25 = vadd.f32 %v1425_v55, %v1424_v52  ;;  %v3166_v31 = vadd.f32 %v3102_v24, %v7158_v9  ;;  %v3294_v59 = vrot.slane %v7062_v62, 3  ;;  %v1427_v38 = vrot.slane %v7083_v3, 4 }
 0x222   : > { %10018 = vst [vmem:[#allocation183_spill] sm:$0xff] %v7162_v7  ;;  %10020 = vst [vmem:[#allocation185_spill] sm:$0xff] %v7168_v10  ;;  %v2672_v11 = vadd.f32 %v2671_v28, %v2670_v8  ;;  %v3262_v1 = vadd.f32 %v3198_v58, %v7168_v10  ;;  %v1663_v40 = vrot.slane %v7083_v3, 1  ;;  %v1951_v34 = vrot.slane %v7083_v3, 6 }
 0x223   : > { %10021 = vst [vmem:[#allocation186_spill] sm:$0xff] %v7172_v25  ;;  %v2334_v56 = vsub.f32 %v7172_v25, %v1726_v27  ;;  %v7185_v24 = vadd.f32 %v3294_v59, %v3166_v31  ;;  %v1428_v55 = vadd.f32 %v1427_v38, %v7083_v3  ;;  %v9553_v27 = vrot.slane %v7083_v3, 7 }
 0x224   : > { %v2673_v36 = vrot.slane %v2672_v11, 1  ;;  %v3454_v28 = vrot.slane %v3262_v1, 7  ;;  %v7193_v7 = vadd.f32 %v1663_v40, %v7083_v3  ;;  %v2675_v59 = vrot.slane %v7090_v6, 4 }
 0x225   : > { %10022 = vst [vmem:[#allocation187_spill] sm:$0xff] %v7185_v24  ;;  %v7188_v58 = vsub.f32 %v2334_v56, %v2398_v19  ;;  %v1429_v46 = vrot.slane %v1428_v55, 2  ;;  %v2911_v56 = vrot.slane %v7090_v6, 1  ;;  %v9554_v52 = vrot.slane %v7090_v6, 7 }
 0x226   : > { %v7190_v49 = vadd.f32 %v2673_v36, %v2672_v11  ;;  %10025 = vst [vmem:[#allocation190_spill] sm:$0xff] %v7193_v7  ;;  %v7205_v36 = vadd.f32 %v9553_v27, %v7083_v3  ;;  %v2047_v11 = vrot.slane %v7083_v3, 5  ;;  %v2676_v40 = vadd.f32 %v2675_v59, %v7090_v6 }
 0x227   : > { %10023 = vst [vmem:[#allocation188_spill] sm:$0xff] %v7188_v58  ;;  %v1430_v38 = vadd.f32 %v1429_v46, %v1428_v55  ;;  %v7224_v55 = vadd.f32 %v9554_v52, %v7090_v6 }
 0x228   : > { %10024 = vst [vmem:[#allocation189_spill] sm:$0xff] %v7190_v49  ;;  %v3390_v1 = vsub.f32 %v7190_v49, %v7062_v62  ;;  %v3710_v19 = vsub.f32 %v7190_v49, %v3166_v31  ;;  %10026 = vst [vmem:[#allocation191_spill] sm:$0xff] %v7205_v36  ;;  %v7218_v58 = vadd.f32 %v1951_v34, %v7205_v36  ;;  %v2677_v46 = vrot.slane %v2676_v40, 2 }
 0x229   : > { %v1431_v27 = vrot.slane %v1430_v38, 1  ;;  %10029 = vst [vmem:[#allocation194_spill] sm:$0xff] %v7224_v55  ;;  %v3199_v34 = vrot.slane %v7090_v6, 6  ;;  %v1433_v62 = vrot.slane %v7098_v42, 4  ;;  %v10039_v49 = vrot.slane %v6989_v48, 7 }
 0x22a   : > { %v7211_v8 = vsub.f32 %v3390_v1, %v3454_v28  ;;  %v7215_v31 = vsub.f32 %v3710_v19, %v3006_v53  ;;  %v7228_v59 = vadd.f32 %v2047_v11, %v7218_v58  ;;  %v7231_v53 = vadd.f32 %v2911_v56, %v7090_v6 }
 0x22b   : > { %v7234_v1 = vadd.f32 %v1431_v27, %v1430_v38  ;;  %v2678_v19 = vadd.f32 %v2677_v46, %v2676_v40  ;;  %v3263_v52 = vadd.f32 %v3199_v34, %v7224_v55  ;;  %v1664_v28 = vrot.slane %v7098_v42, 1 }
 0x22c   : > { %10027 = vst [vmem:[#allocation192_spill] sm:$0xff] %v7211_v8  ;;  %10028 = vst [vmem:[#allocation193_spill] sm:$0xff] %v7215_v31  ;;  %v9558_v11 = vrot.slane %v7098_v42, 7  ;;  %v1434_v27 = vadd.f32 %v1433_v62, %v7098_v42  ;;  %v1952_v31 = vrot.slane %v7098_v42, 6  ;;  %v2681_v56 = vrot.slane %v7106_v32, 4 }
 0x22d   : > { %10030 = vst [vmem:[#allocation195_spill] sm:$0xff] %v7228_v59  ;;  %10031 = vst [vmem:[#allocation196_spill] sm:$0xff] %v7231_v53  ;;  %v2679_v36 = vrot.slane %v2678_v19, 1  ;;  %v3455_v40 = vrot.slane %v3263_v52, 7  ;;  %v7247_v46 = vadd.f32 %v1664_v28, %v7098_v42  ;;  %v2912_v62 = vrot.slane %v7106_v32, 1 }
 0x22e   : > { %10032 = vst [vmem:[#allocation197_spill] sm:$0xff] %v7234_v1  ;;  %v7252_v34 = vadd.f32 %v9558_v11, %v7098_v42  ;;  %v1435_v8 = vrot.slane %v1434_v27, 2  ;;  %v3008_v52 = vrot.slane %v7106_v32, 7  ;;  %v3104_v28 = vrot.slane %v7106_v32, 2 }
 0x22f   : > { %10033 = vst [vmem:[#allocation198_spill] sm:$0xff] %v7247_v46  ;;  %v7255_v24 = vadd.f32 %v2679_v36, %v2678_v19  ;;  %v3200_v46 = vrot.slane %v7106_v32, 6  ;;  %v2682_v36 = vadd.f32 %v2681_v56, %v7106_v32  ;;  %v7267_v19 = vadd.f32 %v2912_v62, %v7106_v32 }
 0x230   : > { %10034 = vst [vmem:[#allocation199_spill] sm:$0xff] %v7252_v34  ;;  %v1436_v7 = vadd.f32 %v1435_v8, %v1434_v27  ;;  %v7270_v26 = vadd.f32 %v3008_v52, %v7106_v32  ;;  %v3296_v38 = vrot.slane %v7106_v32, 3  ;;  %v10038_v59 = vrot.slane %v6989_v48, 4 }
 0x231   : > { %10035 = vst [vmem:[#allocation200_spill] sm:$0xff] %v7255_v24  ;;  %v3391_v11 = vsub.f32 %v7255_v24, %v7090_v6  ;;  %10036 = vst [vmem:[#allocation201_spill] sm:$0xff] %v7267_v19  ;;  %v7279_v10 = vadd.f32 %v10039_v49, %v6989_v48  ;;  %v2683_v27 = vrot.slane %v2682_v36, 2  ;;  %v3168_v56 = vadd.f32 %v3104_v28, %v7267_v19 }
 0x232   : > { %10037 = vst [vmem:[#allocation202_spill] sm:$0xff] %v7270_v26  ;;  %v1404_v9 = vadd.f32 %v10038_v59, %v6989_v48  ;;  %v1437_v8 = vrot.slane %v1436_v7, 1  ;;  %v7283_v62 = vadd.f32 %v1952_v31, %v7252_v34  ;;  %v3264_v45 = vadd.f32 %v3200_v46, %v7270_v26 }
 0x233   : > { %10040 = vst [vmem:[#allocation203_spill] sm:$0xff] %v7279_v10  ;;  %v7285_v6 = vsub.f32 %v3391_v11, %v3455_v40  ;;  %v10043_v59 = vrot.slane %v6989_v48, 6  ;;  %v2684_v49 = vadd.f32 %v2683_v27, %v2682_v36  ;;  %v7295_v17 = vadd.f32 %v3296_v38, %v3168_v56 }
 0x234   : > { %10041 = vst [vmem:[#allocation204_spill] sm:$0xff] %v7283_v62  ;;  %v1405_v35 = vrot.slane %v1404_v9, 2  ;;  %v7293_v47 = vadd.f32 %v1437_v8, %v1436_v7  ;;  %v2175_v28 = vsub.f32 %v7234_v1, %v7083_v3  ;;  %v3456_v31 = vrot.slane %v3264_v45, 7 }
 0x235   : > { %10042 = vst [vmem:[#allocation205_spill] sm:$0xff] %v7285_v6  ;;  %v7291_v55 = vadd.f32 %v10043_v59, %v7279_v10  ;;  %10046 = vst [vmem:[#allocation208_spill] sm:$0xff] %v7295_v17  ;;  %v2236_v46 = vrot.slane %v7037_v37, 7  ;;  %v2685_v34 = vrot.slane %v2684_v49, 1  ;;  %v2238_v59 = vrot.slane %v7152_v5, 7 }
 0x236   : > { %10045 = vst [vmem:[#allocation207_spill] sm:$0xff] %v7293_v47  ;;  %v1406_v40 = vadd.f32 %v1405_v35, %v1404_v9  ;;  %v2176_v6 = vsub.f32 %v7293_v47, %v7098_v42  ;;  %v2239_v7 = vrot.slane %v7218_v58, 7  ;;  %v2240_v8 = vrot.slane %v7283_v62, 7 }
 0x237   : > { %10044 = vst [vmem:[#allocation206_spill] sm:$0xff] %v7291_v55  ;;  %v2235_v38 = vrot.slane %v7291_v55, 7  ;;  %v10047_v45 = vrot.slane %v7000_v50, 4  ;;  %v7310_v9 = vadd.f32 %v2685_v34, %v2684_v49  ;;  %v10049_v37 = vsub.f32 %v7066_v43, %v7007_v16 }
 0x238   : > { %v1407_v36 = vrot.slane %v1406_v40, 1  ;;  %v10051_v5 = vsub.f32 %v7172_v25, %v7057_v18  ;;  %v7322_v11 = vsub.f32 %v2175_v28, %v2239_v7  ;;  %v2787_v49 = vrot.slane %v7010_v14, 1 }
 0x239   : > { %v2652_v27 = vadd.f32 %v10047_v45, %v7000_v50  ;;  %10048 = vst [vmem:[#allocation209_spill] sm:$0xff] %v7310_v9  ;;  %v7315_v35 = vsub.f32 %v10049_v37, %v2236_v46  ;;  %v10055_v45 = vrot.slane %v6993_v20, 1  ;;  %v3392_v46 = vsub.f32 %v7310_v9, %v7106_v32 }
 0x23a   : > { %v7320_v58 = vsub.f32 %v10051_v5, %v2238_v59  ;;  %10053 = vst [vmem:[#allocation212_spill] sm:$0xff] %v7322_v11  ;;  %v7324_v10 = vadd.f32 %v1407_v36, %v1406_v40  ;;  %v3712_v37 = vsub.f32 %v7310_v9, %v3168_v56  ;;  %v7335_v18 = vsub.f32 %v2176_v6, %v2240_v8 }
 0x23b   : > { %10050 = vst [vmem:[#allocation210_spill] sm:$0xff] %v7315_v35  ;;  %v2653_v17 = vrot.slane %v2652_v27, 2  ;;  %v7329_v34 = vadd.f32 %v10055_v45, %v6993_v20  ;;  %v10058_v28 = vrot.slane %v6987_v15, 2  ;;  %v10059_v36 = vrot.slane %v6996_v51, 2 }
 0x23c   : > { %10052 = vst [vmem:[#allocation211_spill] sm:$0xff] %v7320_v58  ;;  %10054 = vst [vmem:[#allocation213_spill] sm:$0xff] %v7324_v10  ;;  %v2171_v20 = vsub.f32 %v7324_v10, %v6989_v48  ;;  %v7347_v32 = vsub.f32 %v3392_v46, %v3456_v31  ;;  %v7349_v56 = vsub.f32 %v3712_v37, %v3008_v52  ;;  %v2907_v59 = vrot.slane %v7000_v50, 1 }
 0x23d   : > { %10056 = vst [vmem:[#allocation214_spill] sm:$0xff] %v7329_v34  ;;  %10057 = vst [vmem:[#allocation215_spill] sm:$0xff] %v7335_v18  ;;  %v2792_v40 = vadd.f32 %v10058_v28, %v6987_v15  ;;  %v2654_v7 = vadd.f32 %v2653_v17, %v2652_v27  ;;  %v2798_v5 = vadd.f32 %v10059_v36, %v6996_v51  ;;  %v2916_v51 = vrot.slane %v6361_v2, 1 }
 0x23e   : > { %10060 = vst [vmem:[#allocation216_spill] sm:$0xff] %v7347_v32  ;;  %10061 = vst [vmem:[#allocation217_spill] sm:$0xff] %v7349_v56  ;;  %v7352_v6 = vadd.f32 %v2787_v49, %v7010_v14  ;;  %v7354_v15 = vsub.f32 %v2171_v20, %v2235_v38  ;;  %v2917_v31 = vrot.slane %v6402_v41, 1  ;;  %v2918_v14 = vrot.slane %v6419_v63, 1 }
 0x23f   : > { %v2793_v8 = vrot.slane %v2792_v40, 1  ;;  %v2655_v45 = vrot.slane %v2654_v7, 1  ;;  %v2799_v28 = vrot.slane %v2798_v5, 1  ;;  %v2919_v38 = vrot.slane %v6466_v33, 1 }
 0x240   : > { %10062 = vst [vmem:[#allocation218_spill] sm:$0xff] %v7352_v6  ;;  %10063 = vst [vmem:[#allocation219_spill] sm:$0xff] %v7354_v15  ;;  %v2920_v49 = vrot.slane %v6483_v44, 1  ;;  %v2921_v37 = vrot.slane %v6526_v13, 1  ;;  %v2922_v20 = vrot.slane %v6543_v60, 1  ;;  %v2924_v36 = vrot.slane %v6607_v22, 1 }
 0x241   : > { %v7358_v27 = vadd.f32 %v2793_v8, %v2792_v40  ;;  %v7362_v52 = vadd.f32 %v2655_v45, %v2654_v7  ;;  %v7364_v46 = vadd.f32 %v2799_v28, %v2798_v5  ;;  %v2923_v40 = vrot.slane %v6590_v4, 1 }
 0x242   : > { %v2925_v8 = vrot.slane %v6650_v61, 1  ;;  %v2926_v7 = vrot.slane %v6667_v30, 1  ;;  %v2927_v5 = vrot.slane %v6714_v0, 1  ;;  %v2928_v45 = vrot.slane %v6731_v39, 1 }
 0x243   : > { %10064 = vst [vmem:[#allocation220_spill] sm:$0xff] %v7358_v27  ;;  %10065 = vst [vmem:[#allocation221_spill] sm:$0xff] %v7362_v52  ;;  %v2929_v28 = vrot.slane %v6774_v57, 1  ;;  %v2930_v17 = vrot.slane %v6791_v12, 1  ;;  %v2931_v56 = vrot.slane %v6836_v23, 1  ;;  %v7381_v16 = vadd.f32 %v2907_v59, %v7000_v50 }
 0x244   : > { %10066 = vst [vmem:[#allocation222_spill] sm:$0xff] %v7364_v46  ;;  %v10068_v3 = vrot.slane %v6303_v21, 1  ;;  %v10070_v25 = vrot.slane %v6313_v29, 1  ;;  %v10072_v47 = vrot.slane %v6346_v54, 1  ;;  %v7399_v10 = vadd.f32 %v2916_v51, %v6361_v2 }
 0x245   : > { %10067 = vst [vmem:[#allocation223_spill] sm:$0xff] %v7381_v16  ;;  %v7402_v59 = vadd.f32 %v2917_v31, %v6402_v41  ;;  %v7405_v42 = vadd.f32 %v2918_v14, %v6419_v63  ;;  %v7414_v62 = vadd.f32 %v2921_v37, %v6526_v13  ;;  %v7420_v51 = vadd.f32 %v2923_v40, %v6590_v4 }
 0x246   : > { %v7386_v32 = vadd.f32 %v10068_v3, %v6303_v21  ;;  %v7391_v43 = vadd.f32 %v10070_v25, %v6313_v29  ;;  %v7396_v1 = vadd.f32 %v10072_v47, %v6346_v54  ;;  %10074 = vst [vmem:[#allocation227_spill] sm:$0xff] %v7399_v10  ;;  %v7408_v3 = vadd.f32 %v2919_v38, %v6466_v33 }
 0x247   : > { %10075 = vst [vmem:[#allocation228_spill] sm:$0xff] %v7402_v59  ;;  %10076 = vst [vmem:[#allocation229_spill] sm:$0xff] %v7405_v42  ;;  %v7411_v25 = vadd.f32 %v2920_v49, %v6483_v44  ;;  %v7417_v47 = vadd.f32 %v2922_v20, %v6543_v60  ;;  %v7423_v31 = vadd.f32 %v2924_v36, %v6607_v22  ;;  %v10092_v48 = vrot.slane %v6313_v29, 7 }
 0x248   : > { %10069 = vst [vmem:[#allocation224_spill] sm:$0xff] %v7386_v32  ;;  %10071 = vst [vmem:[#allocation225_spill] sm:$0xff] %v7391_v43  ;;  %v7426_v14 = vadd.f32 %v2925_v8, %v6650_v61  ;;  %v7429_v38 = vadd.f32 %v2926_v7, %v6667_v30  ;;  %v7432_v49 = vadd.f32 %v2927_v5, %v6714_v0  ;;  %v10090_v8 = vrot.slane %v7000_v50, 7 }
 0x249   : > { %10073 = vst [vmem:[#allocation226_spill] sm:$0xff] %v7396_v1  ;;  %10077 = vst [vmem:[#allocation230_spill] sm:$0xff] %v7408_v3  ;;  %v7435_v37 = vadd.f32 %v2928_v45, %v6731_v39  ;;  %v7438_v20 = vadd.f32 %v2929_v28, %v6774_v57  ;;  %v7441_v40 = vadd.f32 %v2930_v17, %v6791_v12  ;;  %v10091_v5 = vrot.slane %v6303_v21, 7 }
 0x24a   : > { %10078 = vst [vmem:[#allocation231_spill] sm:$0xff] %v7411_v25  ;;  %10079 = vst [vmem:[#allocation232_spill] sm:$0xff] %v7414_v62  ;;  %v7444_v36 = vadd.f32 %v2931_v56, %v6836_v23  ;;  %v7469_v7 = vadd.f32 %v10090_v8, %v7000_v50  ;;  %v7479_v28 = vadd.f32 %v10092_v48, %v6313_v29  ;;  %v10093_v18 = vrot.slane %v6346_v54, 7 }
 0x24b   : > { %10080 = vst [vmem:[#allocation233_spill] sm:$0xff] %v7417_v47  ;;  %10081 = vst [vmem:[#allocation234_spill] sm:$0xff] %v7420_v51  ;;  %v7474_v55 = vadd.f32 %v10091_v5, %v6303_v21  ;;  %v10094_v56 = vrot.slane %v6361_v2, 7  ;;  %v10095_v45 = vrot.slane %v6402_v41, 7  ;;  %v10096_v11 = vrot.slane %v6419_v63, 7 }
 0x24c   : > { %10082 = vst [vmem:[#allocation235_spill] sm:$0xff] %v7423_v31  ;;  %10083 = vst [vmem:[#allocation236_spill] sm:$0xff] %v7426_v14  ;;  %v7484_v17 = vadd.f32 %v10093_v18, %v6346_v54  ;;  %v10097_v58 = vrot.slane %v6466_v33, 7  ;;  %v10098_v35 = vrot.slane %v6483_v44, 7  ;;  %v10099_v15 = vrot.slane %v6526_v13, 7 }
 0x24d   : > { %10084 = vst [vmem:[#allocation237_spill] sm:$0xff] %v7429_v38  ;;  %10085 = vst [vmem:[#allocation238_spill] sm:$0xff] %v7432_v49  ;;  %v7489_v8 = vadd.f32 %v10094_v56, %v6361_v2  ;;  %v7494_v5 = vadd.f32 %v10095_v45, %v6402_v41  ;;  %v7499_v48 = vadd.f32 %v10096_v11, %v6419_v63  ;;  %v10100_v19 = vrot.slane %v6543_v60, 7 }
 0x24e   : > { %10086 = vst [vmem:[#allocation239_spill] sm:$0xff] %v7435_v37  ;;  %10087 = vst [vmem:[#allocation240_spill] sm:$0xff] %v7438_v20  ;;  %v7504_v18 = vadd.f32 %v10097_v58, %v6466_v33  ;;  %v7509_v56 = vadd.f32 %v10098_v35, %v6483_v44  ;;  %v7514_v45 = vadd.f32 %v10099_v15, %v6526_v13  ;;  %v10101_v9 = vrot.slane %v6590_v4, 7 }
 0x24f   : > { %10088 = vst [vmem:[#allocation241_spill] sm:$0xff] %v7441_v40  ;;  %10089 = vst [vmem:[#allocation242_spill] sm:$0xff] %v7444_v36  ;;  %v7519_v11 = vadd.f32 %v10100_v19, %v6543_v60  ;;  %v10102_v26 = vrot.slane %v6607_v22, 7  ;;  %v10103_v46 = vrot.slane %v6650_v61, 7  ;;  %v10104_v36 = vrot.slane %v6667_v30, 7 }
 0x250   : > { %v7524_v58 = vadd.f32 %v10101_v9, %v6590_v4  ;;  %v10105_v27 = vrot.slane %v6714_v0, 7  ;;  %v10106_v40 = vrot.slane %v6731_v39, 7  ;;  %v10107_v6 = vrot.slane %v6774_v57, 7 }
 0x251   : > { %v7529_v35 = vadd.f32 %v10102_v26, %v6607_v22  ;;  %v7534_v15 = vadd.f32 %v10103_v46, %v6650_v61  ;;  %v7539_v19 = vadd.f32 %v10104_v36, %v6667_v30  ;;  %v10108_v20 = vrot.slane %v6791_v12, 7 }
 0x252   : > { %v7544_v9 = vadd.f32 %v10105_v27, %v6714_v0  ;;  %v7549_v26 = vadd.f32 %v10106_v40, %v6731_v39  ;;  %v7554_v46 = vadd.f32 %v10107_v6, %v6774_v57  ;;  %v10109_v34 = vrot.slane %v6836_v23, 7 }
 0x253   : > { %v7559_v36 = vadd.f32 %v10108_v20, %v6791_v12  ;;  %v3195_v37 = vrot.slane %v7000_v50, 6  ;;  %v3201_v40 = vrot.slane %v6303_v21, 6  ;;  %v3202_v49 = vrot.slane %v6313_v29, 6 }
 0x254   : > { %v7564_v27 = vadd.f32 %v10109_v34, %v6836_v23  ;;  %v3203_v38 = vrot.slane %v6346_v54, 6  ;;  %v3204_v6 = vrot.slane %v6361_v2, 6  ;;  %v3205_v14 = vrot.slane %v6402_v41, 6 }
 0x255   : > { %v3206_v20 = vrot.slane %v6419_v63, 6  ;;  %v3207_v31 = vrot.slane %v6466_v33, 6  ;;  %v3208_v51 = vrot.slane %v6483_v44, 6  ;;  %v3209_v34 = vrot.slane %v6526_v13, 6 }
 0x256   : > { %v3210_v50 = vrot.slane %v6543_v60, 6  ;;  %v3211_v21 = vrot.slane %v6590_v4, 6  ;;  %v3212_v29 = vrot.slane %v6607_v22, 6  ;;  %v3213_v54 = vrot.slane %v6650_v61, 6  ;;  %v10152_v22 = vld [vmem:[#allocation240_spill] sm:$0xff] }
 0x257   : > { %v3214_v2 = vrot.slane %v6667_v30, 6  ;;  %v3215_v41 = vrot.slane %v6714_v0, 6  ;;  %v3216_v63 = vrot.slane %v6731_v39, 6  ;;  %v3217_v33 = vrot.slane %v6774_v57, 6 }
 0x258   : > { %v3218_v44 = vrot.slane %v6791_v12, 6  ;;  %v3219_v13 = vrot.slane %v6836_v23, 6  ;;  %v7587_v60 = vadd.f32 %v3195_v37, %v7469_v7  ;;  %v7590_v4 = vadd.f32 %v3201_v40, %v7474_v55  ;;  %v10150_v12 = vld [vmem:[#allocation239_spill] sm:$0xff] }
 0x259   : > { %v7593_v61 = vadd.f32 %v3202_v49, %v7479_v28  ;;  %v7596_v30 = vadd.f32 %v3203_v38, %v7484_v17  ;;  %v7599_v39 = vadd.f32 %v3204_v6, %v7489_v8  ;;  %v7602_v57 = vadd.f32 %v3205_v14, %v7494_v5 }
 0x25a   : > { %10110 = vst [vmem:[#allocation243_spill] sm:$0xff] %v7587_v60  ;;  %10111 = vst [vmem:[#allocation244_spill] sm:$0xff] %v7590_v4  ;;  %v7605_v23 = vadd.f32 %v3206_v20, %v7499_v48  ;;  %v7608_v37 = vadd.f32 %v3207_v31, %v7504_v18  ;;  %v7611_v40 = vadd.f32 %v3208_v51, %v7509_v56  ;;  %v10148_v4 = vld [vmem:[#allocation238_spill] sm:$0xff] }
 0x25b   : > { %10112 = vst [vmem:[#allocation245_spill] sm:$0xff] %v7593_v61  ;;  %10113 = vst [vmem:[#allocation246_spill] sm:$0xff] %v7596_v30  ;;  %v7614_v49 = vadd.f32 %v3209_v34, %v7514_v45  ;;  %v7617_v38 = vadd.f32 %v3210_v50, %v7519_v11  ;;  %v7620_v6 = vadd.f32 %v3211_v21, %v7524_v58  ;;  %v10146_v30 = vld [vmem:[#allocation237_spill] sm:$0xff] }
 0x25c   : > { %10114 = vst [vmem:[#allocation247_spill] sm:$0xff] %v7599_v39  ;;  %10115 = vst [vmem:[#allocation248_spill] sm:$0xff] %v7602_v57  ;;  %v7623_v14 = vadd.f32 %v3212_v29, %v7529_v35  ;;  %v7626_v20 = vadd.f32 %v3213_v54, %v7534_v15  ;;  %v7629_v31 = vadd.f32 %v3214_v2, %v7539_v19  ;;  %v10134_v54 = vld [vmem:[#allocation137_spill] sm:$0xff] }
 0x25d   : > { %10116 = vst [vmem:[#allocation249_spill] sm:$0xff] %v7605_v23  ;;  %10117 = vst [vmem:[#allocation250_spill] sm:$0xff] %v7608_v37  ;;  %v7632_v51 = vadd.f32 %v3215_v41, %v7544_v9  ;;  %v7635_v34 = vadd.f32 %v3216_v63, %v7549_v26  ;;  %v7638_v50 = vadd.f32 %v3217_v33, %v7554_v46  ;;  %v10130_v63 = vld [vmem:[#allocation42_spill] sm:$0xff]  ;;  %v10144_v23 = vld [vmem:[#allocation236_spill] sm:$0xff] }
 0x25e   : > { %10118 = vst [vmem:[#allocation251_spill] sm:$0xff] %v7611_v40  ;;  %10119 = vst [vmem:[#allocation252_spill] sm:$0xff] %v7614_v49  ;;  %v7641_v21 = vadd.f32 %v3218_v44, %v7559_v36  ;;  %v7644_v29 = vadd.f32 %v3219_v13, %v7564_v27  ;;  %v3547_v2 = vsub.f32 %v7362_v52, %v7381_v16  ;;  %v10131_v33 = vld [vmem:[#allocation66_spill] sm:$0xff]  ;;  %v10132_v44 = vld [vmem:[#allocation115_spill] sm:$0xff] }
 0x25f   : > { %10120 = vst [vmem:[#allocation253_spill] sm:$0xff] %v7617_v38  ;;  %10121 = vst [vmem:[#allocation254_spill] sm:$0xff] %v7620_v6  ;;  %v3551_v41 = vsub.f32 %v7255_v24, %v7231_v53  ;;  %v10133_v13 = vld [vmem:[#allocation134_spill] sm:$0xff]  ;;  %v3557_v39 = vsub.f32 %v10134_v54, %v7402_v59  ;;  %v10135_v16 = vld [vmem:[#allocation141_spill] sm:$0xff] }
 0x260   : > { %10122 = vst [vmem:[#allocation255_spill] sm:$0xff] %v7623_v14  ;;  %10123 = vst [vmem:[#allocation256_spill] sm:$0xff] %v7626_v20  ;;  %v10136_v24 = vld [vmem:[#allocation142_spill] sm:$0xff]  ;;  %v10142_v40 = vld [vmem:[#allocation235_spill] sm:$0xff] }
 0x261   : > { %10124 = vst [vmem:[#allocation257_spill] sm:$0xff] %v7629_v31  ;;  %10125 = vst [vmem:[#allocation258_spill] sm:$0xff] %v7632_v51  ;;  %v3558_v51 = vsub.f32 %v10135_v16, %v7405_v42  ;;  %v3559_v53 = vsub.f32 %v10136_v24, %v7408_v3  ;;  %v10140_v38 = vld [vmem:[#allocation234_spill] sm:$0xff]  ;;  %v10143_v59 = vld [vmem:[#allocation151_spill] sm:$0xff] }
 0x262   : > { %10126 = vst [vmem:[#allocation259_spill] sm:$0xff] %v7635_v34  ;;  %10127 = vst [vmem:[#allocation260_spill] sm:$0xff] %v7638_v50  ;;  %v3553_v34 = vsub.f32 %v10130_v63, %v7386_v32  ;;  %v3554_v50 = vsub.f32 %v10131_v33, %v7391_v43  ;;  %v10137_v32 = vld [vmem:[#allocation143_spill] sm:$0xff]  ;;  %v10138_v43 = vld [vmem:[#allocation144_spill] sm:$0xff]  ;;  %v3564_v37 = vsub.f32 %v10143_v59, %v10142_v40 }
 0x263   : > { %10128 = vst [vmem:[#allocation261_spill] sm:$0xff] %v7641_v21  ;;  %10129 = vst [vmem:[#allocation262_spill] sm:$0xff] %v7644_v29  ;;  %v3555_v21 = vsub.f32 %v10132_v44, %v7396_v1  ;;  %v3556_v29 = vsub.f32 %v10133_v13, %v7399_v10  ;;  %v3560_v31 = vsub.f32 %v10137_v32, %v7411_v25  ;;  %v10139_v1 = vld [vmem:[#allocation146_spill] sm:$0xff]  ;;  %v10145_v42 = vld [vmem:[#allocation152_spill] sm:$0xff] }
 0x264   : > { %v3561_v20 = vsub.f32 %v10138_v43, %v7414_v62  ;;  %v3562_v6 = vsub.f32 %v10139_v1, %v7417_v47  ;;  %v10141_v10 = vld [vmem:[#allocation150_spill] sm:$0xff]  ;;  %v3565_v57 = vsub.f32 %v10145_v42, %v10144_v23  ;;  %v10149_v25 = vld [vmem:[#allocation156_spill] sm:$0xff]  ;;  %v10154_v43 = vld [vmem:[#allocation241_spill] sm:$0xff]  ;;  %v3611_v23 = vrot.slane %v7469_v7, 7 }
 0x265   : > { %v3563_v49 = vsub.f32 %v10141_v10, %v10140_v38  ;;  %v10147_v3 = vld [vmem:[#allocation154_spill] sm:$0xff]  ;;  %v3567_v60 = vsub.f32 %v10149_v25, %v10148_v4  ;;  %v10155_v38 = vld [vmem:[#allocation220_spill] sm:$0xff]  ;;  %v3618_v4 = vrot.slane %v7479_v28, 7  ;;  %v3619_v25 = vrot.slane %v7484_v17, 7  ;;  %v10177_v52 = vld [vmem:[#allocation201_spill] sm:$0xff] }
 0x266   : > { %v3566_v61 = vsub.f32 %v10147_v3, %v10146_v30  ;;  %v10151_v62 = vld [vmem:[#allocation214_spill] sm:$0xff]  ;;  %v3570_v10 = vsub.f32 %v10155_v38, %v10154_v43  ;;  %v3617_v30 = vrot.slane %v7474_v55, 7  ;;  %v3623_v43 = vrot.slane %v7504_v18, 7 }
 0x267   : > { %v3568_v0 = vsub.f32 %v10151_v62, %v10150_v12  ;;  %v10153_v47 = vld [vmem:[#allocation218_spill] sm:$0xff]  ;;  %v3620_v12 = vrot.slane %v7489_v8, 7  ;;  %v3625_v7 = vrot.slane %v7514_v45, 7  ;;  %v3627_v55 = vrot.slane %v7524_v58, 7  ;;  %v10161_v58 = vld [vmem:[#allocation165_spill] sm:$0xff] }
 0x268   : > { %v3569_v1 = vsub.f32 %v10153_v47, %v10152_v22  ;;  %v10156_v32 = vld [vmem:[#allocation242_spill] sm:$0xff]  ;;  %v3621_v22 = vrot.slane %v7494_v5, 7  ;;  %v3622_v47 = vrot.slane %v7499_v48, 7  ;;  %v3628_v28 = vrot.slane %v7529_v35, 7 }
 0x269   : > { %v10157_v40 = vld [vmem:[#allocation222_spill] sm:$0xff]  ;;  %v3629_v17 = vrot.slane %v7534_v15, 7  ;;  %v3630_v8 = vrot.slane %v7539_v19, 7  ;;  %v3631_v5 = vrot.slane %v7544_v9, 7  ;;  %v3632_v48 = vrot.slane %v7549_v26, 7  ;;  %v10164_v15 = vld [vmem:[#allocation175_spill] sm:$0xff] }
 0x26a   : > { %v3571_v59 = vsub.f32 %v10157_v40, %v10156_v32  ;;  %v10158_v42 = vld [vmem:[#allocation194_spill] sm:$0xff]  ;;  %v3624_v32 = vrot.slane %v7509_v56, 7  ;;  %v3633_v18 = vrot.slane %v7554_v46, 7  ;;  %v3634_v56 = vrot.slane %v7559_v36, 7  ;;  %v10166_v19 = vld [vmem:[#allocation179_spill] sm:$0xff]  ;;  %v10169_v26 = vld [vmem:[#allocation185_spill] sm:$0xff] }
 0x26b   : > { %v3615_v24 = vrot.slane %v10158_v42, 7  ;;  %v3626_v42 = vrot.slane %v7519_v11, 7  ;;  %v3635_v45 = vrot.slane %v7564_v27, 7  ;;  %v3675_v40 = vsub.f32 %v3547_v2, %v3611_v23  ;;  %v10159_v11 = vld [vmem:[#allocation160_spill] sm:$0xff]  ;;  %v10162_v62 = vld [vmem:[#allocation158_spill] sm:$0xff]  ;;  %v10171_v46 = vld [vmem:[#allocation189_spill] sm:$0xff] }
 0x26c   : > { %v10160_v38 = vrot.slane %v10159_v11, 7  ;;  %v10163_v35 = vsub.f32 %v10161_v58, %v10162_v62  ;;  %v10165_v16 = vrot.slane %v10164_v15, 7  ;;  %v10167_v54 = vld [vmem:[#allocation174_spill] sm:$0xff]  ;;  %v10170_v44 = vrot.slane %v10169_v26, 7  ;;  %v10176_v11 = vld [vmem:[#allocation209_spill] sm:$0xff] }
 0x26d   : > { %v10168_v9 = vsub.f32 %v10166_v19, %v10167_v54  ;;  %v10172_v33 = vld [vmem:[#allocation182_spill] sm:$0xff]  ;;  %v3679_v27 = vsub.f32 %v3551_v41, %v3615_v24  ;;  %v10178_v14 = vsub.f32 %v10176_v11, %v10177_v52  ;;  %v3683_v15 = vsub.f32 %v3555_v21, %v3619_v25  ;;  %v10193_v21 = vld [vmem:[#allocation83_spill] sm:$0xff] }
 0x26e   : > { %v3676_v3 = vsub.f32 %v10163_v35, %v10160_v38  ;;  %v10173_v36 = vsub.f32 %v10171_v46, %v10172_v33  ;;  %v10174_v23 = vld [vmem:[#allocation202_spill] sm:$0xff]  ;;  %v3681_v38 = vsub.f32 %v3553_v34, %v3617_v30  ;;  %v3682_v35 = vsub.f32 %v3554_v50, %v3618_v4 }
 0x26f   : > { %v3677_v13 = vsub.f32 %v10168_v9, %v10165_v16  ;;  %v10175_v2 = vrot.slane %v10174_v23, 7  ;;  %v3684_v58 = vsub.f32 %v3556_v29, %v3620_v12  ;;  %v3685_v19 = vsub.f32 %v3557_v39, %v3621_v22  ;;  %v10180_v4 = vld [vmem:[#allocation210_spill] sm:$0xff]  ;;  %v10181_v22 = vld [vmem:[#allocation177_spill] sm:$0xff] }
 0x270   : > { %v3678_v63 = vsub.f32 %v10173_v36, %v10170_v44  ;;  %v3686_v54 = vsub.f32 %v3558_v51, %v3622_v47  ;;  %v3687_v16 = vsub.f32 %v3559_v53, %v3623_v43  ;;  %v3688_v9 = vsub.f32 %v3560_v31, %v3624_v32  ;;  %v10182_v43 = vld [vmem:[#allocation211_spill] sm:$0xff]  ;;  %v10183_v32 = vld [vmem:[#allocation212_spill] sm:$0xff]  ;;  %v10192_v34 = vld [vmem:[#allocation78_spill] sm:$0xff] }
 0x271   : > { %v3680_v62 = vsub.f32 %v10178_v14, %v10175_v2  ;;  %v3689_v26 = vsub.f32 %v3561_v20, %v3625_v7  ;;  %v3690_v33 = vsub.f32 %v3562_v6, %v3626_v42  ;;  %v3691_v46 = vsub.f32 %v3563_v49, %v3627_v55  ;;  %v10179_v14 = vld [vmem:[#allocation219_spill] sm:$0xff]  ;;  %v10191_v31 = vld [vmem:[#allocation72_spill] sm:$0xff] }
 0x272   : > { %v3692_v36 = vsub.f32 %v3564_v37, %v3628_v28  ;;  %v3693_v44 = vsub.f32 %v3565_v57, %v3629_v17  ;;  %v3694_v24 = vsub.f32 %v3566_v61, %v3630_v8  ;;  %v3695_v41 = vsub.f32 %v3567_v60, %v3631_v5  ;;  %v10184_v47 = vld [vmem:[#allocation215_spill] sm:$0xff]  ;;  %v10185_v57 = vld [vmem:[#allocation33_spill] sm:$0xff]  ;;  %v10186_v60 = vld [vmem:[#allocation40_spill] sm:$0xff] }
 0x273   : > { %v3696_v23 = vsub.f32 %v3568_v0, %v3632_v48  ;;  %v3697_v11 = vsub.f32 %v3569_v1, %v3633_v18  ;;  %v3698_v52 = vsub.f32 %v3570_v10, %v3634_v56  ;;  %v3699_v2 = vsub.f32 %v3571_v59, %v3635_v45  ;;  %v10187_v1 = vld [vmem:[#allocation47_spill] sm:$0xff]  ;;  %v10195_v7 = vld [vmem:[#allocation96_spill] sm:$0xff]  ;;  %v10199_v18 = vld [vmem:[#allocation121_spill] sm:$0xff] }
 0x274   : > { %v7731_v30 = vadd.f32 %v3675_v40, %v10179_v14  ;;  %v4028_v12 = vadd.f32 %v3676_v3, %v10180_v4  ;;  %v4029_v39 = vadd.f32 %v3677_v13, %v10181_v22  ;;  %v4030_v53 = vadd.f32 %v3678_v63, %v10182_v43  ;;  %v10188_v59 = vld [vmem:[#allocation51_spill] sm:$0xff]  ;;  %v10194_v63 = vld [vmem:[#allocation90_spill] sm:$0xff]  ;;  %v10196_v55 = vld [vmem:[#allocation100_spill] sm:$0xff] }
 0x275   : > { %v4031_v25 = vadd.f32 %v3679_v27, %v10183_v32  ;;  %v4032_v37 = vadd.f32 %v3680_v62, %v10184_v47  ;;  %v4033_v61 = vadd.f32 %v3681_v38, %v10185_v57  ;;  %v4034_v0 = vadd.f32 %v3682_v35, %v10186_v60  ;;  %v10189_v40 = vld [vmem:[#allocation59_spill] sm:$0xff]  ;;  %v10197_v17 = vld [vmem:[#allocation108_spill] sm:$0xff] }
 0x276   : > { %v4035_v10 = vadd.f32 %v3683_v15, %v10187_v1  ;;  %v4036_v49 = vadd.f32 %v3684_v58, %v10188_v59  ;;  %v4037_v6 = vadd.f32 %v3685_v19, %v10189_v40  ;;  %v10190_v20 = vld [vmem:[#allocation63_spill] sm:$0xff]  ;;  %v4039_v51 = vadd.f32 %v3687_v16, %v10191_v31  ;;  %v10198_v5 = vld [vmem:[#allocation112_spill] sm:$0xff]  ;;  %v10201_v19 = vld [vmem:[#allocation129_spill] sm:$0xff] }
 0x277   : > { %v4038_v3 = vadd.f32 %v3686_v54, %v10190_v20  ;;  %v4040_v50 = vadd.f32 %v3688_v9, %v10192_v34  ;;  %v4041_v29 = vadd.f32 %v3689_v26, %v10193_v21  ;;  %v4042_v13 = vadd.f32 %v3690_v33, %v10194_v63  ;;  %v10200_v45 = vld [vmem:[#allocation127_spill] sm:$0xff]  ;;  %v10202_v62 = vld [vmem:[#allocation132_spill] sm:$0xff]  ;;  %v10205_v63 = vld [vmem:[#allocation153_spill] sm:$0xff] }
 0x278   : > { %v4043_v42 = vadd.f32 %v3691_v46, %v10195_v7  ;;  %v4044_v28 = vadd.f32 %v3692_v36, %v10196_v55  ;;  %v4045_v8 = vadd.f32 %v3693_v44, %v10197_v17  ;;  %v4046_v48 = vadd.f32 %v3694_v24, %v10198_v5  ;;  %v10203_v35 = vld [vmem:[#allocation136_spill] sm:$0xff]  ;;  %v10204_v34 = vld [vmem:[#allocation255_spill] sm:$0xff]  ;;  %v10207_v5 = vld [vmem:[#allocation14_spill] sm:$0xff] }
 0x279   : > { %v4047_v56 = vadd.f32 %v3695_v41, %v10199_v18  ;;  %v4048_v58 = vadd.f32 %v3696_v23, %v10200_v45  ;;  %v4049_v27 = vadd.f32 %v3697_v11, %v10201_v19  ;;  %v4050_v38 = vadd.f32 %v3698_v52, %v10202_v62  ;;  %v10208_v18 = vld [vmem:[#allocation19_spill] sm:$0xff]  ;;  %v10209_v45 = vld [vmem:[#allocation29_spill] sm:$0xff] }
 0x27a   : > { %v4051_v15 = vadd.f32 %v3699_v2, %v10203_v35  ;;  %v4254_v46 = vrot.slane %v7731_v30, 1  ;;  %v4255_v54 = vrot.slane %v4029_v39, 7  ;;  %v4257_v16 = vrot.slane %v4030_v53, 6 }
 0x27b   : > { %v4259_v9 = vrot.slane %v4031_v25, 5  ;;  %v4261_v26 = vrot.slane %v4032_v37, 4  ;;  %v4263_v33 = vrot.slane %v4033_v61, 3  ;;  %v4265_v36 = vrot.slane %v4034_v0, 2 }
 0x27c   : > { %v4267_v11 = vrot.slane %v4035_v10, 1  ;;  %v4256_v44 = vsel %vm4157_vm0, %v4255_v54, %v4028_v12  ;;  %v4269_v24 = vrot.slane %v4037_v6, 7  ;;  %v4271_v41 = vrot.slane %v4038_v3, 6  ;;  %v10212_v54 = vld [vmem:[#allocation45_spill] sm:$0xff] }
 0x27d   : > { %v4273_v23 = vrot.slane %v4039_v51, 5  ;;  %v4258_v52 = vsel %vm4160_vm1, %v4257_v16, %v4256_v44  ;;  %v4275_v2 = vrot.slane %v4040_v50, 4  ;;  %v4277_v14 = vrot.slane %v4041_v29, 3  ;;  %v10325_v50 = vld [vmem:[#allocation117_spill] sm:$0xff] }
 0x27e   : > { %v4279_v4 = vrot.slane %v4042_v13, 2  ;;  %v4260_v22 = vsel %vm4163_vm2, %v4259_v9, %v4258_v52  ;;  %v4270_v30 = vsel %vm4157_vm0, %v4269_v24, %v4036_v49  ;;  %v4281_v39 = vrot.slane %v4043_v42, 1  ;;  %v10213_v9 = vld [vmem:[#allocation54_spill] sm:$0xff]  ;;  %v10216_v52 = vld [vmem:[#allocation79_spill] sm:$0xff] }
 0x27f   : > { %v4283_v43 = vrot.slane %v4045_v8, 7  ;;  %v4262_v53 = vsel %vm4166_vm3, %v4261_v26, %v4260_v22  ;;  %v4272_v32 = vsel %vm4160_vm1, %v4271_v41, %v4270_v30  ;;  %v4285_v25 = vrot.slane %v4046_v48, 6  ;;  %v10215_v41 = vld [vmem:[#allocation67_spill] sm:$0xff] }
 0x280   : > { %v4287_v12 = vrot.slane %v4047_v56, 5  ;;  %v4264_v47 = vsel %vm4169_vm4, %v4263_v33, %v4262_v53  ;;  %v4274_v37 = vsel %vm4163_vm2, %v4273_v23, %v4272_v32  ;;  %v4289_v61 = vrot.slane %v4048_v58, 4  ;;  %v10214_v33 = vld [vmem:[#allocation57_spill] sm:$0xff]  ;;  %v10218_v22 = vld [vmem:[#allocation91_spill] sm:$0xff] }
 0x281   : > { %v4284_v57 = vsel %vm4157_vm0, %v4283_v43, %v4044_v28  ;;  %v4266_v60 = vsel %vm4172_vm5, %v4265_v36, %v4264_v47  ;;  %v4276_v0 = vsel %vm4166_vm3, %v4275_v2, %v4274_v37  ;;  %v4291_v10 = vrot.slane %v4049_v27, 3  ;;  %v10206_v28 = vld [vmem:[#allocation12_spill] sm:$0xff]  ;;  %v10221_v47 = vld [vmem:[#allocation106_spill] sm:$0xff] }
 0x282   : > { %v4286_v1 = vsel %vm4160_vm1, %v4285_v25, %v4284_v57  ;;  %v4268_v59 = vsel %vm4174_vm6, %v4267_v11, %v4266_v60  ;;  %v4278_v49 = vsel %vm4169_vm4, %v4277_v14, %v4276_v0  ;;  %v4293_v6 = vrot.slane %v4050_v38, 2  ;;  %v10210_v38 = vld [vmem:[#allocation31_spill] sm:$0xff]  ;;  %v10217_v14 = vld [vmem:[#allocation81_spill] sm:$0xff]  ;;  %v10222_v57 = vld [vmem:[#allocation116_spill] sm:$0xff] }
 0x283   : > { %v4288_v40 = vsel %vm4163_vm2, %v4287_v12, %v4286_v1  ;;  %v4280_v20 = vsel %vm4172_vm5, %v4279_v4, %v4278_v49  ;;  %v4295_v31 = vrot.slane %v4051_v15, 1  ;;  %v4499_v51 = vpack.c.bf16 %v4268_v59, %v4254_v46  ;;  %v10211_v15 = vld [vmem:[#allocation41_spill] sm:$0xff]  ;;  %v10220_v25 = vld [vmem:[#allocation103_spill] sm:$0xff]  ;;  %v10223_v60 = vld [vmem:[#allocation206_spill] sm:$0xff] }
 0x284   : > { %v4290_v3 = vsel %vm4166_vm3, %v4289_v61, %v4288_v40  ;;  %v4282_v21 = vsel %vm4174_vm6, %v4281_v39, %v4280_v20  ;;  %v2043_v13 = vrot.slane %v10205_v63, 5  ;;  %v2049_v17 = vrot.slane %v10206_v28, 5  ;;  %v10219_v39 = vld [vmem:[#allocation94_spill] sm:$0xff]  ;;  %v10224_v1 = vld [vmem:[#allocation204_spill] sm:$0xff] }
 0x285   : > { %v4292_v29 = vsel %vm4169_vm4, %v4291_v10, %v4290_v3  ;;  %v4600_v42 = vshrl.u32 %v4499_v51, 16  ;;  %v4603_v55 = vshll.u32 %v4499_v51, 16  ;;  %v2050_v48 = vrot.slane %v10207_v5, 5  ;;  %v10225_v10 = vld [vmem:[#allocation172_spill] sm:$0xff]  ;;  %v10227_v40 = vld [vmem:[#allocation18_spill] sm:$0xff]  ;;  %v10230_v3 = vld [vmem:[#allocation21_spill] sm:$0xff] }
 0x286   : > { %v4294_v7 = vsel %vm4172_vm5, %v4293_v6, %v4292_v29  ;;  %v2051_v56 = vrot.slane %v10208_v18, 5  ;;  %v2053_v58 = vrot.slane %v10209_v45, 5  ;;  %v2054_v35 = vrot.slane %v10210_v38, 5  ;;  %v10232_v51 = vld [vmem:[#allocation28_spill] sm:$0xff]  ;;  %v10234_v29 = vld [vmem:[#allocation39_spill] sm:$0xff]  ;;  %v10297_v63 = vld [vmem:[#allocation30_spill] sm:$0xff] }
 0x287   : > { %v4296_v8 = vsel %vm4174_vm6, %v4295_v31, %v4294_v7  ;;  %v4602_v27 = vrot.slane %v4600_v42, 3  ;;  %v4605_v62 = vrot.slane %v4603_v55, 4  ;;  %v2055_v46 = vrot.slane %v10211_v15, 5  ;;  %v10238_v55 = vld [vmem:[#allocation53_spill] sm:$0xff]  ;;  %v10291_v15 = vld [vmem:[#allocation15_spill] sm:$0xff]  ;;  %v10293_v45 = vld [vmem:[#allocation20_spill] sm:$0xff] }
 0x288   : > { %v4503_v19 = vpack.c.bf16 %v4296_v8, %v4282_v21  ;;  %v2056_v16 = vrot.slane %v10212_v54, 5  ;;  %v2057_v26 = vrot.slane %v10213_v9, 5  ;;  %v2058_v36 = vrot.slane %v10214_v33, 5  ;;  %v10289_v9 = vld [vmem:[#allocation13_spill] sm:$0xff]  ;;  %v10295_v5 = vld [vmem:[#allocation23_spill] sm:$0xff] }
 0x289   : > { %v4606_v11 = vor.u32 %v4605_v62, %v4602_v27  ;;  %v2059_v23 = vrot.slane %v10215_v41, 5  ;;  %v2061_v2 = vrot.slane %v10216_v52, 5  ;;  %v2062_v4 = vrot.slane %v10217_v14, 5  ;;  %v10242_v27 = vld [vmem:[#allocation65_spill] sm:$0xff]  ;;  %v10287_v41 = vld [vmem:[#allocation155_spill] sm:$0xff] }
 0x28a   : > { %v4608_v44 = vshrl.u32 %v4503_v19, 16  ;;  %v4611_v24 = vshll.u32 %v4503_v19, 16  ;;  %v2063_v30 = vrot.slane %v10218_v22, 5  ;;  %v2064_v43 = vrot.slane %v10219_v39, 5  ;;  %v10240_v19 = vld [vmem:[#allocation56_spill] sm:$0xff]  ;;  %v10294_v39 = vld [vmem:[#allocation115_spill] sm:$0xff] }
 0x28b   : > { %v2065_v12 = vrot.slane %v10220_v25, 5  ;;  %v2066_v37 = vrot.slane %v10221_v47, 5  ;;  %v2067_v61 = vrot.slane %v10222_v57, 5  ;;  %v7799_v0 = vadd.f32 %v2043_v13, %v10223_v60  ;;  %v10236_v13 = vld [vmem:[#allocation44_spill] sm:$0xff]  ;;  %v10288_v57 = vld [vmem:[#allocation221_spill] sm:$0xff]  ;;  %v10290_v47 = vld [vmem:[#allocation42_spill] sm:$0xff] }
 0x28c   : > { %v4610_v53 = vrot.slane %v4608_v44, 3  ;;  %v4613_v32 = vrot.slane %v4611_v24, 4  ;;  %v10226_v59 = vrot.slane %v10225_v10, 5  ;;  %v7807_v6 = vadd.f32 %v2049_v17, %v10227_v40  ;;  %v10292_v25 = vld [vmem:[#allocation66_spill] sm:$0xff]  ;;  %v10298_v14 = vld [vmem:[#allocation137_spill] sm:$0xff]  ;;  %v10301_v10 = vld [vmem:[#allocation43_spill] sm:$0xff] }
 0x28d   : > { %v7812_v31 = vadd.f32 %v2050_v48, %v10230_v3  ;;  %v7815_v21 = vadd.f32 %v2051_v56, %v10232_v51  ;;  %v7818_v7 = vadd.f32 %v2053_v58, %v10234_v29  ;;  %v7821_v42 = vadd.f32 %v2054_v35, %v10236_v13  ;;  %v10244_v56 = vld [vmem:[#allocation69_spill] sm:$0xff]  ;;  %v10296_v22 = vld [vmem:[#allocation134_spill] sm:$0xff] }
 0x28e   : > { %v7804_v49 = vadd.f32 %v10226_v59, %v10224_v1  ;;  %10228 = vst [vmem:[#allocation194_spill] sm:$0xff] %v7807_v6  ;;  %v7809_v20 = vor.u32 %v4613_v32, %v4610_v53  ;;  %v7824_v8 = vadd.f32 %v2055_v46, %v10238_v55  ;;  %v7827_v17 = vadd.f32 %v2056_v16, %v10240_v19  ;;  %v10246_v58 = vld [vmem:[#allocation77_spill] sm:$0xff]  ;;  %v10252_v16 = vld [vmem:[#allocation102_spill] sm:$0xff]  ;;  %v10311_v55 = vld [vmem:[#allocation71_spill] sm:$0xff] }
 0x28f   : > { %10231 = vst [vmem:[#allocation158_spill] sm:$0xff] %v7812_v31  ;;  %10233 = vst [vmem:[#allocation175_spill] sm:$0xff] %v7815_v21  ;;  %v7830_v62 = vadd.f32 %v2057_v26, %v10242_v27  ;;  %v7835_v44 = vadd.f32 %v2058_v36, %v10244_v56  ;;  %v7838_v24 = vadd.f32 %v2059_v23, %v10246_v58  ;;  %v10248_v35 = vld [vmem:[#allocation89_spill] sm:$0xff]  ;;  %v10258_v36 = vld [vmem:[#allocation118_spill] sm:$0xff] }
 0x290   : > { %10229 = vst [vmem:[#allocation160_spill] sm:$0xff] %v7809_v20  ;;  %10235 = vst [vmem:[#allocation174_spill] sm:$0xff] %v7818_v7  ;;  %v4615_v48 = vsel %vm4581_vm7, %v4606_v11, %v7809_v20  ;;  %v7841_v53 = vadd.f32 %v2061_v2, %v10248_v35  ;;  %v10250_v46 = vld [vmem:[#allocation93_spill] sm:$0xff]  ;;  %v7847_v60 = vadd.f32 %v2063_v30, %v10252_v16  ;;  %v10256_v11 = vld [vmem:[#allocation114_spill] sm:$0xff] }
 0x291   : > { %10237 = vst [vmem:[#allocation185_spill] sm:$0xff] %v7821_v42  ;;  %10239 = vst [vmem:[#allocation182_spill] sm:$0xff] %v7824_v8  ;;  %4918 = vmatprep.mubr.bf16.mxu1 %v4615_v48  ;;  %v7844_v32 = vadd.f32 %v2062_v4, %v10250_v46  ;;  %v10254_v26 = vld [vmem:[#allocation105_spill] sm:$0xff]  ;;  %v7853_v59 = vadd.f32 %v2065_v12, %v10256_v11  ;;  %v7856_v40 = vadd.f32 %v2066_v37, %v10258_v36  ;;  %v10263_v4 = vld [vmem:[#allocation195_spill] sm:$0xff] }
 0x292   : > { %10241 = vst [vmem:[#allocation202_spill] sm:$0xff] %v7827_v17  ;;  %10243 = vst [vmem:[#allocation201_spill] sm:$0xff] %v7830_v62  ;;  %v7850_v1 = vadd.f32 %v2064_v43, %v10254_v26  ;;  %v10260_v23 = vld [vmem:[#allocation125_spill] sm:$0xff]  ;;  %v10265_v30 = vld [vmem:[#allocation207_spill] sm:$0xff]  ;;  %v3387_v33 = vsub.f32 %v10288_v57, %v10287_v41  ;;  %v3393_v54 = vsub.f32 %v10290_v47, %v10289_v9 }
 0x293   : > { %10245 = vst [vmem:[#allocation219_spill] sm:$0xff] %v7835_v44  ;;  %10247 = vst [vmem:[#allocation210_spill] sm:$0xff] %v7838_v24  ;;  %v7859_v3 = vadd.f32 %v2067_v61, %v10260_v23  ;;  %v10262_v2 = vld [vmem:[#allocation213_spill] sm:$0xff]  ;;  %v3394_v38 = vsub.f32 %v10292_v25, %v10291_v15  ;;  %v3395_v18 = vsub.f32 %v10294_v39, %v10293_v45  ;;  %v10302_v57 = vld [vmem:[#allocation142_spill] sm:$0xff] }
 0x294   : > { %10249 = vst [vmem:[#allocation177_spill] sm:$0xff] %v7841_v53  ;;  %10251 = vst [vmem:[#allocation211_spill] sm:$0xff] %v7844_v32  ;;  %v10264_v29 = vld [vmem:[#allocation197_spill] sm:$0xff]  ;;  %v3396_v28 = vsub.f32 %v10296_v22, %v10295_v5  ;;  %v3397_v20 = vsub.f32 %v10298_v14, %v10297_v63  ;;  %v3399_v41 = vsub.f32 %v10302_v57, %v10301_v10  ;;  %v10303_v51 = vld [vmem:[#allocation46_spill] sm:$0xff] }
 0x295   : > { %10253 = vst [vmem:[#allocation212_spill] sm:$0xff] %v7847_v60  ;;  %10255 = vst [vmem:[#allocation215_spill] sm:$0xff] %v7850_v1  ;;  %v10300_v52 = vld [vmem:[#allocation141_spill] sm:$0xff]  ;;  %v10304_v47 = vld [vmem:[#allocation143_spill] sm:$0xff] }
 0x296   : > { %10257 = vst [vmem:[#allocation33_spill] sm:$0xff] %v7853_v59  ;;  %10259 = vst [vmem:[#allocation40_spill] sm:$0xff] %v7856_v40  ;;  %v10299_v40 = vld [vmem:[#allocation32_spill] sm:$0xff]  ;;  %v3400_v9 = vsub.f32 %v10304_v47, %v10303_v51  ;;  %v10305_v59 = vld [vmem:[#allocation55_spill] sm:$0xff] }
 0x297   : > { %10261 = vst [vmem:[#allocation47_spill] sm:$0xff] %v7859_v3  ;;  %v3398_v3 = vsub.f32 %v10300_v52, %v10299_v40  ;;  %v10306_v25 = vld [vmem:[#allocation144_spill] sm:$0xff]  ;;  %v10307_v13 = vld [vmem:[#allocation58_spill] sm:$0xff]  ;;  %v10312_v14 = vld [vmem:[#allocation151_spill] sm:$0xff] }
 0x298   : > { %v3401_v15 = vsub.f32 %v10306_v25, %v10305_v59  ;;  %v10308_v39 = vld [vmem:[#allocation146_spill] sm:$0xff]  ;;  %v10309_v1 = vld [vmem:[#allocation68_spill] sm:$0xff]  ;;  %v3404_v63 = vsub.f32 %v10312_v14, %v10311_v55  ;;  %v10319_v36 = vld [vmem:[#allocation95_spill] sm:$0xff] }
 0x299   : > { %v3402_v45 = vsub.f32 %v10308_v39, %v10307_v13  ;;  %v10310_v22 = vld [vmem:[#allocation150_spill] sm:$0xff]  ;;  %v10313_v60 = vld [vmem:[#allocation80_spill] sm:$0xff]  ;;  %v10323_v26 = vld [vmem:[#allocation107_spill] sm:$0xff] }
 0x29a   : > { %v3403_v5 = vsub.f32 %v10310_v22, %v10309_v1  ;;  %v10314_v52 = vld [vmem:[#allocation152_spill] sm:$0xff]  ;;  %v10315_v19 = vld [vmem:[#allocation82_spill] sm:$0xff]  ;;  %v10327_v46 = vld [vmem:[#allocation243_spill] sm:$0xff] }
 0x29b   : > { %v3405_v40 = vsub.f32 %v10314_v52, %v10313_v60  ;;  %v10316_v57 = vld [vmem:[#allocation154_spill] sm:$0xff]  ;;  %v10317_v32 = vld [vmem:[#allocation92_spill] sm:$0xff]  ;;  %v3451_v52 = vrot.slane %v10327_v46, 7  ;;  %v10336_v27 = vld [vmem:[#allocation253_spill] sm:$0xff] }
 0x29c   : > { %v3406_v10 = vsub.f32 %v10316_v57, %v10315_v19  ;;  %v10318_v47 = vld [vmem:[#allocation156_spill] sm:$0xff]  ;;  %v10320_v25 = vld [vmem:[#allocation214_spill] sm:$0xff]  ;;  %v10329_v57 = vld [vmem:[#allocation245_spill] sm:$0xff] }
 0x29d   : > { %v3407_v51 = vsub.f32 %v10318_v47, %v10317_v32  ;;  %v3408_v59 = vsub.f32 %v10320_v25, %v10319_v36  ;;  %v10321_v53 = vld [vmem:[#allocation104_spill] sm:$0xff]  ;;  %v10322_v39 = vld [vmem:[#allocation218_spill] sm:$0xff]  ;;  %v3458_v19 = vrot.slane %v10329_v57, 7  ;;  %v10332_v25 = vld [vmem:[#allocation249_spill] sm:$0xff]  ;;  %v3515_v35 = vsub.f32 %v3387_v33, %v3451_v52 }
 0x29e   : > { %v3409_v13 = vsub.f32 %v10322_v39, %v10321_v53  ;;  %v10324_v22 = vld [vmem:[#allocation220_spill] sm:$0xff]  ;;  %v10326_v14 = vld [vmem:[#allocation222_spill] sm:$0xff]  ;;  %v3462_v36 = vrot.slane %v10332_v25, 7  ;;  %v10334_v53 = vld [vmem:[#allocation251_spill] sm:$0xff] }
 0x29f   : > { %v3410_v1 = vsub.f32 %v10324_v22, %v10323_v26  ;;  %v3411_v55 = vsub.f32 %v10326_v14, %v10325_v50  ;;  %v10328_v60 = vld [vmem:[#allocation244_spill] sm:$0xff]  ;;  %v10330_v58 = vld [vmem:[#allocation246_spill] sm:$0xff]  ;;  %v3464_v62 = vrot.slane %v10334_v53, 7  ;;  %v3466_v14 = vrot.slane %v10336_v27, 7  ;;  %v10339_v23 = vld [vmem:[#allocation257_spill] sm:$0xff] }
 0x2a0   : > { %v3457_v24 = vrot.slane %v10328_v60, 7  ;;  %v3459_v47 = vrot.slane %v10330_v58, 7  ;;  %v10331_v32 = vld [vmem:[#allocation248_spill] sm:$0xff]  ;;  %v10333_v48 = vld [vmem:[#allocation250_spill] sm:$0xff]  ;;  %v3470_v57 = vrot.slane %v10339_v23, 7  ;;  %v10341_v11 = vld [vmem:[#allocation259_spill] sm:$0xff]  ;;  %v3522_v61 = vsub.f32 %v3394_v38, %v3458_v19 }
 0x2a1   : > { %v3461_v44 = vrot.slane %v10331_v32, 7  ;;  %v3463_v39 = vrot.slane %v10333_v48, 7  ;;  %v10335_v22 = vld [vmem:[#allocation252_spill] sm:$0xff]  ;;  %v10337_v50 = vld [vmem:[#allocation254_spill] sm:$0xff]  ;;  %v3472_v32 = vrot.slane %v10341_v11, 7  ;;  %v10343_v16 = vld [vmem:[#allocation261_spill] sm:$0xff]  ;;  %v3526_v37 = vsub.f32 %v3398_v3, %v3462_v36 }
 0x2a2   : > { %v3465_v26 = vrot.slane %v10335_v22, 7  ;;  %v3467_v46 = vrot.slane %v10337_v50, 7  ;;  %v10338_v17 = vld [vmem:[#allocation256_spill] sm:$0xff]  ;;  %v10340_v8 = vld [vmem:[#allocation258_spill] sm:$0xff]  ;;  %v3474_v48 = vrot.slane %v10343_v16, 7  ;;  %v3521_v22 = vsub.f32 %v3393_v54, %v3457_v24  ;;  %v10345_v56 = vld [vmem:[#allocation247_spill] sm:$0xff] }
 0x2a3   : > { %v3469_v60 = vrot.slane %v10338_v17, 7  ;;  %v3471_v58 = vrot.slane %v10340_v8, 7  ;;  %v10342_v42 = vld [vmem:[#allocation260_spill] sm:$0xff]  ;;  %v10344_v7 = vld [vmem:[#allocation262_spill] sm:$0xff]  ;;  %v3523_v27 = vsub.f32 %v3395_v18, %v3459_v47  ;;  %v10346_v50 = vrot.slane %v10345_v56, 7  ;;  %v10348_v47 = vld [vmem:[#allocation205_spill] sm:$0xff] }
 0x2a4   : > { %v3473_v25 = vrot.slane %v10342_v42, 7  ;;  %v3475_v53 = vrot.slane %v10344_v7, 7  ;;  %v3525_v17 = vsub.f32 %v3397_v20, %v3461_v44  ;;  %v3527_v23 = vsub.f32 %v3399_v41, %v3463_v39  ;;  %v10351_v19 = vld [vmem:[#allocation161_spill] sm:$0xff] }
 0x2a5   : > { %v3524_v21 = vsub.f32 %v3396_v28, %v10346_v50  ;;  %v3528_v31 = vsub.f32 %v3400_v9, %v3464_v62  ;;  %v3529_v8 = vsub.f32 %v3401_v15, %v3465_v26  ;;  %v3530_v12 = vsub.f32 %v3402_v45, %v3466_v14  ;;  %v10355_v56 = vld [vmem:[#allocation173_spill] sm:$0xff] }
 0x2a6   : > { %v3531_v11 = vsub.f32 %v3403_v5, %v3467_v46  ;;  %v10347_v42 = vrot.slane %v10204_v34, 7  ;;  %v3533_v16 = vsub.f32 %v3405_v40, %v3469_v60  ;;  %v3534_v43 = vsub.f32 %v3406_v10, %v3470_v57  ;;  %v10360_v46 = vld [vmem:[#allocation186_spill] sm:$0xff]  ;;  %v10361_v60 = vld [vmem:[#allocation184_spill] sm:$0xff] }
 0x2a7   : > { %v3535_v7 = vsub.f32 %v3407_v51, %v3471_v58  ;;  %v3536_v33 = vsub.f32 %v3408_v59, %v3472_v32  ;;  %v3537_v54 = vsub.f32 %v3409_v13, %v3473_v25  ;;  %v3538_v38 = vsub.f32 %v3410_v1, %v3474_v48  ;;  %v10363_v58 = vld [vmem:[#allocation192_spill] sm:$0xff] }
 0x2a8   : > { %v3532_v6 = vsub.f32 %v3404_v63, %v10347_v42  ;;  %v3539_v18 = vsub.f32 %v3411_v55, %v3475_v53  ;;  %v3931_v52 = vrot.slane %v3515_v35, 1  ;;  %v3935_v28 = vrot.slane %v10348_v47, 1  ;;  %v10372_v42 = vld [vmem:[#allocation26_spill] sm:$0xff]  ;;  %v10379_v47 = vld [vmem:[#allocation36_spill] sm:$0xff] }
 0x2a9   : > { %v3937_v20 = vrot.slane %v3521_v22, 1  ;;  %v3938_v44 = vrot.slane %v3522_v61, 1  ;;  %v3939_v41 = vrot.slane %v3523_v27, 1  ;;  %v3940_v9 = vrot.slane %v3524_v21, 1  ;;  %v10350_v21 = vld [vmem:[#allocation164_spill] sm:$0xff] }
 0x2aa   : > { %v3941_v15 = vrot.slane %v3525_v17, 1  ;;  %v3942_v45 = vrot.slane %v3526_v37, 1  ;;  %v3943_v5 = vrot.slane %v3527_v23, 1  ;;  %v3944_v14 = vrot.slane %v3528_v31, 1  ;;  %v10353_v31 = vld [vmem:[#allocation169_spill] sm:$0xff]  ;;  %v10367_v22 = vld [vmem:[#allocation216_spill] sm:$0xff] }
 0x2ab   : > { %v3945_v34 = vrot.slane %v3529_v8, 1  ;;  %v3946_v63 = vrot.slane %v3530_v12, 1  ;;  %v3947_v39 = vrot.slane %v3531_v11, 1  ;;  %v3948_v10 = vrot.slane %v3532_v6, 1  ;;  %v10356_v6 = vld [vmem:[#allocation171_spill] sm:$0xff]  ;;  %v10369_v17 = vld [vmem:[#allocation24_spill] sm:$0xff] }
 0x2ac   : > { %v3949_v62 = vrot.slane %v3533_v16, 1  ;;  %v3950_v24 = vrot.slane %v3534_v43, 1  ;;  %v3951_v59 = vrot.slane %v3535_v7, 1  ;;  %v3952_v1 = vrot.slane %v3536_v33, 1  ;;  %v10358_v43 = vld [vmem:[#allocation181_spill] sm:$0xff]  ;;  %v10370_v23 = vld [vmem:[#allocation194_spill] sm:$0xff] }
 0x2ad   : > { %v3953_v40 = vrot.slane %v3537_v54, 1  ;;  %v3954_v3 = vrot.slane %v3538_v38, 1  ;;  %v3955_v51 = vrot.slane %v3539_v18, 1  ;;  %v10349_v13 = vsub.f32 %v10262_v2, %v7799_v0  ;;  %v10373_v16 = vld [vmem:[#allocation158_spill] sm:$0xff]  ;;  %v10376_v38 = vld [vmem:[#allocation175_spill] sm:$0xff] }
 0x2ae   : > { %v10352_v37 = vsub.f32 %v10350_v21, %v10351_v19  ;;  %v10354_v61 = vrot.slane %v10353_v31, 1  ;;  %v10357_v35 = vsub.f32 %v10355_v56, %v10356_v6  ;;  %v10359_v26 = vrot.slane %v10358_v43, 1  ;;  %v10375_v54 = vld [vmem:[#allocation34_spill] sm:$0xff]  ;;  %v10385_v56 = vld [vmem:[#allocation185_spill] sm:$0xff] }
 0x2af   : > { %v7971_v55 = vadd.f32 %v3931_v52, %v10349_v13  ;;  %v10362_v57 = vsub.f32 %v10360_v46, %v10361_v60  ;;  %v10364_v32 = vrot.slane %v10363_v58, 1  ;;  %v10365_v25 = vsub.f32 %v10264_v29, %v10263_v4  ;;  %v10378_v4 = vld [vmem:[#allocation37_spill] sm:$0xff]  ;;  %v10382_v19 = vld [vmem:[#allocation174_spill] sm:$0xff] }
 0x2b0   : > { %v3996_v12 = vadd.f32 %v10354_v61, %v10352_v37  ;;  %v3997_v36 = vadd.f32 %v10359_v26, %v10357_v35  ;;  %v10366_v53 = vsub.f32 %v10265_v30, %v7804_v49  ;;  %v10368_v27 = vrot.slane %v10367_v22, 1  ;;  %v10381_v49 = vld [vmem:[#allocation48_spill] sm:$0xff]  ;;  %v10384_v61 = vld [vmem:[#allocation50_spill] sm:$0xff]  ;;  %v10396_v22 = vld [vmem:[#allocation75_spill] sm:$0xff] }
 0x2b1   : > { %v3998_v0 = vadd.f32 %v10364_v32, %v10362_v57  ;;  %v3999_v48 = vadd.f32 %v3935_v28, %v10365_v25  ;;  %v10371_v8 = vsub.f32 %v10369_v17, %v10370_v23  ;;  %v10374_v7 = vsub.f32 %v10372_v42, %v10373_v16  ;;  %v10387_v35 = vld [vmem:[#allocation60_spill] sm:$0xff]  ;;  %v10388_v43 = vld [vmem:[#allocation182_spill] sm:$0xff]  ;;  %v10393_v32 = vld [vmem:[#allocation73_spill] sm:$0xff] }
 0x2b2   : > { %v4000_v50 = vadd.f32 %v10368_v27, %v10366_v53  ;;  %v10377_v18 = vsub.f32 %v10375_v54, %v10376_v38  ;;  %v10380_v28 = vsub.f32 %v10378_v4, %v10379_v47  ;;  %v10383_v37 = vsub.f32 %v10381_v49, %v10382_v19  ;;  %v10390_v60 = vld [vmem:[#allocation62_spill] sm:$0xff]  ;;  %v10394_v25 = vld [vmem:[#allocation201_spill] sm:$0xff]  ;;  %v10397_v27 = vld [vmem:[#allocation219_spill] sm:$0xff] }
 0x2b3   : > { %v4001_v11 = vadd.f32 %v3937_v20, %v10371_v8  ;;  %v4002_v33 = vadd.f32 %v3938_v44, %v10374_v7  ;;  %v10386_v6 = vsub.f32 %v10384_v61, %v10385_v56  ;;  %v10389_v26 = vsub.f32 %v10387_v35, %v10388_v43  ;;  %v10391_v57 = vld [vmem:[#allocation202_spill] sm:$0xff]  ;;  %v10399_v8 = vld [vmem:[#allocation84_spill] sm:$0xff]  ;;  %v10402_v38 = vld [vmem:[#allocation87_spill] sm:$0xff] }
 0x2b4   : > { %v4003_v52 = vadd.f32 %v3939_v41, %v10377_v18  ;;  %v4004_v13 = vadd.f32 %v3940_v9, %v10380_v28  ;;  %v4005_v31 = vadd.f32 %v3941_v15, %v10383_v37  ;;  %v10392_v58 = vsub.f32 %v10390_v60, %v10391_v57  ;;  %v10400_v16 = vld [vmem:[#allocation210_spill] sm:$0xff]  ;;  %v10405_v28 = vld [vmem:[#allocation97_spill] sm:$0xff]  ;;  %v10408_v56 = vld [vmem:[#allocation99_spill] sm:$0xff] }
 0x2b5   : > { %v4006_v20 = vadd.f32 %v3942_v45, %v10386_v6  ;;  %v4007_v44 = vadd.f32 %v3943_v5, %v10389_v26  ;;  %v10395_v53 = vsub.f32 %v10393_v32, %v10394_v25  ;;  %v10398_v23 = vsub.f32 %v10396_v22, %v10397_v27  ;;  %v10403_v18 = vld [vmem:[#allocation86_spill] sm:$0xff]  ;;  %v10406_v19 = vld [vmem:[#allocation177_spill] sm:$0xff]  ;;  %v10409_v6 = vld [vmem:[#allocation211_spill] sm:$0xff] }
 0x2b6   : > { %v4008_v41 = vadd.f32 %v3944_v14, %v10392_v58  ;;  %v10401_v7 = vsub.f32 %v10399_v8, %v10400_v16  ;;  %v10404_v47 = vsub.f32 %v10402_v38, %v10403_v18  ;;  %v10407_v37 = vsub.f32 %v10405_v28, %v10406_v19  ;;  %v10411_v26 = vld [vmem:[#allocation109_spill] sm:$0xff]  ;;  %v10412_v57 = vld [vmem:[#allocation212_spill] sm:$0xff]  ;;  %v10414_v25 = vld [vmem:[#allocation111_spill] sm:$0xff] }
 0x2b7   : > { %v4009_v9 = vadd.f32 %v3945_v34, %v10395_v53  ;;  %v4010_v15 = vadd.f32 %v3946_v63, %v10398_v23  ;;  %v10410_v43 = vsub.f32 %v10408_v56, %v10409_v6  ;;  %v10413_v58 = vsub.f32 %v10411_v26, %v10412_v57  ;;  %v10415_v53 = vld [vmem:[#allocation215_spill] sm:$0xff]  ;;  %v10417_v23 = vld [vmem:[#allocation122_spill] sm:$0xff]  ;;  %v10418_v16 = vld [vmem:[#allocation33_spill] sm:$0xff] }
 0x2b8   : > { %v4011_v45 = vadd.f32 %v3947_v39, %v10401_v7  ;;  %v4012_v5 = vadd.f32 %v3948_v10, %v10404_v47  ;;  %v4013_v14 = vadd.f32 %v3949_v62, %v10407_v37  ;;  %v10416_v27 = vsub.f32 %v10414_v25, %v10415_v53  ;;  %v10420_v18 = vld [vmem:[#allocation124_spill] sm:$0xff]  ;;  %v10423_v37 = vld [vmem:[#allocation133_spill] sm:$0xff]  ;;  %v10424_v28 = vld [vmem:[#allocation47_spill] sm:$0xff] }
 0x2b9   : > { %v4014_v34 = vadd.f32 %v3950_v24, %v10410_v43  ;;  %v4015_v63 = vadd.f32 %v3951_v59, %v10413_v58  ;;  %v10419_v7 = vsub.f32 %v10417_v23, %v10418_v16  ;;  %v10421_v47 = vld [vmem:[#allocation40_spill] sm:$0xff]  ;;  %v10425_v6 = vsub.f32 %v10423_v37, %v10424_v28  ;;  %v10450_v8 = vld [vmem:[#allocation131_spill] sm:$0xff] }
 0x2ba   : > { %v4016_v39 = vadd.f32 %v3952_v1, %v10416_v27  ;;  %v10422_v19 = vsub.f32 %v10420_v18, %v10421_v47  ;;  %v4155_v43 = vrot.slane %v3996_v12, 7  ;;  %v4156_v56 = vrot.slane %v3997_v36, 6  ;;  %v10449_v25 = vld [vmem:[#allocation128_spill] sm:$0xff] }
 0x2bb   : > { %v4017_v10 = vadd.f32 %v3953_v40, %v10419_v7  ;;  %v4019_v24 = vadd.f32 %v3955_v51, %v10425_v6  ;;  %v4159_v57 = vrot.slane %v3998_v0, 5  ;;  %v4162_v59 = vrot.slane %v3999_v48, 4  ;;  %v10426_v6 = vld [vmem:[#allocation119_spill] sm:$0xff] }
 0x2bc   : > { %v4018_v62 = vadd.f32 %v3954_v3, %v10422_v19  ;;  %v4165_v58 = vrot.slane %v4000_v50, 3  ;;  %v4168_v26 = vrot.slane %v4001_v11, 2  ;;  %v4171_v53 = vrot.slane %v4002_v33, 1 }
 0x2bd   : > { %v4176_v1 = vrot.slane %v4004_v13, 7  ;;  %v4158_v27 = vsel %vm4157_vm0, %v4156_v56, %v4155_v43  ;;  %v4177_v16 = vrot.slane %v4005_v31, 6  ;;  %v4179_v40 = vrot.slane %v4006_v20, 5 }
 0x2be   : > { %v4181_v7 = vrot.slane %v4007_v44, 4  ;;  %v4161_v47 = vsel %vm4160_vm1, %v4159_v57, %v4158_v27  ;;  %v4183_v3 = vrot.slane %v4008_v41, 3  ;;  %v4185_v19 = vrot.slane %v4009_v9, 2 }
 0x2bf   : > { %v4187_v18 = vrot.slane %v4010_v15, 1  ;;  %v4164_v51 = vsel %vm4163_vm2, %v4162_v59, %v4161_v47  ;;  %v4178_v12 = vsel %vm4157_vm0, %v4177_v16, %v4176_v1  ;;  %v4190_v36 = vrot.slane %v4012_v5, 7 }
 0x2c0   : > { %v4191_v0 = vrot.slane %v4013_v14, 6  ;;  %v4167_v48 = vsel %vm4166_vm3, %v4165_v58, %v4164_v51  ;;  %v4180_v50 = vsel %vm4160_vm1, %v4179_v40, %v4178_v12  ;;  %v4193_v11 = vrot.slane %v4014_v34, 5 }
 0x2c1   : > { %v4195_v33 = vrot.slane %v4015_v63, 4  ;;  %v4170_v13 = vsel %vm4169_vm4, %v4168_v26, %v4167_v48  ;;  %v4182_v31 = vsel %vm4163_vm2, %v4181_v7, %v4180_v50  ;;  %v4197_v44 = vrot.slane %v4016_v39, 3  ;;  %v10429_v7 = vld [vmem:[#allocation135_spill] sm:$0xff] }
 0x2c2   : > { %v4192_v20 = vsel %vm4157_vm0, %v4191_v0, %v4190_v36  ;;  %v4173_v41 = vsel %vm4172_vm5, %v4171_v53, %v4170_v13  ;;  %v4184_v9 = vsel %vm4166_vm3, %v4183_v3, %v4182_v31  ;;  %v4199_v5 = vrot.slane %v4017_v10, 2  ;;  %v10427_v10 = vld [vmem:[#allocation126_spill] sm:$0xff]  ;;  %v10430_v48 = vld [vmem:[#allocation139_spill] sm:$0xff] }
 0x2c3   : > { %v4194_v15 = vsel %vm4160_vm1, %v4193_v11, %v4192_v20  ;;  %v4175_v28 = vsel %vm4174_vm6, %v4003_v52, %v4173_v41  ;;  %v4186_v14 = vsel %vm4169_vm4, %v4185_v19, %v4184_v9  ;;  %v4201_v34 = vrot.slane %v4018_v62, 1  ;;  %v10428_v52 = vld [vmem:[#allocation130_spill] sm:$0xff] }
 0x2c4   : > { %v4196_v56 = vsel %vm4163_vm2, %v4195_v33, %v4194_v15  ;;  %v4188_v26 = vsel %vm4172_vm5, %v4187_v18, %v4186_v14  ;;  %v4498_v39 = vpack.c.bf16 %v4175_v28, %v7971_v55  ;;  %v1553_v43 = vrot.slane %v10426_v6, 4  ;;  %v10431_v28 = vld [vmem:[#allocation145_spill] sm:$0xff] }
 0x2c5   : > { %v4198_v63 = vsel %vm4166_vm3, %v4197_v44, %v4196_v56  ;;  %v4189_v57 = vsel %vm4174_vm6, %v4011_v45, %v4188_v26  ;;  %v1559_v58 = vrot.slane %v10427_v10, 4  ;;  %v1565_v53 = vrot.slane %v10428_v52, 4 }
 0x2c6   : > { %v4200_v59 = vsel %vm4169_vm4, %v4199_v5, %v4198_v63  ;;  %v4583_v27 = vshrl.u32 %v4498_v39, 16  ;;  %v4586_v62 = vshll.u32 %v4498_v39, 16  ;;  %v1554_v18 = vadd.f32 %v1553_v43, %v10426_v6  ;;  %v5713_v43 = vld [vmem:[#allocation7 + $0x80] sm:$0xff]  }
 0x2c7   : > { %v4202_v1 = vsel %vm4172_vm5, %v4201_v34, %v4200_v59  ;;  %v1560_v55 = vadd.f32 %v1559_v58, %v10427_v10  ;;  %v1566_v40 = vadd.f32 %v1565_v53, %v10428_v52  ;;  %v1571_v45 = vrot.slane %v10429_v7, 4  ;;  %v10434_v58 = vld [vmem:[#allocation148_spill] sm:$0xff] }
 0x2c8   : > { %v4203_v16 = vsel %vm4174_vm6, %v4019_v24, %v4202_v1  ;;  %v4585_v3 = vrot.slane %v4583_v27, 3  ;;  %v4588_v19 = vrot.slane %v4586_v62, 4  ;;  %v1555_v51 = vrot.slane %v1554_v18, 2 }
 0x2c9   : > { %v4502_v47 = vpack.c.bf16 %v4203_v16, %v4189_v57  ;;  %v1561_v12 = vrot.slane %v1560_v55, 2  ;;  %v1567_v36 = vrot.slane %v1566_v40, 2  ;;  %v1572_v0 = vadd.f32 %v1571_v45, %v10429_v7  ;;  %v5714_v16 = vld [vmem:[#allocation7 + $0xc8] sm:$0xff]  }
 0x2ca   : > { %v1577_v50 = vrot.slane %v10430_v48, 4  ;;  %v4589_v11 = vor.u32 %v4588_v19, %v4585_v3  ;;  %v1556_v24 = vadd.f32 %v1555_v51, %v1554_v18  ;;  %v1583_v14 = vrot.slane %v10431_v28, 4 }
 0x2cb   : > { %v4591_v33 = vshrl.u32 %v4502_v47, 16  ;;  %v4594_v13 = vshll.u32 %v4502_v47, 16  ;;  %v1562_v31 = vadd.f32 %v1561_v12, %v1560_v55  ;;  %v1568_v20 = vadd.f32 %v1567_v36, %v1566_v40 }
 0x2cc   : > { %v1573_v44 = vrot.slane %v1572_v0, 2  ;;  %v1578_v41 = vadd.f32 %v1577_v50, %v10430_v48  ;;  %v1557_v5 = vrot.slane %v1556_v24, 1  ;;  %v1584_v59 = vadd.f32 %v1583_v14, %v10431_v28 }
 0x2cd   : > { %v4593_v9 = vrot.slane %v4591_v33, 3  ;;  %v4596_v15 = vrot.slane %v4594_v13, 4  ;;  %v1563_v56 = vrot.slane %v1562_v31, 1  ;;  %v1569_v34 = vrot.slane %v1568_v20, 1  ;;  %v5715_v33 = vld [vmem:[#allocation7 + $0x88] sm:$0xff]  }
 0x2ce   : > { %v1574_v26 = vadd.f32 %v1573_v44, %v1572_v0  ;;  %v1579_v63 = vrot.slane %v1578_v41, 2  ;;  %v8088_v57 = vadd.f32 %v1557_v5, %v1556_v24  ;;  %v1589_v53 = vrot.slane %v10434_v58, 4  ;;  %v5716_v44 = vld [vmem:[#allocation7 + $0xd0] sm:$0xff]  }
 0x2cf   : > { %v8086_v39 = vor.u32 %v4596_v15, %v4593_v9  ;;  %v8092_v1 = vadd.f32 %v1563_v56, %v1562_v31  ;;  %v8094_v27 = vadd.f32 %v1569_v34, %v1568_v20  ;;  %v1585_v40 = vrot.slane %v1584_v59, 2 }
 0x2d0   : > { %10433 = vst [vmem:[#allocation59_spill] sm:$0xff] %v8088_v57  ;;  %v1575_v62 = vrot.slane %v1574_v26, 1  ;;  %v1580_v18 = vadd.f32 %v1579_v63, %v1578_v41  ;;  %v1590_v45 = vadd.f32 %v1589_v53, %v10434_v58  ;;  %v9697_v47 = vrot.slane %v10426_v6, 7 }
 0x2d1   : > { %10432 = vst [vmem:[#allocation51_spill] sm:$0xff] %v8086_v39  ;;  %10435 = vst [vmem:[#allocation63_spill] sm:$0xff] %v8092_v1  ;;  %v4598_v55 = vsel %vm4581_vm7, %v4589_v11, %v8086_v39  ;;  %v9696_v51 = vrot.slane %v10427_v10, 7  ;;  %v9695_v12 = vrot.slane %v10428_v52, 7  ;;  %v1586_v36 = vadd.f32 %v1585_v40, %v1584_v59 }
 0x2d2   : > { %10436 = vst [vmem:[#allocation72_spill] sm:$0xff] %v8094_v27  ;;  %4919 = vmatmul.mubr.bf16.vlgmr.msra.gmra.mrb[52].mxu1 %v4598_v55  ;;  %v8100_v3 = vadd.f32 %v1575_v62, %v1574_v26  ;;  %v1581_v19 = vrot.slane %v1580_v18, 1  ;;  %v1591_v0 = vrot.slane %v1590_v45, 2  ;;  %v9694_v50 = vrot.slane %v10429_v7, 7  ;;  %v5717_v62 = vld [vmem:[#allocation7 + $0x90] sm:$0xff]  }
 0x2d3   : > { %5306 = vmatpush3.bf16.msra.mxu1 %v5713_v43  ;;  %v9693_v11 = vrot.slane %v10430_v48, 7  ;;  %v9692_v24 = vrot.slane %v10431_v28, 7  ;;  %v9691_v31 = vrot.slane %v10434_v58, 7  ;;  %v8113_v20 = vadd.f32 %v9697_v47, %v10426_v6  ;;  %v10448_v47 = vld [vmem:[#allocation120_spill] sm:$0xff] }
 0x2d4   : > { %10437 = vst [vmem:[#allocation78_spill] sm:$0xff] %v8100_v3  ;;  %v8106_v13 = vadd.f32 %v1581_v19, %v1580_v18  ;;  %5307 = vmatprep.subr.bf16.mxu1 %v5714_v16  ;;  %v1587_v41 = vrot.slane %v1586_v36, 1  ;;  %v1592_v9 = vadd.f32 %v1591_v0, %v1590_v45  ;;  %v8118_v15 = vadd.f32 %v9696_v51, %v10427_v10 }
 0x2d5   : > { %10439 = vst [vmem:[#allocation90_spill] sm:$0xff] %v8113_v20  ;;  %v8123_v5 = vadd.f32 %v9695_v12, %v10428_v52  ;;  %v8128_v14 = vadd.f32 %v9694_v50, %v10429_v7  ;;  %v8133_v56 = vadd.f32 %v9693_v11, %v10430_v48  ;;  %v8138_v34 = vadd.f32 %v9692_v24, %v10431_v28 }
 0x2d6   : > { %10438 = vst [vmem:[#allocation83_spill] sm:$0xff] %v8106_v13  ;;  %10440 = vst [vmem:[#allocation96_spill] sm:$0xff] %v8118_v15  ;;  %v8143_v26 = vadd.f32 %v9691_v31, %v10434_v58  ;;  %v8145_v63 = vadd.f32 %v1587_v41, %v1586_v36  ;;  %v1593_v43 = vrot.slane %v1592_v9, 1  ;;  %v1972_v59 = vrot.slane %v10426_v6, 6 }
 0x2d7   : > { %10441 = vst [vmem:[#allocation100_spill] sm:$0xff] %v8123_v5  ;;  %10442 = vst [vmem:[#allocation108_spill] sm:$0xff] %v8128_v14  ;;  %v1973_v53 = vrot.slane %v10427_v10, 6  ;;  %5308 = vmatpush3.bf16.msra.mxu1 %v5715_v33  ;;  %v1974_v18 = vrot.slane %v10428_v52, 6  ;;  %v1975_v16 = vrot.slane %v10429_v7, 6  ;;  %v1976_v55 = vrot.slane %v10430_v48, 6 }
 0x2d8   : > { %10443 = vst [vmem:[#allocation112_spill] sm:$0xff] %v8133_v56  ;;  %10444 = vst [vmem:[#allocation121_spill] sm:$0xff] %v8138_v34  ;;  %v1977_v40 = vrot.slane %v10431_v28, 6  ;;  %5309 = vmatprep.subr.bf16.mxu1 %v5716_v44  ;;  %v8153_v45 = vadd.f32 %v1593_v43, %v1592_v9  ;;  %v1978_v19 = vrot.slane %v10434_v58, 6  ;;  %v8157_v36 = vadd.f32 %v1972_v59, %v8113_v20 }
 0x2d9   : > { %10445 = vst [vmem:[#allocation127_spill] sm:$0xff] %v8143_v26  ;;  %10446 = vst [vmem:[#allocation129_spill] sm:$0xff] %v8145_v63  ;;  %v8160_v0 = vadd.f32 %v1973_v53, %v8118_v15  ;;  %v8163_v33 = vadd.f32 %v1974_v18, %v8123_v5  ;;  %v8166_v41 = vadd.f32 %v1975_v16, %v8128_v14  ;;  %v2807_v38 = vrot.slane %v10449_v25, 4 }
 0x2da   : > { %10447 = vst [vmem:[#allocation132_spill] sm:$0xff] %v8153_v45  ;;  %v8169_v31 = vadd.f32 %v1976_v55, %v8133_v56  ;;  %v8172_v44 = vadd.f32 %v1977_v40, %v8138_v34  ;;  %v8175_v9 = vadd.f32 %v1978_v19, %v8143_v26  ;;  %v2196_v43 = vsub.f32 %v8088_v57, %v10426_v6 }
 0x2db   : > { %v2197_v59 = vsub.f32 %v8092_v1, %v10427_v10  ;;  %v2198_v53 = vsub.f32 %v8094_v27, %v10428_v52  ;;  %5310 = vmatpush3.bf16.msra.mxu1 %v5717_v62  ;;  %v2199_v18 = vsub.f32 %v8100_v3, %v10429_v7  ;;  %v2200_v16 = vsub.f32 %v8106_v13, %v10430_v48 }
 0x2dc   : > { %v2201_v55 = vsub.f32 %v8145_v63, %v10431_v28  ;;  %v2202_v40 = vsub.f32 %v8153_v45, %v10434_v58  ;;  %v2260_v19 = vrot.slane %v8157_v36, 7  ;;  %v2261_v24 = vrot.slane %v8160_v0, 7 }
 0x2dd   : > { %v2262_v11 = vrot.slane %v8163_v33, 7  ;;  %v2263_v62 = vrot.slane %v8166_v41, 7  ;;  %v2264_v50 = vrot.slane %v8169_v31, 7  ;;  %v2265_v12 = vrot.slane %v8172_v44, 7 }
 0x2de   : > { %v2266_v51 = vrot.slane %v8175_v9, 7  ;;  %v2801_v26 = vrot.slane %v10448_v47, 4  ;;  %v8199_v34 = vsub.f32 %v2196_v43, %v2260_v19  ;;  %v8201_v56 = vsub.f32 %v2197_v59, %v2261_v24  ;;  %v10451_v43 = vld [vmem:[#allocation138_spill] sm:$0xff]  ;;  %v10452_v24 = vld [vmem:[#allocation140_spill] sm:$0xff] }
 0x2df   : > { %v8203_v14 = vsub.f32 %v2198_v53, %v2262_v11  ;;  %v8205_v5 = vsub.f32 %v2199_v18, %v2263_v62  ;;  %v8207_v15 = vsub.f32 %v2200_v16, %v2264_v50  ;;  %v8209_v20 = vsub.f32 %v2201_v55, %v2265_v12  ;;  %v10453_v53 = vld [vmem:[#allocation147_spill] sm:$0xff]  ;;  %v10454_v62 = vld [vmem:[#allocation149_spill] sm:$0xff] }
 0x2e0   : > { %v8211_v37 = vsub.f32 %v2202_v40, %v2266_v51  ;;  %v2802_v23 = vadd.f32 %v2801_v26, %v10448_v47  ;;  %v2813_v22 = vrot.slane %v10450_v8, 4  ;;  %v2819_v19 = vrot.slane %v10451_v43, 4 }
 0x2e1   : > { %v2825_v59 = vrot.slane %v10452_v24, 4  ;;  %v2831_v18 = vrot.slane %v10453_v53, 4  ;;  %v2837_v50 = vrot.slane %v10454_v62, 4  ;;  %v2932_v12 = vrot.slane %v10448_v47, 1 }
 0x2e2   : > { %v2803_v11 = vrot.slane %v2802_v23, 2  ;;  %v2808_v51 = vadd.f32 %v2807_v38, %v10449_v25  ;;  %v2814_v16 = vadd.f32 %v2813_v22, %v10450_v8  ;;  %v2820_v26 = vadd.f32 %v2819_v19, %v10451_v43 }
 0x2e3   : > { %v2826_v55 = vadd.f32 %v2825_v59, %v10452_v24  ;;  %v2832_v32 = vadd.f32 %v2831_v18, %v10453_v53  ;;  %v2838_v60 = vadd.f32 %v2837_v50, %v10454_v62  ;;  %v2933_v35 = vrot.slane %v10449_v25, 1 }
 0x2e4   : > { %v2804_v40 = vadd.f32 %v2803_v11, %v2802_v23  ;;  %v2809_v61 = vrot.slane %v2808_v51, 2  ;;  %v2815_v49 = vrot.slane %v2814_v16, 2  ;;  %v2821_v4 = vrot.slane %v2820_v26, 2 }
 0x2e5   : > { %v2827_v54 = vrot.slane %v2826_v55, 2  ;;  %v2833_v17 = vrot.slane %v2832_v32, 2  ;;  %v2839_v38 = vrot.slane %v2838_v60, 2  ;;  %v2934_v22 = vrot.slane %v10450_v8, 1 }
 0x2e6   : > { %v2805_v42 = vrot.slane %v2804_v40, 1  ;;  %v2810_v30 = vadd.f32 %v2809_v61, %v2808_v51  ;;  %v2816_v19 = vadd.f32 %v2815_v49, %v2814_v16  ;;  %v2822_v29 = vadd.f32 %v2821_v4, %v2820_v26  ;;  %v5718_v51 = vld [vmem:[#allocation7 + $0xd8] sm:$0xff]   ;;  %v5720_v26 = vld [vmem:[#allocation7 + $0xe0] sm:$0xff]  }
 0x2e7   : > { %v2828_v59 = vadd.f32 %v2827_v54, %v2826_v55  ;;  %v2834_v11 = vadd.f32 %v2833_v17, %v2832_v32  ;;  %v2840_v18 = vadd.f32 %v2839_v38, %v2838_v60  ;;  %v2935_v50 = vrot.slane %v10451_v43, 1  ;;  %v5719_v16 = vld [vmem:[#allocation7 + $0x98] sm:$0xff]   ;;  %5311 = vmatprep.subr.bf16.mxu1 %v5718_v51 }
 0x2e8   : > { %v8229_v23 = vadd.f32 %v2805_v42, %v2804_v40  ;;  %v2811_v46 = vrot.slane %v2810_v30, 1  ;;  %v2817_v21 = vrot.slane %v2816_v19, 1  ;;  %v2823_v2 = vrot.slane %v2822_v29, 1  ;;  %5312 = vmatpush3.bf16.msra.mxu1 %v5719_v16  ;;  %v5721_v40 = vld [vmem:[#allocation7 + $0xa0] sm:$0xff]  }
 0x2e9   : > { %v2829_v39 = vrot.slane %v2828_v59, 1  ;;  %v2835_v45 = vrot.slane %v2834_v11, 1  ;;  %v2841_v63 = vrot.slane %v2840_v18, 1  ;;  %v2936_v13 = vrot.slane %v10452_v24, 1  ;;  %5313 = vmatprep.subr.bf16.mxu1 %v5720_v26 }
 0x2ea   : > { %10455 = vst [vmem:[#allocation136_spill] sm:$0xff] %v8229_v23  ;;  %v2937_v3 = vrot.slane %v10453_v53, 1  ;;  %v8234_v61 = vadd.f32 %v2811_v46, %v2810_v30  ;;  %v8236_v4 = vadd.f32 %v2817_v21, %v2816_v19  ;;  %v8238_v42 = vadd.f32 %v2823_v2, %v2822_v29 }
 0x2eb   : > { %v8240_v17 = vadd.f32 %v2829_v39, %v2828_v59  ;;  %v8242_v54 = vadd.f32 %v2835_v45, %v2834_v11  ;;  %v8244_v49 = vadd.f32 %v2841_v63, %v2840_v18  ;;  %v2938_v60 = vrot.slane %v10454_v62, 1  ;;  %v5722_v59 = vld [vmem:[#allocation7 + $0xe8] sm:$0xff]  }
 0x2ec   : > { %10456 = vst [vmem:[#allocation255_spill] sm:$0xff] %v8234_v61  ;;  %10457 = vst [vmem:[#allocation206_spill] sm:$0xff] %v8236_v4  ;;  %v8248_v32 = vadd.f32 %v2932_v12, %v10448_v47  ;;  %v8251_v30 = vadd.f32 %v2933_v35, %v10449_v25  ;;  %v8254_v2 = vadd.f32 %v2934_v22, %v10450_v8  ;;  %v9723_v63 = vrot.slane %v10448_v47, 7 }
 0x2ed   : > { %10458 = vst [vmem:[#allocation204_spill] sm:$0xff] %v8238_v42  ;;  %10459 = vst [vmem:[#allocation18_spill] sm:$0xff] %v8240_v17  ;;  %v8257_v29 = vadd.f32 %v2935_v50, %v10451_v43  ;;  %v8260_v21 = vadd.f32 %v2936_v13, %v10452_v24  ;;  %v8263_v46 = vadd.f32 %v2937_v3, %v10453_v53  ;;  %v9722_v35 = vrot.slane %v10449_v25, 7 }
 0x2ee   : > { %10460 = vst [vmem:[#allocation21_spill] sm:$0xff] %v8242_v54  ;;  %10461 = vst [vmem:[#allocation28_spill] sm:$0xff] %v8244_v49  ;;  %v8266_v39 = vadd.f32 %v2938_v60, %v10454_v62  ;;  %v9720_v45 = vrot.slane %v10450_v8, 7  ;;  %v9718_v12 = vrot.slane %v10451_v43, 7  ;;  %v9717_v55 = vrot.slane %v10452_v24, 7  ;;  %5314 = vmatpush3.bf16.msra.mxu1 %v5721_v40 }
 0x2ef   : > { %10462 = vst [vmem:[#allocation39_spill] sm:$0xff] %v8248_v32  ;;  %10463 = vst [vmem:[#allocation44_spill] sm:$0xff] %v8251_v30  ;;  %v9719_v13 = vrot.slane %v10453_v53, 7  ;;  %v9721_v3 = vrot.slane %v10454_v62, 7  ;;  %v8278_v38 = vadd.f32 %v9723_v63, %v10448_v47  ;;  %v8283_v22 = vadd.f32 %v9722_v35, %v10449_v25  ;;  %v5723_v35 = vld [vmem:[#allocation7 + $0xa8] sm:$0xff]   ;;  %5315 = vmatprep.subr.bf16.mxu1 %v5722_v59  ;;  %v5725_v59 = vld [vmem:[#allocation7 + $0xb0] sm:$0xff]  }
 0x2f0   : > { %10464 = vst [vmem:[#allocation53_spill] sm:$0xff] %v8254_v2  ;;  %10465 = vst [vmem:[#allocation56_spill] sm:$0xff] %v8257_v29  ;;  %v3572_v19 = vsub.f32 %v8229_v23, %v8248_v32  ;;  %v8290_v11 = vadd.f32 %v9720_v45, %v10450_v8  ;;  %v8295_v18 = vadd.f32 %v9718_v12, %v10451_v43 }
 0x2f1   : > { %10466 = vst [vmem:[#allocation65_spill] sm:$0xff] %v8260_v21  ;;  %10467 = vst [vmem:[#allocation69_spill] sm:$0xff] %v8263_v46  ;;  %v8300_v50 = vadd.f32 %v9717_v55, %v10452_v24  ;;  %v8305_v60 = vadd.f32 %v9719_v13, %v10453_v53  ;;  %v8310_v51 = vadd.f32 %v9721_v3, %v10454_v62  ;;  %v3636_v3 = vrot.slane %v8278_v38, 7 }
 0x2f2   : > { %10468 = vst [vmem:[#allocation77_spill] sm:$0xff] %v8266_v39  ;;  %10469 = vst [vmem:[#allocation89_spill] sm:$0xff] %v8295_v18  ;;  %v3573_v16 = vsub.f32 %v8234_v61, %v8251_v30  ;;  %v3574_v26 = vsub.f32 %v8236_v4, %v8254_v2  ;;  %v3575_v55 = vsub.f32 %v8238_v42, %v8257_v29  ;;  %v3637_v63 = vrot.slane %v8283_v22, 7 }
 0x2f3   : > { %10470 = vst [vmem:[#allocation93_spill] sm:$0xff] %v8300_v50  ;;  %10471 = vst [vmem:[#allocation102_spill] sm:$0xff] %v8305_v60  ;;  %v3576_v12 = vsub.f32 %v8240_v17, %v8260_v21  ;;  %v3577_v13 = vsub.f32 %v8242_v54, %v8263_v46  ;;  %v3578_v45 = vsub.f32 %v8244_v49, %v8266_v39  ;;  %v3638_v2 = vrot.slane %v8290_v11, 7  ;;  %v5724_v21 = vld [vmem:[#allocation7 + $0xf0] sm:$0xff]  }
 0x2f4   : > { %v3639_v30 = vrot.slane %v8295_v18, 7  ;;  %v3640_v29 = vrot.slane %v8300_v50, 7  ;;  %v3641_v32 = vrot.slane %v8305_v60, 7  ;;  %v3642_v46 = vrot.slane %v8310_v51, 7  ;;  %5316 = vmatpush3.bf16.msra.mxu1 %v5723_v35 }
 0x2f5   : > { %v3700_v54 = vsub.f32 %v3572_v19, %v3636_v3  ;;  %v2068_v39 = vrot.slane %v10426_v6, 5  ;;  %v3701_v49 = vsub.f32 %v3573_v16, %v3637_v63  ;;  %v3702_v40 = vsub.f32 %v3574_v26, %v3638_v2  ;;  %5317 = vmatprep.subr.bf16.mxu1 %v5724_v21  ;;  %v5726_v2 = vld [vmem:[#allocation7 + $0xf8] sm:$0xff]  }
 0x2f6   : > { %v3703_v17 = vsub.f32 %v3575_v55, %v3639_v30  ;;  %v3704_v42 = vsub.f32 %v3576_v12, %v3640_v29  ;;  %v3705_v4 = vsub.f32 %v3577_v13, %v3641_v32  ;;  %v3706_v61 = vsub.f32 %v3578_v45, %v3642_v46  ;;  %v10472_v12 = vld [vmem:[#allocation78_spill] sm:$0xff] }
 0x2f7   : > { %v4052_v23 = vadd.f32 %v3700_v54, %v8199_v34  ;;  %v2069_v18 = vrot.slane %v10427_v10, 5  ;;  %v4053_v50 = vadd.f32 %v3701_v49, %v8201_v56  ;;  %v4054_v60 = vadd.f32 %v3702_v40, %v8203_v14  ;;  %v10529_v10 = vld [vmem:[#allocation166_spill] sm:$0xff] }
 0x2f8   : > { %v4055_v3 = vadd.f32 %v3703_v17, %v8205_v5  ;;  %v4056_v19 = vadd.f32 %v3704_v42, %v8207_v15  ;;  %v4057_v30 = vadd.f32 %v3705_v4, %v8209_v20  ;;  %v4058_v32 = vadd.f32 %v3706_v61, %v8211_v37  ;;  %5318 = vmatpush3.bf16.msra.mxu1 %v5725_v59  ;;  %v5727_v42 = vld [vmem:[#allocation7 + $0xb8] sm:$0xff]  }
 0x2f9   : > { %v2070_v34 = vrot.slane %v10428_v52, 5  ;;  %v2071_v54 = vrot.slane %v10429_v7, 5  ;;  %v4297_v29 = vrot.slane %v4053_v50, 7  ;;  %v4299_v46 = vrot.slane %v4054_v60, 6  ;;  %5319 = vmatprep.subr.bf16.mxu1 %v5726_v2  ;;  %v10475_v60 = vld [vmem:[#allocation132_spill] sm:$0xff]  ;;  %v10528_v52 = vld [vmem:[#allocation190_spill] sm:$0xff] }
 0x2fa   : > { %v4301_v63 = vrot.slane %v4055_v3, 5  ;;  %v4303_v56 = vrot.slane %v4056_v19, 4  ;;  %v4305_v49 = vrot.slane %v4057_v30, 3  ;;  %v4307_v14 = vrot.slane %v4058_v32, 2 }
 0x2fb   : > { %v2072_v5 = vrot.slane %v10430_v48, 5  ;;  %v2073_v15 = vrot.slane %v10431_v28, 5  ;;  %v4298_v20 = vsel %vm4157_vm0, %v4297_v29, %v4052_v23  ;;  %v2074_v37 = vrot.slane %v10434_v58, 5 }
 0x2fc   : > { %v8347_v61 = vadd.f32 %v2068_v39, %v8157_v36  ;;  %v8350_v4 = vadd.f32 %v2069_v18, %v8160_v0  ;;  %v4300_v17 = vsel %vm4160_vm1, %v4299_v46, %v4298_v20  ;;  %v8354_v21 = vadd.f32 %v2070_v34, %v8163_v33  ;;  %5320 = vmatpush3.bf16.msra.mxu1 %v5727_v42  ;;  %v10474_v18 = vld [vmem:[#allocation129_spill] sm:$0xff]  ;;  %v10478_v42 = vld [vmem:[#allocation102_spill] sm:$0xff] }
 0x2fd   : > { %v8357_v35 = vadd.f32 %v2071_v54, %v8166_v41  ;;  %v8360_v45 = vadd.f32 %v2072_v5, %v8169_v31  ;;  %v4302_v23 = vsel %vm4163_vm2, %v4301_v63, %v4300_v17  ;;  %v8364_v36 = vadd.f32 %v2073_v15, %v8172_v44  ;;  %v10477_v5 = vld [vmem:[#allocation93_spill] sm:$0xff]  ;;  %v10480_v17 = vld [vmem:[#allocation255_spill] sm:$0xff] }
 0x2fe   : > { %v8367_v0 = vadd.f32 %v2074_v37, %v8175_v9  ;;  %v2164_v39 = vsub.f32 %v8088_v57, %v8347_v61  ;;  %v4304_v33 = vsel %vm4166_vm3, %v4303_v56, %v4302_v23  ;;  %v2165_v41 = vsub.f32 %v8092_v1, %v8350_v4  ;;  %v10473_v9 = vld [vmem:[#allocation83_spill] sm:$0xff]  ;;  %v10479_v61 = vld [vmem:[#allocation136_spill] sm:$0xff] }
 0x2ff   : > { %v2166_v31 = vsub.f32 %v8094_v27, %v8354_v21  ;;  %v2167_v55 = vsub.f32 %v10472_v12, %v8357_v35  ;;  %v4306_v44 = vsel %vm4169_vm4, %v4305_v49, %v4304_v33  ;;  %v2168_v13 = vsub.f32 %v10473_v9, %v8360_v45  ;;  %v10476_v49 = vld [vmem:[#allocation89_spill] sm:$0xff]  ;;  %v10482_v45 = vld [vmem:[#allocation204_spill] sm:$0xff]  ;;  %v10527_v9 = vld [vmem:[#allocation51_spill] sm:$0xff] }
 0x300   : > { %v2169_v50 = vsub.f32 %v10474_v18, %v8364_v36  ;;  %v2170_v16 = vsub.f32 %v10475_v60, %v8367_v0  ;;  %v4308_v26 = vsel %vm4172_vm5, %v4307_v14, %v4306_v44  ;;  %v3220_v40 = vrot.slane %v10448_v47, 6  ;;  %v10483_v36 = vld [vmem:[#allocation18_spill] sm:$0xff]  ;;  %v10484_v33 = vld [vmem:[#allocation21_spill] sm:$0xff]  ;;  %v10485_v44 = vld [vmem:[#allocation28_spill] sm:$0xff] }
 0x301   : > { %v3221_v59 = vrot.slane %v10449_v25, 6  ;;  %v3222_v3 = vrot.slane %v10450_v8, 6  ;;  %v4507_v19 = vpack.c.bf16 %v4308_v26, %v4308_v26  ;;  %v3223_v2 = vrot.slane %v10451_v43, 6 }
 0x302   : > { %v3224_v30 = vrot.slane %v10452_v24, 6  ;;  %v3225_v32 = vrot.slane %v10453_v53, 6  ;;  %v3226_v34 = vrot.slane %v10454_v62, 6  ;;  %v3284_v54 = vadd.f32 %v3220_v40, %v8278_v38 }
 0x303   : > { %v3285_v29 = vadd.f32 %v3221_v59, %v8283_v22  ;;  %v3286_v46 = vadd.f32 %v3222_v3, %v8290_v11  ;;  %v4660_v63 = vshrl.u32 %v4507_v19, 16  ;;  %v4663_v56 = vshll.u32 %v4507_v19, 16  ;;  %v10481_v11 = vld [vmem:[#allocation206_spill] sm:$0xff] }
 0x304   : > { %v3287_v14 = vadd.f32 %v3223_v2, %v10476_v49  ;;  %v3288_v15 = vadd.f32 %v3224_v30, %v10477_v5  ;;  %v3289_v20 = vadd.f32 %v3225_v32, %v10478_v42  ;;  %v3290_v37 = vadd.f32 %v3226_v34, %v8310_v51 }
 0x305   : > { %v3412_v4 = vsub.f32 %v10479_v61, %v10448_v47  ;;  %v3413_v38 = vsub.f32 %v10480_v17, %v10449_v25  ;;  %v4662_v21 = vrot.slane %v4660_v63, 3  ;;  %v4665_v22 = vrot.slane %v4663_v56, 4  ;;  %v10486_v56 = vld [vmem:[#allocation160_spill] sm:$0xff]  ;;  %v10504_v61 = vld [vmem:[#allocation103_spill] sm:$0xff] }
 0x306   : > { %v3414_v35 = vsub.f32 %v10481_v11, %v10450_v8  ;;  %v3415_v23 = vsub.f32 %v10482_v45, %v10451_v43  ;;  %v3416_v0 = vsub.f32 %v10483_v36, %v10452_v24  ;;  %v3417_v51 = vsub.f32 %v10484_v33, %v10453_v53  ;;  %v10506_v24 = vld [vmem:[#allocation116_spill] sm:$0xff] }
 0x307   : > { %v3418_v26 = vsub.f32 %v10485_v44, %v10454_v62  ;;  %v3476_v40 = vrot.slane %v3284_v54, 7  ;;  %v4666_v59 = vor.u32 %v4665_v22, %v4662_v21  ;;  %v3477_v3 = vrot.slane %v3285_v29, 7 }
 0x308   : > { %v3478_v19 = vrot.slane %v3286_v46, 7  ;;  %v3479_v2 = vrot.slane %v3287_v14, 7  ;;  %v3480_v30 = vrot.slane %v3288_v15, 7  ;;  %v3481_v32 = vrot.slane %v3289_v20, 7  ;;  %v10487_v46 = vld [vmem:[#allocation153_spill] sm:$0xff] }
 0x309   : > { %v3482_v34 = vrot.slane %v3290_v37, 7  ;;  %v3540_v63 = vsub.f32 %v3412_v4, %v3476_v40  ;;  %v4667_v49 = vsel %vm4581_vm7, %v10486_v56, %v4666_v59  ;;  %v3541_v5 = vsub.f32 %v3413_v38, %v3477_v3  ;;  %v10488_v38 = vld [vmem:[#allocation12_spill] sm:$0xff] }
 0x30a   : > { %v3542_v42 = vsub.f32 %v3414_v35, %v3478_v19  ;;  %v3543_v36 = vsub.f32 %v3415_v23, %v3479_v2  ;;  %4926 = vmatprep.mubr.bf16.mxu1 %v4667_v49  ;;  %v3544_v33 = vsub.f32 %v3416_v0, %v3480_v30  ;;  %v3545_v45 = vsub.f32 %v3417_v51, %v3481_v32  ;;  %v10489_v30 = vld [vmem:[#allocation14_spill] sm:$0xff]  ;;  %v10495_v49 = vld [vmem:[#allocation45_spill] sm:$0xff] }
 0x30b   : > { %v3546_v11 = vsub.f32 %v3418_v26, %v3482_v34  ;;  %v3956_v44 = vrot.slane %v3540_v63, 1  ;;  %v3957_v54 = vrot.slane %v3541_v5, 1  ;;  %v1659_v14 = vrot.slane %v10487_v46, 1  ;;  %v10494_v63 = vld [vmem:[#allocation41_spill] sm:$0xff] }
 0x30c   : > { %v3958_v21 = vrot.slane %v3542_v42, 1  ;;  %v3959_v29 = vrot.slane %v3543_v36, 1  ;;  %v3960_v15 = vrot.slane %v3544_v33, 1  ;;  %v3961_v20 = vrot.slane %v3545_v45, 1  ;;  %v10490_v45 = vld [vmem:[#allocation19_spill] sm:$0xff]  ;;  %v10496_v42 = vld [vmem:[#allocation54_spill] sm:$0xff] }
 0x30d   : > { %v3962_v37 = vrot.slane %v3546_v11, 1  ;;  %v4020_v4 = vadd.f32 %v3956_v44, %v2164_v39  ;;  %v4021_v22 = vadd.f32 %v3957_v54, %v2165_v41  ;;  %v1665_v35 = vrot.slane %v10488_v38, 1  ;;  %v10491_v41 = vld [vmem:[#allocation22_spill] sm:$0xff] }
 0x30e   : > { %v4022_v40 = vadd.f32 %v3958_v21, %v2166_v31  ;;  %v4023_v59 = vadd.f32 %v3959_v29, %v2167_v55  ;;  %v4024_v23 = vadd.f32 %v3960_v15, %v2168_v13  ;;  %v4025_v3 = vadd.f32 %v3961_v20, %v2169_v50  ;;  %v10492_v55 = vld [vmem:[#allocation29_spill] sm:$0xff]  ;;  %v10493_v13 = vld [vmem:[#allocation31_spill] sm:$0xff] }
 0x30f   : > { %v4026_v0 = vadd.f32 %v3962_v37, %v2170_v16  ;;  %v4204_v51 = vrot.slane %v4020_v4, 7  ;;  %v4205_v26 = vrot.slane %v4021_v22, 6  ;;  %v1666_v36 = vrot.slane %v10489_v30, 1  ;;  %v10497_v29 = vld [vmem:[#allocation57_spill] sm:$0xff]  ;;  %v10498_v20 = vld [vmem:[#allocation67_spill] sm:$0xff]  ;;  %v10499_v4 = vld [vmem:[#allocation70_spill] sm:$0xff] }
 0x310   : > { %v4207_v19 = vrot.slane %v4022_v40, 5  ;;  %v4209_v2 = vrot.slane %v4023_v59, 4  ;;  %v4211_v32 = vrot.slane %v4024_v23, 3  ;;  %v4213_v34 = vrot.slane %v4025_v3, 2  ;;  %v10500_v59 = vld [vmem:[#allocation79_spill] sm:$0xff]  ;;  %v10501_v3 = vld [vmem:[#allocation81_spill] sm:$0xff] }
 0x311   : > { %v4215_v33 = vrot.slane %v4026_v0, 1  ;;  %v1667_v11 = vrot.slane %v10490_v45, 1  ;;  %v4206_v39 = vsel %vm4157_vm0, %v4205_v26, %v4204_v51  ;;  %v1668_v31 = vrot.slane %v10491_v41, 1  ;;  %v10502_v51 = vld [vmem:[#allocation91_spill] sm:$0xff] }
 0x312   : > { %v1669_v44 = vrot.slane %v10492_v55, 1  ;;  %v1670_v50 = vrot.slane %v10493_v13, 1  ;;  %v4208_v16 = vsel %vm4160_vm1, %v4207_v19, %v4206_v39  ;;  %v1671_v56 = vrot.slane %v10494_v63, 1  ;;  %v10503_v39 = vld [vmem:[#allocation94_spill] sm:$0xff] }
 0x313   : > { %v1672_v5 = vrot.slane %v10495_v49, 1  ;;  %v1673_v54 = vrot.slane %v10496_v42, 1  ;;  %v4210_v21 = vsel %vm4163_vm2, %v4209_v2, %v4208_v16  ;;  %v1674_v15 = vrot.slane %v10497_v29, 1  ;;  %v10505_v16 = vld [vmem:[#allocation106_spill] sm:$0xff] }
 0x314   : > { %v1675_v37 = vrot.slane %v10498_v20, 1  ;;  %v1676_v22 = vrot.slane %v10499_v4, 1  ;;  %v4212_v40 = vsel %vm4166_vm3, %v4211_v32, %v4210_v21  ;;  %v1677_v23 = vrot.slane %v10500_v59, 1 }
 0x315   : > { %v1678_v0 = vrot.slane %v10501_v3, 1  ;;  %v1679_v26 = vrot.slane %v10502_v51, 1  ;;  %v4214_v19 = vsel %vm4169_vm4, %v4213_v34, %v4212_v40  ;;  %v1680_v17 = vrot.slane %v10503_v39, 1 }
 0x316   : > { %v1681_v2 = vrot.slane %v10504_v61, 1  ;;  %v1682_v62 = vrot.slane %v10505_v16, 1  ;;  %v4216_v53 = vsel %vm4172_vm5, %v4215_v33, %v4214_v19  ;;  %v1683_v43 = vrot.slane %v10506_v24, 1 }
 0x317   : > { %v8443_v32 = vadd.f32 %v1659_v14, %v10487_v46  ;;  %v8446_v21 = vadd.f32 %v1665_v35, %v10488_v38  ;;  %v4506_v8 = vpack.c.bf16 %v4216_v53, %v4216_v53  ;;  %v8449_v25 = vadd.f32 %v1666_v36, %v10489_v30 }
 0x318   : > { %v8452_v34 = vadd.f32 %v1667_v11, %v10490_v45  ;;  %v8455_v40 = vadd.f32 %v1668_v31, %v10491_v41  ;;  %v8458_v33 = vadd.f32 %v1669_v44, %v10492_v55  ;;  %v8461_v19 = vadd.f32 %v1670_v50, %v10493_v13 }
 0x319   : > { %10507 = vst [vmem:[#allocation105_spill] sm:$0xff] %v8443_v32  ;;  %10508 = vst [vmem:[#allocation114_spill] sm:$0xff] %v8446_v21  ;;  %v8464_v14 = vadd.f32 %v1671_v56, %v10494_v63  ;;  %v8467_v53 = vadd.f32 %v1672_v5, %v10495_v49  ;;  %v4651_v35 = vshrl.u32 %v4506_v8, 16  ;;  %v4654_v36 = vshll.u32 %v4506_v8, 16 }
 0x31a   : > { %10509 = vst [vmem:[#allocation118_spill] sm:$0xff] %v8449_v25  ;;  %10510 = vst [vmem:[#allocation125_spill] sm:$0xff] %v8452_v34  ;;  %v8470_v11 = vadd.f32 %v1673_v54, %v10496_v42  ;;  %v8473_v31 = vadd.f32 %v1674_v15, %v10497_v29  ;;  %v8476_v44 = vadd.f32 %v1675_v37, %v10498_v20  ;;  %v1862_v18 = vrot.slane %v10493_v13, 2 }
 0x31b   : > { %10511 = vst [vmem:[#allocation195_spill] sm:$0xff] %v8455_v40  ;;  %10512 = vst [vmem:[#allocation243_spill] sm:$0xff] %v8458_v33  ;;  %v8479_v50 = vadd.f32 %v1676_v22, %v10499_v4  ;;  %v8482_v56 = vadd.f32 %v1677_v23, %v10500_v59  ;;  %v8485_v5 = vadd.f32 %v1678_v0, %v10501_v3  ;;  %v4653_v47 = vrot.slane %v4651_v35, 3 }
 0x31c   : > { %10513 = vst [vmem:[#allocation244_spill] sm:$0xff] %v8461_v19  ;;  %10514 = vst [vmem:[#allocation245_spill] sm:$0xff] %v8464_v14  ;;  %v4656_v8 = vrot.slane %v4654_v36, 4  ;;  %v8488_v54 = vadd.f32 %v1679_v26, %v10502_v51  ;;  %v8491_v15 = vadd.f32 %v1680_v17, %v10503_v39  ;;  %v8494_v37 = vadd.f32 %v1681_v2, %v10504_v61 }
 0x31d   : > { %10515 = vst [vmem:[#allocation246_spill] sm:$0xff] %v8467_v53  ;;  %10516 = vst [vmem:[#allocation248_spill] sm:$0xff] %v8470_v11  ;;  %v8497_v22 = vadd.f32 %v1682_v62, %v10505_v16  ;;  %v8500_v23 = vadd.f32 %v1683_v43, %v10506_v24  ;;  %v1851_v0 = vrot.slane %v10487_v46, 2  ;;  %v1857_v35 = vrot.slane %v10488_v38, 2 }
 0x31e   : > { %10517 = vst [vmem:[#allocation249_spill] sm:$0xff] %v8473_v31  ;;  %10518 = vst [vmem:[#allocation250_spill] sm:$0xff] %v8476_v44  ;;  %v4657_v60 = vor.u32 %v4656_v8, %v4653_v47  ;;  %v1858_v26 = vrot.slane %v10489_v30, 2  ;;  %v1859_v36 = vrot.slane %v10490_v45, 2  ;;  %v1860_v17 = vrot.slane %v10491_v41, 2 }
 0x31f   : > { %10519 = vst [vmem:[#allocation251_spill] sm:$0xff] %v8479_v50  ;;  %10520 = vst [vmem:[#allocation252_spill] sm:$0xff] %v8482_v56  ;;  %v1861_v2 = vrot.slane %v10492_v55, 2  ;;  %v1863_v62 = vrot.slane %v10494_v63, 2  ;;  %v1864_v12 = vrot.slane %v10495_v49, 2  ;;  %v1865_v47 = vrot.slane %v10496_v42, 2 }
 0x320   : > { %10521 = vst [vmem:[#allocation253_spill] sm:$0xff] %v8485_v5  ;;  %10522 = vst [vmem:[#allocation254_spill] sm:$0xff] %v8488_v54  ;;  %v4658_v43 = vsel %vm4581_vm7, %v10527_v9, %v4657_v60  ;;  %v1866_v8 = vrot.slane %v10497_v29, 2  ;;  %v1867_v27 = vrot.slane %v10498_v20, 2  ;;  %v1868_v1 = vrot.slane %v10499_v4, 2  ;;  %v10531_v20 = vld [vmem:[#allocation198_spill] sm:$0xff] }
 0x321   : > { %10523 = vst [vmem:[#allocation256_spill] sm:$0xff] %v8491_v15  ;;  %10524 = vst [vmem:[#allocation257_spill] sm:$0xff] %v8494_v37  ;;  %4927 = vmatmul.mubr.bf16.gmra.mrb[56].mxu1 %v4658_v43  ;;  %v1869_v57 = vrot.slane %v10500_v59, 2  ;;  %v1870_v58 = vrot.slane %v10501_v3, 2  ;;  %v1871_v28 = vrot.slane %v10502_v51, 2  ;;  %v1872_v48 = vrot.slane %v10503_v39, 2 }
 0x322   : > { %10525 = vst [vmem:[#allocation258_spill] sm:$0xff] %v8497_v22  ;;  %10526 = vst [vmem:[#allocation259_spill] sm:$0xff] %v8500_v23  ;;  %v1873_v9 = vrot.slane %v10504_v61, 2  ;;  %v1874_v60 = vrot.slane %v10505_v16, 2  ;;  %v1875_v7 = vrot.slane %v10506_v24, 2  ;;  %v1915_v43 = vadd.f32 %v1851_v0, %v8443_v32  ;;  %v10532_v59 = vld [vmem:[#allocation172_spill] sm:$0xff] }
 0x323   : > { %v10530_v6 = vrot.slane %v10529_v10, 2  ;;  %v10533_v29 = vrot.slane %v10532_v59, 2  ;;  %v1921_v51 = vadd.f32 %v1857_v35, %v8446_v21  ;;  %v1922_v39 = vadd.f32 %v1858_v26, %v8449_v25  ;;  %v10629_v25 = vld [vmem:[#allocation104_spill] sm:$0xff]  ;;  %v10630_v21 = vld [vmem:[#allocation107_spill] sm:$0xff] }
 0x324   : > { %v1923_v61 = vadd.f32 %v1859_v36, %v8452_v34  ;;  %v1924_v16 = vadd.f32 %v1860_v17, %v8455_v40  ;;  %v1925_v24 = vadd.f32 %v1861_v2, %v8458_v33  ;;  %v1926_v0 = vadd.f32 %v1862_v18, %v8461_v19  ;;  %v10548_v19 = vld [vmem:[#allocation62_spill] sm:$0xff]  ;;  %v10551_v33 = vld [vmem:[#allocation84_spill] sm:$0xff]  ;;  %v10552_v40 = vld [vmem:[#allocation87_spill] sm:$0xff] }
 0x325   : > { %v1919_v4 = vadd.f32 %v10530_v6, %v10528_v52  ;;  %v1920_v3 = vadd.f32 %v10533_v29, %v10531_v20  ;;  %v1927_v32 = vadd.f32 %v1863_v62, %v8464_v14  ;;  %v1928_v6 = vadd.f32 %v1864_v12, %v8467_v53  ;;  %v10546_v53 = vld [vmem:[#allocation50_spill] sm:$0xff]  ;;  %v10553_v34 = vld [vmem:[#allocation97_spill] sm:$0xff] }
 0x326   : > { %v1929_v52 = vadd.f32 %v1865_v47, %v8470_v11  ;;  %v1930_v29 = vadd.f32 %v1866_v8, %v8473_v31  ;;  %v1931_v35 = vadd.f32 %v1867_v27, %v8476_v44  ;;  %v1932_v26 = vadd.f32 %v1868_v1, %v8479_v50  ;;  %v10534_v11 = vld [vmem:[#allocation213_spill] sm:$0xff]  ;;  %v10535_v31 = vld [vmem:[#allocation159_spill] sm:$0xff]  ;;  %v10536_v27 = vld [vmem:[#allocation164_spill] sm:$0xff] }
 0x327   : > { %v1933_v36 = vadd.f32 %v1869_v57, %v8482_v56  ;;  %v1934_v17 = vadd.f32 %v1870_v58, %v8485_v5  ;;  %v1935_v2 = vadd.f32 %v1871_v28, %v8488_v54  ;;  %v1936_v18 = vadd.f32 %v1872_v48, %v8491_v15  ;;  %v10537_v1 = vld [vmem:[#allocation180_spill] sm:$0xff]  ;;  %v10538_v50 = vld [vmem:[#allocation186_spill] sm:$0xff]  ;;  %v10539_v56 = vld [vmem:[#allocation197_spill] sm:$0xff] }
 0x328   : > { %v1937_v62 = vadd.f32 %v1873_v9, %v8494_v37  ;;  %v1938_v12 = vadd.f32 %v1874_v60, %v8497_v22  ;;  %v1939_v47 = vadd.f32 %v1875_v7, %v8500_v23  ;;  %v2491_v8 = vsub.f32 %v10534_v11, %v1915_v43  ;;  %v10540_v5 = vld [vmem:[#allocation207_spill] sm:$0xff]  ;;  %v10541_v54 = vld [vmem:[#allocation24_spill] sm:$0xff]  ;;  %v10542_v15 = vld [vmem:[#allocation26_spill] sm:$0xff] }
 0x329   : > { %v2492_v44 = vsub.f32 %v10536_v27, %v10535_v31  ;;  %v2494_v57 = vsub.f32 %v10538_v50, %v10537_v1  ;;  %v2495_v58 = vsub.f32 %v10539_v56, %v1919_v4  ;;  %v2496_v28 = vsub.f32 %v10540_v5, %v1920_v3  ;;  %v10543_v37 = vld [vmem:[#allocation34_spill] sm:$0xff]  ;;  %v10544_v22 = vld [vmem:[#allocation37_spill] sm:$0xff]  ;;  %v10545_v23 = vld [vmem:[#allocation48_spill] sm:$0xff] }
 0x32a   : > { %v2497_v48 = vsub.f32 %v10541_v54, %v1921_v51  ;;  %v2498_v9 = vsub.f32 %v10542_v15, %v1922_v39  ;;  %v2499_v60 = vsub.f32 %v10543_v37, %v1923_v61  ;;  %v2500_v7 = vsub.f32 %v10544_v22, %v1924_v16  ;;  %v10547_v31 = vld [vmem:[#allocation60_spill] sm:$0xff]  ;;  %v10549_v1 = vld [vmem:[#allocation73_spill] sm:$0xff]  ;;  %v10550_v56 = vld [vmem:[#allocation75_spill] sm:$0xff] }
 0x32b   : > { %v2501_v43 = vsub.f32 %v10545_v23, %v1925_v24  ;;  %v2502_v14 = vsub.f32 %v10546_v53, %v1926_v0  ;;  %v2503_v27 = vsub.f32 %v10547_v31, %v1927_v32  ;;  %v2504_v50 = vsub.f32 %v10548_v19, %v1928_v6  ;;  %v10554_v37 = vld [vmem:[#allocation99_spill] sm:$0xff]  ;;  %v10555_v22 = vld [vmem:[#allocation109_spill] sm:$0xff]  ;;  %v10557_v53 = vld [vmem:[#allocation122_spill] sm:$0xff] }
 0x32c   : > { %v2505_v4 = vsub.f32 %v10549_v1, %v1929_v52  ;;  %v2506_v3 = vsub.f32 %v10550_v56, %v1930_v29  ;;  %v2507_v51 = vsub.f32 %v10551_v33, %v1931_v35  ;;  %v2508_v39 = vsub.f32 %v10552_v40, %v1932_v26  ;;  %v10556_v23 = vld [vmem:[#allocation111_spill] sm:$0xff]  ;;  %v10558_v31 = vld [vmem:[#allocation124_spill] sm:$0xff]  ;;  %v10559_v19 = vld [vmem:[#allocation133_spill] sm:$0xff] }
 0x32d   : > { %v2509_v61 = vsub.f32 %v10553_v34, %v1933_v36  ;;  %v2510_v16 = vsub.f32 %v10554_v37, %v1934_v17  ;;  %v2511_v24 = vsub.f32 %v10555_v22, %v1935_v2  ;;  %v2512_v0 = vsub.f32 %v10556_v23, %v1936_v18  ;;  %v10561_v35 = vld [vmem:[#allocation157_spill] sm:$0xff]  ;;  %v10563_v36 = vld [vmem:[#allocation163_spill] sm:$0xff]  ;;  %v10626_v23 = vld [vmem:[#allocation82_spill] sm:$0xff] }
 0x32e   : > { %v2513_v32 = vsub.f32 %v10557_v53, %v1937_v62  ;;  %v2514_v6 = vsub.f32 %v10558_v31, %v1938_v12  ;;  %v2515_v52 = vsub.f32 %v10559_v19, %v1939_v47  ;;  %v10560_v29 = vrot.slane %v10487_v46, 7  ;;  %v10625_v31 = vld [vmem:[#allocation80_spill] sm:$0xff]  ;;  %v10628_v1 = vld [vmem:[#allocation95_spill] sm:$0xff]  ;;  %v10631_v20 = vld [vmem:[#allocation117_spill] sm:$0xff] }
 0x32f   : > { %v10562_v26 = vrot.slane %v10561_v35, 7  ;;  %v10564_v17 = vrot.slane %v10563_v36, 7  ;;  %v10565_v2 = vrot.slane %v10529_v10, 7  ;;  %v10566_v62 = vrot.slane %v10532_v59, 7  ;;  %v10582_v35 = vld [vmem:[#allocation57_spill] sm:$0xff]  ;;  %v10588_v36 = vld [vmem:[#allocation70_spill] sm:$0xff] }
 0x330   : > { %v8578_v56 = vsub.f32 %v2491_v8, %v10560_v29  ;;  %v10567_v46 = vrot.slane %v10488_v38, 7  ;;  %v10568_v8 = vrot.slane %v10489_v30, 7  ;;  %v10569_v29 = vrot.slane %v10490_v45, 7  ;;  %v10627_v34 = vld [vmem:[#allocation92_spill] sm:$0xff] }
 0x331   : > { %v8582_v40 = vsub.f32 %v2492_v44, %v10562_v26  ;;  %v8586_v37 = vsub.f32 %v2494_v57, %v10564_v17  ;;  %v8590_v18 = vsub.f32 %v2495_v58, %v10565_v2  ;;  %v8594_v12 = vsub.f32 %v2496_v28, %v10566_v62  ;;  %v10585_v26 = vld [vmem:[#allocation67_spill] sm:$0xff]  ;;  %v10594_v2 = vld [vmem:[#allocation81_spill] sm:$0xff] }
 0x332   : > { %v8598_v47 = vsub.f32 %v2497_v48, %v10567_v46  ;;  %v8602_v44 = vsub.f32 %v2498_v9, %v10568_v8  ;;  %v8606_v57 = vsub.f32 %v2499_v60, %v10569_v29  ;;  %v10570_v10 = vrot.slane %v10491_v41, 7  ;;  %v10591_v17 = vld [vmem:[#allocation79_spill] sm:$0xff]  ;;  %v10600_v8 = vld [vmem:[#allocation94_spill] sm:$0xff] }
 0x333   : > { %v10572_v59 = vrot.slane %v10492_v55, 7  ;;  %v10574_v38 = vrot.slane %v10493_v13, 7  ;;  %v10576_v30 = vrot.slane %v10494_v63, 7  ;;  %v10578_v45 = vrot.slane %v10495_v49, 7  ;;  %v10597_v62 = vld [vmem:[#allocation91_spill] sm:$0xff] }
 0x334   : > { %v8610_v58 = vsub.f32 %v2500_v7, %v10570_v10  ;;  %v10580_v41 = vrot.slane %v10496_v42, 7  ;;  %v10583_v55 = vrot.slane %v10582_v35, 7  ;;  %v10586_v13 = vrot.slane %v10585_v26, 7  ;;  %v10603_v10 = vld [vmem:[#allocation103_spill] sm:$0xff] }
 0x335   : > { %v8614_v28 = vsub.f32 %v2501_v43, %v10572_v59  ;;  %v8618_v48 = vsub.f32 %v2502_v14, %v10574_v38  ;;  %v8622_v9 = vsub.f32 %v2503_v27, %v10576_v30  ;;  %v8626_v60 = vsub.f32 %v2504_v50, %v10578_v45  ;;  %v10606_v38 = vld [vmem:[#allocation106_spill] sm:$0xff]  ;;  %v10609_v45 = vld [vmem:[#allocation116_spill] sm:$0xff]  ;;  %v10612_v35 = vld [vmem:[#allocation155_spill] sm:$0xff] }
 0x336   : > { %10571 = vst [vmem:[#allocation260_spill] sm:$0xff] %v8610_v58  ;;  %v8630_v7 = vsub.f32 %v2505_v4, %v10580_v41  ;;  %v8634_v43 = vsub.f32 %v2506_v3, %v10583_v55  ;;  %v8638_v14 = vsub.f32 %v2507_v51, %v10586_v13  ;;  %v10589_v63 = vrot.slane %v10588_v36, 7  ;;  %v10614_v13 = vld [vmem:[#allocation15_spill] sm:$0xff] }
 0x337   : > { %10573 = vst [vmem:[#allocation261_spill] sm:$0xff] %v8614_v28  ;;  %10575 = vst [vmem:[#allocation262_spill] sm:$0xff] %v8618_v48  ;;  %v10592_v49 = vrot.slane %v10591_v17, 7  ;;  %v10595_v42 = vrot.slane %v10594_v2, 7  ;;  %v10598_v46 = vrot.slane %v10597_v62, 7  ;;  %v10601_v29 = vrot.slane %v10600_v8, 7 }
 0x338   : > { %10577 = vst [vmem:[#allocation247_spill] sm:$0xff] %v8622_v9  ;;  %10579 = vst [vmem:[#allocation205_spill] sm:$0xff] %v8626_v60  ;;  %v8642_v27 = vsub.f32 %v2508_v39, %v10589_v63  ;;  %v10604_v59 = vrot.slane %v10603_v10, 7  ;;  %v10607_v30 = vrot.slane %v10606_v38, 7  ;;  %v10610_v41 = vrot.slane %v10609_v45, 7  ;;  %v10616_v17 = vld [vmem:[#allocation23_spill] sm:$0xff] }
 0x339   : > { %10581 = vst [vmem:[#allocation161_spill] sm:$0xff] %v8630_v7  ;;  %10584 = vst [vmem:[#allocation169_spill] sm:$0xff] %v8634_v43  ;;  %v8646_v50 = vsub.f32 %v2509_v61, %v10592_v49  ;;  %v8650_v4 = vsub.f32 %v2510_v16, %v10595_v42  ;;  %v8654_v3 = vsub.f32 %v2511_v24, %v10598_v46  ;;  %v3099_v55 = vrot.slane %v10612_v35, 2  ;;  %v10613_v24 = vld [vmem:[#allocation13_spill] sm:$0xff]  ;;  %v10618_v42 = vld [vmem:[#allocation32_spill] sm:$0xff] }
 0x33a   : > { %10587 = vst [vmem:[#allocation173_spill] sm:$0xff] %v8638_v14  ;;  %10590 = vst [vmem:[#allocation171_spill] sm:$0xff] %v8642_v27  ;;  %v8658_v51 = vsub.f32 %v2512_v0, %v10601_v29  ;;  %v8662_v39 = vsub.f32 %v2513_v32, %v10604_v59  ;;  %v8666_v61 = vsub.f32 %v2514_v6, %v10607_v30  ;;  %v3105_v26 = vrot.slane %v10613_v24, 2  ;;  %v10615_v0 = vld [vmem:[#allocation20_spill] sm:$0xff]  ;;  %v10617_v32 = vld [vmem:[#allocation30_spill] sm:$0xff] }
 0x33b   : > { %10593 = vst [vmem:[#allocation181_spill] sm:$0xff] %v8646_v50  ;;  %10596 = vst [vmem:[#allocation184_spill] sm:$0xff] %v8650_v4  ;;  %v8670_v16 = vsub.f32 %v2515_v52, %v10610_v41  ;;  %v3106_v36 = vrot.slane %v10614_v13, 2  ;;  %v3107_v63 = vrot.slane %v10615_v0, 2  ;;  %v3108_v49 = vrot.slane %v10616_v17, 2  ;;  %v10619_v6 = vld [vmem:[#allocation43_spill] sm:$0xff] }
 0x33c   : > { %10599 = vst [vmem:[#allocation192_spill] sm:$0xff] %v8654_v3  ;;  %10602 = vst [vmem:[#allocation216_spill] sm:$0xff] %v8658_v51  ;;  %v3109_v2 = vrot.slane %v10617_v32, 2  ;;  %v3110_v62 = vrot.slane %v10618_v42, 2  ;;  %v3111_v46 = vrot.slane %v10619_v6, 2  ;;  %v10620_v8 = vld [vmem:[#allocation46_spill] sm:$0xff] }
 0x33d   : > { %10605 = vst [vmem:[#allocation194_spill] sm:$0xff] %v8662_v39  ;;  %10608 = vst [vmem:[#allocation158_spill] sm:$0xff] %v8666_v61  ;;  %v3112_v29 = vrot.slane %v10620_v8, 2  ;;  %v10621_v52 = vld [vmem:[#allocation55_spill] sm:$0xff]  ;;  %v10622_v59 = vld [vmem:[#allocation58_spill] sm:$0xff]  ;;  %v3117_v53 = vrot.slane %v10625_v31, 2 }
 0x33e   : > { %10611 = vst [vmem:[#allocation175_spill] sm:$0xff] %v8670_v16  ;;  %v3113_v10 = vrot.slane %v10621_v52, 2  ;;  %v3114_v38 = vrot.slane %v10622_v59, 2  ;;  %v10623_v30 = vld [vmem:[#allocation68_spill] sm:$0xff]  ;;  %v10624_v41 = vld [vmem:[#allocation71_spill] sm:$0xff]  ;;  %v3118_v22 = vrot.slane %v10626_v23, 2 }
 0x33f   : > { %v3115_v45 = vrot.slane %v10623_v30, 2  ;;  %v3116_v19 = vrot.slane %v10624_v41, 2  ;;  %v3119_v33 = vrot.slane %v10627_v34, 2  ;;  %v3120_v15 = vrot.slane %v10628_v1, 2  ;;  %v10632_v16 = vld [vmem:[#allocation223_spill] sm:$0xff]  ;;  %v10633_v39 = vld [vmem:[#allocation196_spill] sm:$0xff] }
 0x340   : > { %v3121_v54 = vrot.slane %v10629_v25, 2  ;;  %v3122_v5 = vrot.slane %v10630_v21, 2  ;;  %v3123_v11 = vrot.slane %v10631_v20, 2  ;;  %v8693_v61 = vadd.f32 %v3099_v55, %v10632_v16  ;;  %v10634_v51 = vld [vmem:[#allocation168_spill] sm:$0xff]  ;;  %v10637_v14 = vld [vmem:[#allocation225_spill] sm:$0xff]  ;;  %v10638_v7 = vld [vmem:[#allocation226_spill] sm:$0xff] }
 0x341   : > { %v10635_v3 = vrot.slane %v10634_v51, 2  ;;  %v10636_v50 = vld [vmem:[#allocation224_spill] sm:$0xff]  ;;  %v8704_v43 = vadd.f32 %v3106_v36, %v10637_v14  ;;  %v8707_v60 = vadd.f32 %v3107_v63, %v10638_v7  ;;  %v10639_v9 = vld [vmem:[#allocation227_spill] sm:$0xff]  ;;  %v10643_v55 = vld [vmem:[#allocation229_spill] sm:$0xff] }
 0x342   : > { %v8701_v27 = vadd.f32 %v3105_v26, %v10636_v50  ;;  %v8710_v48 = vadd.f32 %v3108_v49, %v10639_v9  ;;  %v10641_v28 = vld [vmem:[#allocation228_spill] sm:$0xff]  ;;  %v8716_v58 = vadd.f32 %v3110_v62, %v10643_v55  ;;  %v10647_v50 = vld [vmem:[#allocation231_spill] sm:$0xff]  ;;  %v10651_v7 = vld [vmem:[#allocation233_spill] sm:$0xff] }
 0x343   : > { %v8698_v4 = vadd.f32 %v10635_v3, %v10633_v39  ;;  %v8713_v16 = vadd.f32 %v3109_v2, %v10641_v28  ;;  %v10645_v3 = vld [vmem:[#allocation230_spill] sm:$0xff]  ;;  %v8722_v26 = vadd.f32 %v3112_v29, %v10647_v50  ;;  %v10649_v14 = vld [vmem:[#allocation232_spill] sm:$0xff]  ;;  %v8728_v63 = vadd.f32 %v3114_v38, %v10651_v7  ;;  %v10655_v28 = vld [vmem:[#allocation235_spill] sm:$0xff] }
 0x344   : > { %10640 = vst [vmem:[#allocation36_spill] sm:$0xff] %v8710_v48  ;;  %10644 = vst [vmem:[#allocation185_spill] sm:$0xff] %v8716_v58  ;;  %v8719_v39 = vadd.f32 %v3111_v46, %v10645_v3  ;;  %v8725_v36 = vadd.f32 %v3113_v10, %v10649_v14  ;;  %v10653_v9 = vld [vmem:[#allocation234_spill] sm:$0xff]  ;;  %v8734_v2 = vadd.f32 %v3116_v19, %v10655_v28  ;;  %v10657_v62 = vld [vmem:[#allocation236_spill] sm:$0xff] }
 0x345   : > { %10642 = vst [vmem:[#allocation174_spill] sm:$0xff] %v8713_v16  ;;  %10648 = vst [vmem:[#allocation202_spill] sm:$0xff] %v8722_v26  ;;  %v8731_v49 = vadd.f32 %v3115_v45, %v10653_v9  ;;  %v8737_v55 = vadd.f32 %v3117_v53, %v10657_v62  ;;  %v10659_v46 = vld [vmem:[#allocation237_spill] sm:$0xff]  ;;  %v10661_v29 = vld [vmem:[#allocation238_spill] sm:$0xff]  ;;  %v3291_v53 = vrot.slane %v10612_v35, 3  ;;  %v3298_v62 = vrot.slane %v10614_v13, 3 }
 0x346   : > { %10646 = vst [vmem:[#allocation182_spill] sm:$0xff] %v8719_v39  ;;  %10650 = vst [vmem:[#allocation201_spill] sm:$0xff] %v8725_v36  ;;  %v8740_v3 = vadd.f32 %v3118_v22, %v10659_v46  ;;  %v8743_v50 = vadd.f32 %v3119_v33, %v10661_v29  ;;  %v10663_v10 = vld [vmem:[#allocation239_spill] sm:$0xff]  ;;  %v10665_v38 = vld [vmem:[#allocation240_spill] sm:$0xff]  ;;  %v3297_v22 = vrot.slane %v10613_v24, 3  ;;  %v3299_v33 = vrot.slane %v10615_v0, 3 }
 0x347   : > { %10652 = vst [vmem:[#allocation219_spill] sm:$0xff] %v8728_v63  ;;  %10654 = vst [vmem:[#allocation210_spill] sm:$0xff] %v8731_v49  ;;  %v8746_v14 = vadd.f32 %v3120_v15, %v10663_v10  ;;  %v8749_v7 = vadd.f32 %v3121_v54, %v10665_v38  ;;  %v10667_v45 = vld [vmem:[#allocation241_spill] sm:$0xff]  ;;  %v10669_v19 = vld [vmem:[#allocation242_spill] sm:$0xff]  ;;  %v3300_v15 = vrot.slane %v10616_v17, 3  ;;  %v3301_v46 = vrot.slane %v10617_v32, 3 }
 0x348   : > { %10656 = vst [vmem:[#allocation86_spill] sm:$0xff] %v8734_v2  ;;  %10658 = vst [vmem:[#allocation177_spill] sm:$0xff] %v8737_v55  ;;  %v8752_v9 = vadd.f32 %v3122_v5, %v10667_v45  ;;  %v8755_v28 = vadd.f32 %v3123_v11, %v10669_v19  ;;  %v3302_v54 = vrot.slane %v10618_v42, 3  ;;  %v3303_v5 = vrot.slane %v10619_v6, 3  ;;  %v10672_v13 = vld [vmem:[#allocation221_spill] sm:$0xff]  ;;  %v10673_v24 = vld [vmem:[#allocation162_spill] sm:$0xff] }
 0x349   : > { %10660 = vst [vmem:[#allocation211_spill] sm:$0xff] %v8740_v3  ;;  %10662 = vst [vmem:[#allocation212_spill] sm:$0xff] %v8743_v50  ;;  %v3304_v29 = vrot.slane %v10620_v8, 3  ;;  %v3305_v11 = vrot.slane %v10621_v52, 3  ;;  %v3306_v10 = vrot.slane %v10622_v59, 3  ;;  %v3307_v38 = vrot.slane %v10623_v30, 3 }
 0x34a   : > { %10664 = vst [vmem:[#allocation215_spill] sm:$0xff] %v8746_v14  ;;  %10666 = vst [vmem:[#allocation33_spill] sm:$0xff] %v8749_v7  ;;  %v3308_v45 = vrot.slane %v10624_v41, 3  ;;  %v3309_v19 = vrot.slane %v10625_v31, 3  ;;  %v3310_v17 = vrot.slane %v10626_v23, 3  ;;  %v3311_v32 = vrot.slane %v10627_v34, 3 }
 0x34b   : > { %10668 = vst [vmem:[#allocation40_spill] sm:$0xff] %v8752_v9  ;;  %10670 = vst [vmem:[#allocation47_spill] sm:$0xff] %v8755_v28  ;;  %v3312_v42 = vrot.slane %v10628_v1, 3  ;;  %v3313_v6 = vrot.slane %v10629_v25, 3  ;;  %v3314_v8 = vrot.slane %v10630_v21, 3  ;;  %v3315_v52 = vrot.slane %v10631_v20, 3 }
 0x34c   : > { %v3355_v59 = vadd.f32 %v3291_v53, %v8693_v61  ;;  %v10671_v30 = vrot.slane %v10634_v51, 3  ;;  %v3361_v31 = vadd.f32 %v3297_v22, %v8701_v27  ;;  %v3362_v23 = vadd.f32 %v3298_v62, %v8704_v43  ;;  %v10676_v35 = vld [vmem:[#allocation179_spill] sm:$0xff] }
 0x34d   : > { %v3363_v34 = vadd.f32 %v3299_v33, %v8707_v60  ;;  %v3364_v1 = vadd.f32 %v3300_v15, %v8710_v48  ;;  %v3365_v25 = vadd.f32 %v3301_v46, %v8713_v16  ;;  %v3366_v21 = vadd.f32 %v3302_v54, %v8716_v58  ;;  %v10693_v58 = vld [vmem:[#allocation151_spill] sm:$0xff]  ;;  %v10694_v16 = vld [vmem:[#allocation152_spill] sm:$0xff]  ;;  %v10695_v48 = vld [vmem:[#allocation154_spill] sm:$0xff] }
 0x34e   : > { %v3359_v41 = vadd.f32 %v10671_v30, %v8698_v4  ;;  %v3367_v20 = vadd.f32 %v3303_v5, %v8719_v39  ;;  %v3368_v53 = vadd.f32 %v3304_v29, %v8722_v26  ;;  %v3369_v0 = vadd.f32 %v3305_v11, %v8725_v36  ;;  %v10691_v39 = vld [vmem:[#allocation146_spill] sm:$0xff] }
 0x34f   : > { %v3370_v30 = vadd.f32 %v3306_v10, %v8728_v63  ;;  %v3371_v22 = vadd.f32 %v3307_v38, %v8731_v49  ;;  %v3372_v62 = vadd.f32 %v3308_v45, %v8734_v2  ;;  %v3373_v33 = vadd.f32 %v3309_v19, %v8737_v55  ;;  %v10674_v38 = vld [vmem:[#allocation165_spill] sm:$0xff]  ;;  %v10675_v45 = vld [vmem:[#allocation178_spill] sm:$0xff]  ;;  %v10677_v55 = vld [vmem:[#allocation187_spill] sm:$0xff] }
 0x350   : > { %v3374_v15 = vadd.f32 %v3310_v17, %v8740_v3  ;;  %v3375_v46 = vadd.f32 %v3311_v32, %v8743_v50  ;;  %v3376_v54 = vadd.f32 %v3312_v42, %v8746_v14  ;;  %v3377_v5 = vadd.f32 %v3313_v6, %v8749_v7  ;;  %v10678_v17 = vld [vmem:[#allocation189_spill] sm:$0xff]  ;;  %v10679_v32 = vld [vmem:[#allocation200_spill] sm:$0xff]  ;;  %v10682_v7 = vld [vmem:[#allocation42_spill] sm:$0xff] }
 0x351   : > { %v3378_v29 = vadd.f32 %v3314_v8, %v8752_v9  ;;  %v3379_v11 = vadd.f32 %v3315_v52, %v8755_v28  ;;  %v3867_v10 = vsub.f32 %v10672_v13, %v3355_v59  ;;  %v3868_v51 = vsub.f32 %v10674_v38, %v10673_v24  ;;  %v10680_v42 = vld [vmem:[#allocation208_spill] sm:$0xff]  ;;  %v10681_v14 = vld [vmem:[#allocation209_spill] sm:$0xff]  ;;  %v10683_v9 = vld [vmem:[#allocation66_spill] sm:$0xff] }
 0x352   : > { %v3869_v19 = vsub.f32 %v10676_v35, %v10675_v45  ;;  %v3870_v3 = vsub.f32 %v10678_v17, %v10677_v55  ;;  %v3871_v50 = vsub.f32 %v10679_v32, %v3359_v41  ;;  %v3872_v6 = vsub.f32 %v10681_v14, %v10680_v42  ;;  %v10684_v28 = vld [vmem:[#allocation115_spill] sm:$0xff]  ;;  %v10685_v2 = vld [vmem:[#allocation134_spill] sm:$0xff]  ;;  %v10686_v24 = vld [vmem:[#allocation137_spill] sm:$0xff] }
 0x353   : > { %v3873_v8 = vsub.f32 %v10682_v7, %v3361_v31  ;;  %v3874_v52 = vsub.f32 %v10683_v9, %v3362_v23  ;;  %v3875_v59 = vsub.f32 %v10684_v28, %v3363_v34  ;;  %v3876_v49 = vsub.f32 %v10685_v2, %v3364_v1  ;;  %v10687_v63 = vld [vmem:[#allocation141_spill] sm:$0xff]  ;;  %v10688_v45 = vld [vmem:[#allocation142_spill] sm:$0xff]  ;;  %v10689_v55 = vld [vmem:[#allocation143_spill] sm:$0xff] }
 0x354   : > { %v3877_v38 = vsub.f32 %v10686_v24, %v3365_v25  ;;  %v3878_v35 = vsub.f32 %v10687_v63, %v3366_v21  ;;  %v3879_v36 = vsub.f32 %v10688_v45, %v3367_v20  ;;  %v3880_v17 = vsub.f32 %v10689_v55, %v3368_v53  ;;  %v10690_v41 = vld [vmem:[#allocation144_spill] sm:$0xff]  ;;  %v10692_v42 = vld [vmem:[#allocation150_spill] sm:$0xff] }
 0x355   : > { %v3881_v26 = vsub.f32 %v10690_v41, %v3369_v0  ;;  %v3882_v14 = vsub.f32 %v10691_v39, %v3370_v30  ;;  %v3883_v31 = vsub.f32 %v10692_v42, %v3371_v22  ;;  %v3884_v23 = vsub.f32 %v10693_v58, %v3372_v62  ;;  %v10696_v2 = vld [vmem:[#allocation156_spill] sm:$0xff]  ;;  %v10697_v24 = vld [vmem:[#allocation214_spill] sm:$0xff]  ;;  %v10784_v41 = vld [vmem:[#allocation197_spill] sm:$0xff] }
 0x356   : > { %v3885_v34 = vsub.f32 %v10694_v16, %v3373_v33  ;;  %v3886_v1 = vsub.f32 %v10695_v48, %v3374_v15  ;;  %v3887_v25 = vsub.f32 %v10696_v2, %v3375_v46  ;;  %v3888_v21 = vsub.f32 %v10697_v24, %v3376_v54  ;;  %v10698_v63 = vld [vmem:[#allocation218_spill] sm:$0xff]  ;;  %v10699_v45 = vld [vmem:[#allocation220_spill] sm:$0xff]  ;;  %v10778_v48 = vld [vmem:[#allocation101_spill] sm:$0xff] }
 0x357   : > { %v3889_v20 = vsub.f32 %v10698_v63, %v3377_v5  ;;  %v3890_v53 = vsub.f32 %v10699_v45, %v3378_v29  ;;  %v10700_v55 = vld [vmem:[#allocation222_spill] sm:$0xff]  ;;  %v8830_v30 = vadd.f32 %v3867_v10, %v8578_v56  ;;  %v4092_v22 = vadd.f32 %v3868_v51, %v8582_v40  ;;  %v10701_v62 = vld [vmem:[#allocation176_spill] sm:$0xff]  ;;  %v10703_v56 = vld [vmem:[#allocation261_spill] sm:$0xff] }
 0x358   : > { %v3891_v0 = vsub.f32 %v10700_v55, %v3379_v11  ;;  %v4093_v58 = vadd.f32 %v3869_v19, %v10701_v62  ;;  %v4094_v33 = vadd.f32 %v3870_v3, %v8586_v37  ;;  %v4095_v15 = vadd.f32 %v3871_v50, %v8590_v18  ;;  %v10702_v11 = vld [vmem:[#allocation260_spill] sm:$0xff]  ;;  %v10704_v45 = vld [vmem:[#allocation262_spill] sm:$0xff]  ;;  %v10705_v51 = vld [vmem:[#allocation247_spill] sm:$0xff] }
 0x359   : > { %v4096_v46 = vadd.f32 %v3872_v6, %v8594_v12  ;;  %v4097_v54 = vadd.f32 %v3873_v8, %v8598_v47  ;;  %v4098_v5 = vadd.f32 %v3874_v52, %v8602_v44  ;;  %v4099_v29 = vadd.f32 %v3875_v59, %v8606_v57  ;;  %v10706_v62 = vld [vmem:[#allocation205_spill] sm:$0xff]  ;;  %v10710_v8 = vld [vmem:[#allocation171_spill] sm:$0xff]  ;;  %v10712_v59 = vld [vmem:[#allocation184_spill] sm:$0xff] }
 0x35a   : > { %v4100_v55 = vadd.f32 %v3876_v49, %v10702_v11  ;;  %v4101_v10 = vadd.f32 %v3877_v38, %v10703_v56  ;;  %v4102_v40 = vadd.f32 %v3878_v35, %v10704_v45  ;;  %v4103_v19 = vadd.f32 %v3879_v36, %v10705_v51  ;;  %v10707_v3 = vld [vmem:[#allocation161_spill] sm:$0xff]  ;;  %v10713_v11 = vld [vmem:[#allocation192_spill] sm:$0xff]  ;;  %v10715_v45 = vld [vmem:[#allocation194_spill] sm:$0xff] }
 0x35b   : > { %v4104_v37 = vadd.f32 %v3880_v17, %v10706_v62  ;;  %v4105_v18 = vadd.f32 %v3881_v26, %v10707_v3  ;;  %v10708_v50 = vld [vmem:[#allocation169_spill] sm:$0xff]  ;;  %v4108_v44 = vadd.f32 %v3884_v23, %v10710_v8  ;;  %v4110_v49 = vadd.f32 %v3886_v1, %v10712_v59  ;;  %v10714_v56 = vld [vmem:[#allocation216_spill] sm:$0xff]  ;;  %v10716_v51 = vld [vmem:[#allocation158_spill] sm:$0xff] }
 0x35c   : > { %v4106_v12 = vadd.f32 %v3882_v14, %v10708_v50  ;;  %v10709_v6 = vld [vmem:[#allocation173_spill] sm:$0xff]  ;;  %v4111_v38 = vadd.f32 %v3887_v25, %v10713_v11  ;;  %v4112_v35 = vadd.f32 %v3888_v21, %v10714_v56  ;;  %v4113_v36 = vadd.f32 %v3889_v20, %v10715_v45  ;;  %v10717_v62 = vld [vmem:[#allocation175_spill] sm:$0xff]  ;;  %v10776_v24 = vld [vmem:[#allocation88_spill] sm:$0xff] }
 0x35d   : > { %v4107_v47 = vadd.f32 %v3883_v31, %v10709_v6  ;;  %v10711_v52 = vld [vmem:[#allocation181_spill] sm:$0xff]  ;;  %v4114_v17 = vadd.f32 %v3890_v53, %v10716_v51  ;;  %v4115_v26 = vadd.f32 %v3891_v0, %v10717_v62  ;;  %v4438_v14 = vrot.slane %v8830_v30, 1  ;;  %v10777_v2 = vld [vmem:[#allocation98_spill] sm:$0xff] }
 0x35e   : > { %v4109_v57 = vadd.f32 %v3885_v34, %v10711_v52  ;;  %v4439_v3 = vrot.slane %v4093_v58, 7  ;;  %v4441_v31 = vrot.slane %v4094_v33, 6  ;;  %v4443_v50 = vrot.slane %v4095_v15, 5  ;;  %v10718_v62 = vld [vmem:[#allocation105_spill] sm:$0xff] }
 0x35f   : > { %v4445_v23 = vrot.slane %v4096_v46, 4  ;;  %v4447_v6 = vrot.slane %v4097_v54, 3  ;;  %v4449_v34 = vrot.slane %v4098_v5, 2  ;;  %v4451_v8 = vrot.slane %v4099_v29, 1  ;;  %v10775_v63 = vld [vmem:[#allocation85_spill] sm:$0xff] }
 0x360   : > { %v4453_v1 = vrot.slane %v4101_v10, 7  ;;  %v4440_v25 = vsel %vm4157_vm0, %v4439_v3, %v4092_v22  ;;  %v4455_v52 = vrot.slane %v4102_v40, 6  ;;  %v4457_v21 = vrot.slane %v4103_v19, 5  ;;  %v10719_v3 = vld [vmem:[#allocation213_spill] sm:$0xff] }
 0x361   : > { %v4459_v59 = vrot.slane %v4104_v37, 4  ;;  %v4442_v20 = vsel %vm4160_vm1, %v4441_v31, %v4440_v25  ;;  %v4461_v0 = vrot.slane %v4105_v18, 3  ;;  %v4463_v11 = vrot.slane %v4106_v12, 2 }
 0x362   : > { %v4454_v53 = vsel %vm4157_vm0, %v4453_v1, %v4100_v55  ;;  %v4444_v58 = vsel %vm4163_vm2, %v4443_v50, %v4442_v20  ;;  %v4465_v33 = vrot.slane %v4107_v47, 1  ;;  %v4467_v15 = vrot.slane %v4109_v57, 7  ;;  %v10720_v50 = vld [vmem:[#allocation198_spill] sm:$0xff] }
 0x363   : > { %v4456_v30 = vsel %vm4160_vm1, %v4455_v52, %v4454_v53  ;;  %v4446_v46 = vsel %vm4166_vm3, %v4445_v23, %v4444_v58  ;;  %v4469_v22 = vrot.slane %v4110_v49, 6  ;;  %v4471_v5 = vrot.slane %v4111_v38, 5  ;;  %v10724_v52 = vld [vmem:[#allocation118_spill] sm:$0xff] }
 0x364   : > { %v4458_v54 = vsel %vm4163_vm2, %v4457_v21, %v4456_v30  ;;  %v4448_v29 = vsel %vm4169_vm4, %v4447_v6, %v4446_v46  ;;  %v4468_v55 = vsel %vm4157_vm0, %v4467_v15, %v4108_v44  ;;  %v4473_v40 = vrot.slane %v4112_v35, 4  ;;  %v10722_v6 = vld [vmem:[#allocation114_spill] sm:$0xff]  ;;  %v10730_v30 = vld [vmem:[#allocation243_spill] sm:$0xff] }
 0x365   : > { %v4460_v10 = vsel %vm4166_vm3, %v4459_v59, %v4458_v54  ;;  %v4450_v19 = vsel %vm4172_vm5, %v4449_v34, %v4448_v29  ;;  %v4470_v18 = vsel %vm4160_vm1, %v4469_v22, %v4468_v55  ;;  %v4475_v12 = vrot.slane %v4113_v36, 3  ;;  %v10721_v36 = vld [vmem:[#allocation207_spill] sm:$0xff]  ;;  %v10723_v34 = vld [vmem:[#allocation24_spill] sm:$0xff]  ;;  %v10725_v21 = vld [vmem:[#allocation26_spill] sm:$0xff] }
 0x366   : > { %v4462_v37 = vsel %vm4169_vm4, %v4461_v0, %v4460_v10  ;;  %v4452_v47 = vsel %vm4174_vm6, %v4451_v8, %v4450_v19  ;;  %v4472_v49 = vsel %vm4163_vm2, %v4471_v5, %v4470_v18  ;;  %v4477_v38 = vrot.slane %v4114_v17, 2  ;;  %v10727_v20 = vld [vmem:[#allocation34_spill] sm:$0xff]  ;;  %v10728_v0 = vld [vmem:[#allocation195_spill] sm:$0xff]  ;;  %v10732_v5 = vld [vmem:[#allocation244_spill] sm:$0xff] }
 0x367   : > { %v4464_v57 = vsel %vm4172_vm5, %v4463_v11, %v4462_v37  ;;  %v4474_v45 = vsel %vm4166_vm3, %v4473_v40, %v4472_v49  ;;  %v4479_v44 = vrot.slane %v4115_v26, 1  ;;  %v4501_v35 = vpack.c.bf16 %v4452_v47, %v4438_v14  ;;  %v10726_v14 = vld [vmem:[#allocation125_spill] sm:$0xff]  ;;  %v10733_v29 = vld [vmem:[#allocation50_spill] sm:$0xff]  ;;  %v10735_v40 = vld [vmem:[#allocation60_spill] sm:$0xff] }
 0x368   : > { %v4466_v56 = vsel %vm4174_vm6, %v4465_v33, %v4464_v57  ;;  %v4476_v51 = vsel %vm4169_vm4, %v4475_v12, %v4474_v45  ;;  %v2331_v31 = vsub.f32 %v10719_v3, %v10718_v62  ;;  %v2336_v23 = vsub.f32 %v10721_v36, %v10720_v50  ;;  %v10729_v11 = vld [vmem:[#allocation37_spill] sm:$0xff]  ;;  %v10731_v33 = vld [vmem:[#allocation48_spill] sm:$0xff]  ;;  %v10736_v37 = vld [vmem:[#allocation246_spill] sm:$0xff] }
 0x369   : > { %v2337_v8 = vsub.f32 %v10723_v34, %v10722_v6  ;;  %v4478_v1 = vsel %vm4172_vm5, %v4477_v38, %v4476_v51  ;;  %v4634_v17 = vshrl.u32 %v4501_v35, 16  ;;  %v4637_v25 = vshll.u32 %v4501_v35, 16  ;;  %v10734_v55 = vld [vmem:[#allocation245_spill] sm:$0xff]  ;;  %v10737_v18 = vld [vmem:[#allocation62_spill] sm:$0xff]  ;;  %v10738_v47 = vld [vmem:[#allocation248_spill] sm:$0xff] }
 0x36a   : > { %v2338_v59 = vsub.f32 %v10725_v21, %v10724_v52  ;;  %v4480_v26 = vsel %vm4174_vm6, %v4479_v44, %v4478_v1  ;;  %v2339_v53 = vsub.f32 %v10727_v20, %v10726_v14  ;;  %v2340_v58 = vsub.f32 %v10729_v11, %v10728_v0  ;;  %v10739_v57 = vld [vmem:[#allocation73_spill] sm:$0xff]  ;;  %v10741_v45 = vld [vmem:[#allocation75_spill] sm:$0xff]  ;;  %v10742_v62 = vld [vmem:[#allocation250_spill] sm:$0xff] }
 0x36b   : > { %v2341_v15 = vsub.f32 %v10731_v33, %v10730_v30  ;;  %v4505_v46 = vpack.c.bf16 %v4480_v26, %v4466_v56  ;;  %v4636_v54 = vrot.slane %v4634_v17, 3  ;;  %v4639_v22 = vrot.slane %v4637_v25, 4  ;;  %v10740_v38 = vld [vmem:[#allocation249_spill] sm:$0xff]  ;;  %v10743_v3 = vld [vmem:[#allocation84_spill] sm:$0xff]  ;;  %v10744_v36 = vld [vmem:[#allocation251_spill] sm:$0xff] }
 0x36c   : > { %v2342_v10 = vsub.f32 %v10733_v29, %v10732_v5  ;;  %v2343_v19 = vsub.f32 %v10735_v40, %v10734_v55  ;;  %v2344_v12 = vsub.f32 %v10737_v18, %v10736_v37  ;;  %v2345_v49 = vsub.f32 %v10739_v57, %v10738_v47  ;;  %v10745_v6 = vld [vmem:[#allocation87_spill] sm:$0xff]  ;;  %v10746_v1 = vld [vmem:[#allocation252_spill] sm:$0xff]  ;;  %v10747_v17 = vld [vmem:[#allocation97_spill] sm:$0xff] }
 0x36d   : > { %v2346_v44 = vsub.f32 %v10741_v45, %v10740_v38  ;;  %v4640_v35 = vor.u32 %v4639_v22, %v4636_v54  ;;  %v4642_v51 = vshrl.u32 %v4505_v46, 16  ;;  %v4645_v56 = vshll.u32 %v4505_v46, 16  ;;  %v10748_v52 = vld [vmem:[#allocation253_spill] sm:$0xff]  ;;  %v10749_v21 = vld [vmem:[#allocation99_spill] sm:$0xff]  ;;  %v10750_v14 = vld [vmem:[#allocation254_spill] sm:$0xff] }
 0x36e   : > { %v2347_v50 = vsub.f32 %v10743_v3, %v10742_v62  ;;  %v2348_v34 = vsub.f32 %v10745_v6, %v10744_v36  ;;  %v2349_v25 = vsub.f32 %v10747_v17, %v10746_v1  ;;  %v2350_v26 = vsub.f32 %v10749_v21, %v10748_v52  ;;  %v10751_v20 = vld [vmem:[#allocation109_spill] sm:$0xff]  ;;  %v10752_v33 = vld [vmem:[#allocation256_spill] sm:$0xff]  ;;  %v10753_v54 = vld [vmem:[#allocation111_spill] sm:$0xff] }
 0x36f   : > { %v2351_v0 = vsub.f32 %v10751_v20, %v10750_v14  ;;  %v4644_v11 = vrot.slane %v4642_v51, 3  ;;  %v4647_v30 = vrot.slane %v4645_v56, 4  ;;  %v2352_v46 = vsub.f32 %v10753_v54, %v10752_v33  ;;  %v10754_v22 = vld [vmem:[#allocation257_spill] sm:$0xff]  ;;  %v10755_v5 = vld [vmem:[#allocation122_spill] sm:$0xff]  ;;  %v10757_v40 = vld [vmem:[#allocation124_spill] sm:$0xff] }
 0x370   : > { %v2353_v29 = vsub.f32 %v10755_v5, %v10754_v22  ;;  %v10756_v55 = vld [vmem:[#allocation258_spill] sm:$0xff]  ;;  %v10758_v18 = vld [vmem:[#allocation259_spill] sm:$0xff]  ;;  %v10759_v47 = vld [vmem:[#allocation133_spill] sm:$0xff]  ;;  %v2416_v16 = vrot.slane %v10778_v48, 7 }
 0x371   : > { %v2354_v37 = vsub.f32 %v10757_v40, %v10756_v55  ;;  %v2355_v57 = vsub.f32 %v10759_v47, %v10758_v18  ;;  %v10760_v38 = vld [vmem:[#allocation203_spill] sm:$0xff]  ;;  %v8922_v36 = vor.u32 %v4647_v30, %v4644_v11  ;;  %v10763_v51 = vld [vmem:[#allocation16_spill] sm:$0xff]  ;;  %v10764_v6 = vld [vmem:[#allocation17_spill] sm:$0xff] }
 0x372   : > { %v2395_v45 = vrot.slane %v10760_v38, 7  ;;  %v10761_v62 = vld [vmem:[#allocation199_spill] sm:$0xff]  ;;  %v2401_v56 = vrot.slane %v10763_v51, 7  ;;  %v2402_v1 = vrot.slane %v10764_v6, 7  ;;  %v10765_v17 = vld [vmem:[#allocation25_spill] sm:$0xff]  ;;  %v10768_v54 = vld [vmem:[#allocation38_spill] sm:$0xff] }
 0x373   : > { %v2400_v3 = vrot.slane %v10761_v62, 7  ;;  %10762 = vst [vmem:[#allocation89_spill] sm:$0xff] %v8922_v36  ;;  %v2403_v52 = vrot.slane %v10765_v17, 7  ;;  %v10766_v21 = vld [vmem:[#allocation27_spill] sm:$0xff]  ;;  %v2406_v22 = vrot.slane %v10768_v54, 7  ;;  %v10769_v5 = vld [vmem:[#allocation49_spill] sm:$0xff]  ;;  %v4649_v40 = vsel %vm4581_vm7, %v4640_v35, %v8922_v36 }
 0x374   : > { %v2404_v14 = vrot.slane %v10766_v21, 7  ;;  %v10767_v20 = vld [vmem:[#allocation35_spill] sm:$0xff]  ;;  %v2407_v55 = vrot.slane %v10769_v5, 7  ;;  %v10770_v18 = vld [vmem:[#allocation52_spill] sm:$0xff]  ;;  %v10771_v30 = vld [vmem:[#allocation61_spill] sm:$0xff]  ;;  %4967 = vmatprep.mubr.bf16.mxu1 %v4649_v40  ;;  %v2414_v54 = vrot.slane %v10776_v24, 7  ;;  %v8958_v48 = vsub.f32 %v2338_v59, %v2402_v1 }
 0x375   : > { %v2405_v33 = vrot.slane %v10767_v20, 7  ;;  %v2408_v11 = vrot.slane %v10770_v18, 7  ;;  %v2409_v47 = vrot.slane %v10771_v30, 7  ;;  %v10772_v38 = vld [vmem:[#allocation64_spill] sm:$0xff]  ;;  %v10773_v51 = vld [vmem:[#allocation74_spill] sm:$0xff]  ;;  %v2413_v20 = vrot.slane %v10775_v63, 7 }
 0x376   : > { %v2410_v62 = vrot.slane %v10772_v38, 7  ;;  %v2411_v6 = vrot.slane %v10773_v51, 7  ;;  %v10774_v17 = vld [vmem:[#allocation76_spill] sm:$0xff]  ;;  %v2415_v5 = vrot.slane %v10777_v2, 7  ;;  %v10779_v35 = vld [vmem:[#allocation110_spill] sm:$0xff]  ;;  %v10780_v18 = vld [vmem:[#allocation113_spill] sm:$0xff]  ;;  %v8945_v38 = vsub.f32 %v2331_v31, %v2395_v45 }
 0x377   : > { %v2412_v21 = vrot.slane %v10774_v17, 7  ;;  %v2417_v36 = vrot.slane %v10779_v35, 7  ;;  %v2418_v42 = vrot.slane %v10780_v18, 7  ;;  %v10781_v30 = vld [vmem:[#allocation123_spill] sm:$0xff]  ;;  %v10785_v17 = vld [vmem:[#allocation190_spill] sm:$0xff]  ;;  %v8954_v24 = vsub.f32 %v2336_v23, %v2400_v3 }
 0x378   : > { %v2419_v39 = vrot.slane %v10781_v30, 7  ;;  %v10782_v40 = vld [vmem:[#allocation191_spill] sm:$0xff]  ;;  %v10786_v28 = vsub.f32 %v10784_v41, %v10785_v17  ;;  %v8956_v2 = vsub.f32 %v2337_v8, %v2401_v56  ;;  %v8960_v35 = vsub.f32 %v2339_v53, %v2403_v52  ;;  %v10796_v3 = vld [vmem:[#allocation202_spill] sm:$0xff] }
 0x379   : > { %v10783_v51 = vrot.slane %v10782_v40, 7  ;;  %v8962_v18 = vsub.f32 %v2340_v58, %v2404_v14  ;;  %v8964_v30 = vsub.f32 %v2341_v15, %v2405_v33  ;;  %v8966_v31 = vsub.f32 %v2342_v10, %v2406_v22  ;;  %v10800_v56 = vld [vmem:[#allocation219_spill] sm:$0xff]  ;;  %v10802_v52 = vld [vmem:[#allocation210_spill] sm:$0xff] }
 0x37a   : > { %v8968_v45 = vsub.f32 %v2343_v19, %v2407_v55  ;;  %v8970_v40 = vsub.f32 %v2344_v12, %v2408_v11  ;;  %v8974_v41 = vsub.f32 %v2346_v44, %v2410_v62  ;;  %v8976_v23 = vsub.f32 %v2347_v50, %v2411_v6  ;;  %v10803_v14 = vld [vmem:[#allocation150_spill] sm:$0xff]  ;;  %v10805_v55 = vld [vmem:[#allocation151_spill] sm:$0xff]  ;;  %v10807_v62 = vld [vmem:[#allocation152_spill] sm:$0xff] }
 0x37b   : > { %v8952_v63 = vsub.f32 %v10786_v28, %v10783_v51  ;;  %v8972_v28 = vsub.f32 %v2345_v49, %v2409_v47  ;;  %v8978_v8 = vsub.f32 %v2348_v34, %v2412_v21  ;;  %v8980_v59 = vsub.f32 %v2349_v25, %v2413_v20  ;;  %v10804_v22 = vld [vmem:[#allocation86_spill] sm:$0xff]  ;;  %v10806_v47 = vld [vmem:[#allocation177_spill] sm:$0xff]  ;;  %v10808_v21 = vld [vmem:[#allocation211_spill] sm:$0xff] }
 0x37c   : > { %v8982_v53 = vsub.f32 %v2350_v26, %v2414_v54  ;;  %v8984_v58 = vsub.f32 %v2351_v0, %v2415_v5  ;;  %v8986_v15 = vsub.f32 %v2352_v46, %v2416_v16  ;;  %v8988_v10 = vsub.f32 %v2353_v29, %v2417_v36  ;;  %v10787_v16 = vld [vmem:[#allocation115_spill] sm:$0xff]  ;;  %v10788_v26 = vld [vmem:[#allocation36_spill] sm:$0xff]  ;;  %v10791_v46 = vld [vmem:[#allocation137_spill] sm:$0xff] }
 0x37d   : > { %v8990_v19 = vsub.f32 %v2354_v37, %v2418_v42  ;;  %v8992_v12 = vsub.f32 %v2355_v57, %v2419_v39  ;;  %v3707_v49 = vsub.f32 %v10672_v13, %v8693_v61  ;;  %v3711_v44 = vsub.f32 %v10679_v32, %v8698_v4  ;;  %v10789_v42 = vld [vmem:[#allocation134_spill] sm:$0xff]  ;;  %v10792_v37 = vld [vmem:[#allocation185_spill] sm:$0xff]  ;;  %v10810_v5 = vld [vmem:[#allocation212_spill] sm:$0xff] }
 0x37e   : > { %v3713_v50 = vsub.f32 %v10682_v7, %v8701_v27  ;;  %v3714_v34 = vsub.f32 %v10683_v9, %v8704_v43  ;;  %v3715_v25 = vsub.f32 %v10787_v16, %v8707_v60  ;;  %v3716_v0 = vsub.f32 %v10789_v42, %v10788_v26  ;;  %v10790_v39 = vld [vmem:[#allocation174_spill] sm:$0xff]  ;;  %v10793_v61 = vld [vmem:[#allocation141_spill] sm:$0xff]  ;;  %v10797_v27 = vld [vmem:[#allocation143_spill] sm:$0xff] }
 0x37f   : > { %v3717_v29 = vsub.f32 %v10791_v46, %v10790_v39  ;;  %v3718_v13 = vsub.f32 %v10793_v61, %v10792_v37  ;;  %v10794_v57 = vld [vmem:[#allocation182_spill] sm:$0xff]  ;;  %v3720_v7 = vsub.f32 %v10797_v27, %v10796_v3  ;;  %v10798_v36 = vld [vmem:[#allocation201_spill] sm:$0xff]  ;;  %v10799_v43 = vld [vmem:[#allocation144_spill] sm:$0xff]  ;;  %v3723_v33 = vsub.f32 %v10803_v14, %v10802_v52 }
 0x380   : > { %v10795_v4 = vld [vmem:[#allocation142_spill] sm:$0xff]  ;;  %v3721_v9 = vsub.f32 %v10799_v43, %v10798_v36  ;;  %v3724_v11 = vsub.f32 %v10805_v55, %v10804_v22  ;;  %v3725_v6 = vsub.f32 %v10807_v62, %v10806_v47  ;;  %v10811_v51 = vld [vmem:[#allocation156_spill] sm:$0xff]  ;;  %v10812_v16 = vld [vmem:[#allocation215_spill] sm:$0xff] }
 0x381   : > { %v3719_v32 = vsub.f32 %v10795_v4, %v10794_v57  ;;  %v10801_v60 = vld [vmem:[#allocation146_spill] sm:$0xff]  ;;  %v3727_v17 = vsub.f32 %v10811_v51, %v10810_v5  ;;  %v10814_v39 = vld [vmem:[#allocation33_spill] sm:$0xff]  ;;  %v10816_v61 = vld [vmem:[#allocation40_spill] sm:$0xff] }
 0x382   : > { %v3722_v1 = vsub.f32 %v10801_v60, %v10800_v56  ;;  %v10809_v20 = vld [vmem:[#allocation154_spill] sm:$0xff]  ;;  %v10817_v57 = vld [vmem:[#allocation220_spill] sm:$0xff]  ;;  %v10818_v3 = vld [vmem:[#allocation47_spill] sm:$0xff] }
 0x383   : > { %v3726_v54 = vsub.f32 %v10809_v20, %v10808_v21  ;;  %v10813_v26 = vld [vmem:[#allocation214_spill] sm:$0xff]  ;;  %v3730_v4 = vsub.f32 %v10817_v57, %v10816_v61  ;;  %v10820_v43 = vld [vmem:[#allocation155_spill] sm:$0xff]  ;;  %v10822_v52 = vld [vmem:[#allocation168_spill] sm:$0xff] }
 0x384   : > { %v3728_v42 = vsub.f32 %v10813_v26, %v10812_v16  ;;  %v10815_v46 = vld [vmem:[#allocation218_spill] sm:$0xff]  ;;  %v10821_v56 = vrot.slane %v10820_v43, 7  ;;  %v10823_v14 = vrot.slane %v10822_v52, 7  ;;  %v10824_v55 = vld [vmem:[#allocation13_spill] sm:$0xff]  ;;  %v10826_v21 = vld [vmem:[#allocation15_spill] sm:$0xff] }
 0x385   : > { %v3729_v37 = vsub.f32 %v10815_v46, %v10814_v39  ;;  %v10819_v27 = vld [vmem:[#allocation222_spill] sm:$0xff]  ;;  %v10825_v47 = vrot.slane %v10824_v55, 7  ;;  %v10827_v20 = vrot.slane %v10826_v21, 7  ;;  %v10828_v51 = vld [vmem:[#allocation20_spill] sm:$0xff]  ;;  %v10830_v39 = vld [vmem:[#allocation23_spill] sm:$0xff] }
 0x386   : > { %v3731_v36 = vsub.f32 %v10819_v27, %v10818_v3  ;;  %v3835_v60 = vsub.f32 %v3707_v49, %v10821_v56  ;;  %v3839_v22 = vsub.f32 %v3711_v44, %v10823_v14  ;;  %v10829_v16 = vrot.slane %v10828_v51, 7  ;;  %v10832_v57 = vld [vmem:[#allocation30_spill] sm:$0xff]  ;;  %v10834_v43 = vld [vmem:[#allocation32_spill] sm:$0xff]  ;;  %v10836_v52 = vld [vmem:[#allocation43_spill] sm:$0xff] }
 0x387   : > { %v3841_v62 = vsub.f32 %v3713_v50, %v10825_v47  ;;  %v3842_v5 = vsub.f32 %v3714_v34, %v10827_v20  ;;  %v10831_v46 = vrot.slane %v10830_v39, 7  ;;  %v10833_v3 = vrot.slane %v10832_v57, 7  ;;  %v10838_v55 = vld [vmem:[#allocation46_spill] sm:$0xff]  ;;  %v10840_v21 = vld [vmem:[#allocation55_spill] sm:$0xff]  ;;  %v10844_v39 = vld [vmem:[#allocation68_spill] sm:$0xff] }
 0x388   : > { %v3843_v26 = vsub.f32 %v3715_v25, %v10829_v16  ;;  %v10835_v49 = vrot.slane %v10834_v43, 7  ;;  %v10837_v44 = vrot.slane %v10836_v52, 7  ;;  %v10839_v50 = vrot.slane %v10838_v55, 7  ;;  %v10842_v51 = vld [vmem:[#allocation58_spill] sm:$0xff]  ;;  %v10846_v57 = vld [vmem:[#allocation71_spill] sm:$0xff]  ;;  %v10848_v43 = vld [vmem:[#allocation80_spill] sm:$0xff] }
 0x389   : > { %v3844_v61 = vsub.f32 %v3716_v0, %v10831_v46  ;;  %v3845_v27 = vsub.f32 %v3717_v29, %v10833_v3  ;;  %v10841_v34 = vrot.slane %v10840_v21, 7  ;;  %v10843_v25 = vrot.slane %v10842_v51, 7  ;;  %v10850_v52 = vld [vmem:[#allocation82_spill] sm:$0xff]  ;;  %v10852_v55 = vld [vmem:[#allocation92_spill] sm:$0xff]  ;;  %v10854_v21 = vld [vmem:[#allocation95_spill] sm:$0xff] }
 0x38a   : > { %v3846_v56 = vsub.f32 %v3718_v13, %v10835_v49  ;;  %v3847_v14 = vsub.f32 %v3719_v32, %v10837_v44  ;;  %v3848_v47 = vsub.f32 %v3720_v7, %v10839_v50  ;;  %v10845_v0 = vrot.slane %v10844_v39, 7  ;;  %v10856_v51 = vld [vmem:[#allocation104_spill] sm:$0xff]  ;;  %v10858_v39 = vld [vmem:[#allocation107_spill] sm:$0xff] }
 0x38b   : > { %v3849_v20 = vsub.f32 %v3721_v9, %v10841_v34  ;;  %v3850_v16 = vsub.f32 %v3722_v1, %v10843_v25  ;;  %v10847_v29 = vrot.slane %v10846_v57, 7  ;;  %v10849_v13 = vrot.slane %v10848_v43, 7  ;;  %v10860_v57 = vld [vmem:[#allocation117_spill] sm:$0xff]  ;;  %v10862_v43 = vld [vmem:[#allocation167_spill] sm:$0xff] }
 0x38c   : > { %v3851_v46 = vsub.f32 %v3723_v33, %v10845_v0  ;;  %v10851_v32 = vrot.slane %v10850_v52, 7  ;;  %v10853_v7 = vrot.slane %v10852_v55, 7  ;;  %v10855_v9 = vrot.slane %v10854_v21, 7  ;;  %v10864_v52 = vld [vmem:[#allocation188_spill] sm:$0xff]  ;;  %v10866_v55 = vld [vmem:[#allocation217_spill] sm:$0xff] }
 0x38d   : > { %v3852_v3 = vsub.f32 %v3724_v11, %v10847_v29  ;;  %v3853_v49 = vsub.f32 %v3725_v6, %v10849_v13  ;;  %v10857_v1 = vrot.slane %v10856_v51, 7  ;;  %v10859_v33 = vrot.slane %v10858_v39, 7 }
 0x38e   : > { %v3854_v44 = vsub.f32 %v3726_v54, %v10851_v32  ;;  %v3855_v50 = vsub.f32 %v3727_v17, %v10853_v7  ;;  %v3856_v34 = vsub.f32 %v3728_v42, %v10855_v9  ;;  %v10861_v11 = vrot.slane %v10860_v57, 7  ;;  %v10863_v54 = vld [vmem:[#allocation170_spill] sm:$0xff]  ;;  %v10865_v17 = vld [vmem:[#allocation193_spill] sm:$0xff] }
 0x38f   : > { %v3857_v25 = vsub.f32 %v3729_v37, %v10857_v1  ;;  %v3858_v0 = vsub.f32 %v3730_v4, %v10859_v33  ;;  %v9079_v6 = vadd.f32 %v3835_v60, %v8945_v38  ;;  %v4060_v13 = vadd.f32 %v10863_v54, %v10862_v43 }
 0x390   : > { %v3859_v29 = vsub.f32 %v3731_v36, %v10861_v11  ;;  %v4062_v32 = vadd.f32 %v10865_v17, %v10864_v52  ;;  %v4063_v42 = vadd.f32 %v3839_v22, %v8952_v63  ;;  %v4064_v37 = vadd.f32 %v10866_v55, %v8954_v24  ;;  %v10867_v22 = vld [vmem:[#allocation183_spill] sm:$0xff] }
 0x391   : > { %v4065_v7 = vadd.f32 %v3841_v62, %v8956_v2  ;;  %v4066_v4 = vadd.f32 %v3842_v5, %v8958_v48  ;;  %v4067_v36 = vadd.f32 %v3843_v26, %v8960_v35  ;;  %v4068_v38 = vadd.f32 %v3844_v61, %v8962_v18 }
 0x392   : > { %v4069_v60 = vadd.f32 %v3845_v27, %v8964_v30  ;;  %v4070_v21 = vadd.f32 %v3846_v56, %v8966_v31  ;;  %v4071_v9 = vadd.f32 %v3847_v14, %v8968_v45  ;;  %v4072_v51 = vadd.f32 %v3848_v47, %v8970_v40 }
 0x393   : > { %v4073_v63 = vadd.f32 %v3849_v20, %v8972_v28  ;;  %v4074_v24 = vadd.f32 %v3850_v16, %v8974_v41  ;;  %v4075_v2 = vadd.f32 %v3851_v46, %v8976_v23  ;;  %v4076_v48 = vadd.f32 %v3852_v3, %v8978_v8 }
 0x394   : > { %v4077_v35 = vadd.f32 %v3853_v49, %v8980_v59  ;;  %v4078_v18 = vadd.f32 %v3854_v44, %v8982_v53  ;;  %v4079_v30 = vadd.f32 %v3855_v50, %v8984_v58  ;;  %v4080_v31 = vadd.f32 %v3856_v34, %v8986_v15 }
 0x395   : > { %v4081_v45 = vadd.f32 %v3857_v25, %v8988_v10  ;;  %v4082_v40 = vadd.f32 %v3858_v0, %v8990_v19  ;;  %v4083_v28 = vadd.f32 %v3859_v29, %v8992_v12  ;;  %v4346_v41 = vrot.slane %v9079_v6, 1 }
 0x396   : > { %v4347_v23 = vrot.slane %v10867_v22, 7  ;;  %v4349_v62 = vrot.slane %v4062_v32, 6  ;;  %v4351_v8 = vrot.slane %v4063_v42, 5  ;;  %v4353_v5 = vrot.slane %v4064_v37, 4  ;;  %v10868_v42 = vld [vmem:[#allocation119_spill] sm:$0xff]  ;;  %v10869_v37 = vld [vmem:[#allocation126_spill] sm:$0xff] }
 0x397   : > { %v4355_v59 = vrot.slane %v4065_v7, 3  ;;  %v4357_v26 = vrot.slane %v4066_v4, 2  ;;  %v4359_v58 = vrot.slane %v4067_v36, 1  ;;  %v4361_v61 = vrot.slane %v4069_v60, 7  ;;  %v10870_v60 = vld [vmem:[#allocation130_spill] sm:$0xff] }
 0x398   : > { %v4348_v53 = vsel %vm4157_vm0, %v4347_v23, %v4060_v13  ;;  %v4363_v15 = vrot.slane %v4070_v21, 6  ;;  %v4365_v27 = vrot.slane %v4071_v9, 5  ;;  %v4367_v19 = vrot.slane %v4072_v51, 4  ;;  %v10871_v51 = vld [vmem:[#allocation135_spill] sm:$0xff] }
 0x399   : > { %v4350_v10 = vsel %vm4160_vm1, %v4349_v62, %v4348_v53  ;;  %v4369_v56 = vrot.slane %v4073_v63, 3  ;;  %v4362_v14 = vsel %vm4157_vm0, %v4361_v61, %v4068_v38  ;;  %v4371_v47 = vrot.slane %v4074_v24, 2  ;;  %v10872_v24 = vld [vmem:[#allocation139_spill] sm:$0xff] }
 0x39a   : > { %v4352_v12 = vsel %vm4163_vm2, %v4351_v8, %v4350_v10  ;;  %v4373_v20 = vrot.slane %v4075_v2, 1  ;;  %v4364_v46 = vsel %vm4160_vm1, %v4363_v15, %v4362_v14  ;;  %v4375_v3 = vrot.slane %v4077_v35, 7 }
 0x39b   : > { %v4354_v16 = vsel %vm4166_vm3, %v4353_v5, %v4352_v12  ;;  %v4377_v49 = vrot.slane %v4078_v18, 6  ;;  %v4366_v50 = vsel %vm4163_vm2, %v4365_v27, %v4364_v46  ;;  %v4379_v34 = vrot.slane %v4079_v30, 5 }
 0x39c   : > { %v4356_v44 = vsel %vm4169_vm4, %v4355_v59, %v4354_v16  ;;  %v4381_v1 = vrot.slane %v4080_v31, 4  ;;  %v4368_v39 = vsel %vm4166_vm3, %v4367_v19, %v4366_v50  ;;  %v4376_v33 = vsel %vm4157_vm0, %v4375_v3, %v4076_v48  ;;  %v10873_v48 = vld [vmem:[#allocation145_spill] sm:$0xff] }
 0x39d   : > { %v4358_v25 = vsel %vm4172_vm5, %v4357_v26, %v4356_v44  ;;  %v4383_v0 = vrot.slane %v4081_v45, 3  ;;  %v4370_v11 = vsel %vm4169_vm4, %v4369_v56, %v4368_v39  ;;  %v4378_v29 = vsel %vm4160_vm1, %v4377_v49, %v4376_v33  ;;  %v10874_v45 = vld [vmem:[#allocation148_spill] sm:$0xff]  ;;  %v10876_v39 = vld [vmem:[#allocation63_spill] sm:$0xff] }
 0x39e   : > { %v4360_v57 = vsel %vm4174_vm6, %v4359_v58, %v4358_v25  ;;  %v4385_v6 = vrot.slane %v4082_v40, 2  ;;  %v4372_v43 = vsel %vm4172_vm5, %v4371_v47, %v4370_v11  ;;  %v4380_v54 = vsel %vm4163_vm2, %v4379_v34, %v4378_v29  ;;  %v10878_v11 = vld [vmem:[#allocation78_spill] sm:$0xff] }
 0x39f   : > { %v4387_v13 = vrot.slane %v4083_v28, 1  ;;  %v4500_v52 = vpack.c.bf16 %v4360_v57, %v4346_v41  ;;  %v4374_v17 = vsel %vm4174_vm6, %v4373_v20, %v4372_v43  ;;  %v4382_v32 = vsel %vm4166_vm3, %v4381_v1, %v4380_v54  ;;  %v10875_v1 = vld [vmem:[#allocation59_spill] sm:$0xff] }
 0x3a0   : > { %v1684_v55 = vrot.slane %v10868_v42, 1  ;;  %v1685_v7 = vrot.slane %v10869_v37, 1  ;;  %v4384_v4 = vsel %vm4169_vm4, %v4383_v0, %v4382_v32  ;;  %v1686_v21 = vrot.slane %v10870_v60, 1  ;;  %v10877_v0 = vld [vmem:[#allocation72_spill] sm:$0xff]  ;;  %v10879_v43 = vld [vmem:[#allocation83_spill] sm:$0xff] }
 0x3a1   : > { %v4617_v36 = vshrl.u32 %v4500_v52, 16  ;;  %v4620_v38 = vshll.u32 %v4500_v52, 16  ;;  %v4386_v9 = vsel %vm4172_vm5, %v4385_v6, %v4384_v4  ;;  %v1687_v63 = vrot.slane %v10871_v51, 1 }
 0x3a2   : > { %v1688_v2 = vrot.slane %v10872_v24, 1  ;;  %v1689_v35 = vrot.slane %v10873_v48, 1  ;;  %v4388_v18 = vsel %vm4174_vm6, %v4387_v13, %v4386_v9  ;;  %v1690_v40 = vrot.slane %v10874_v45, 1  ;;  %v10880_v13 = vld [vmem:[#allocation129_spill] sm:$0xff] }
 0x3a3   : > { %v4619_v30 = vrot.slane %v4617_v36, 3  ;;  %v4622_v31 = vrot.slane %v4620_v38, 4  ;;  %v4504_v28 = vpack.c.bf16 %v4388_v18, %v4374_v17  ;;  %v9138_v41 = vadd.f32 %v1684_v55, %v10868_v42  ;;  %v10881_v17 = vld [vmem:[#allocation132_spill] sm:$0xff] }
 0x3a4   : > { %v9141_v22 = vadd.f32 %v1685_v7, %v10869_v37  ;;  %v9144_v23 = vadd.f32 %v1686_v21, %v10870_v60  ;;  %v9147_v8 = vadd.f32 %v1687_v63, %v10871_v51  ;;  %v9150_v5 = vadd.f32 %v1688_v2, %v10872_v24 }
 0x3a5   : > { %v4623_v62 = vor.u32 %v4622_v31, %v4619_v30  ;;  %v9153_v59 = vadd.f32 %v1689_v35, %v10873_v48  ;;  %v4625_v26 = vshrl.u32 %v4504_v28, 16  ;;  %v4628_v53 = vshll.u32 %v4504_v28, 16 }
 0x3a6   : > { %v9156_v58 = vadd.f32 %v1690_v40, %v10874_v45  ;;  %v1876_v61 = vrot.slane %v10868_v42, 2  ;;  %v1877_v15 = vrot.slane %v10869_v37, 2  ;;  %v1878_v10 = vrot.slane %v10870_v60, 2 }
 0x3a7   : > { %v1879_v27 = vrot.slane %v10871_v51, 2  ;;  %v1880_v19 = vrot.slane %v10872_v24, 2  ;;  %v4627_v56 = vrot.slane %v4625_v26, 3  ;;  %v4630_v12 = vrot.slane %v4628_v53, 4  ;;  %v10891_v26 = vld [vmem:[#allocation131_spill] sm:$0xff] }
 0x3a8   : > { %v1881_v14 = vrot.slane %v10873_v48, 2  ;;  %v1882_v47 = vrot.slane %v10874_v45, 2  ;;  %v1940_v20 = vadd.f32 %v1876_v61, %v9138_v41  ;;  %v1941_v16 = vadd.f32 %v1877_v15, %v9141_v22  ;;  %v10893_v15 = vld [vmem:[#allocation140_spill] sm:$0xff] }
 0x3a9   : > { %v1942_v46 = vadd.f32 %v1878_v10, %v9144_v23  ;;  %v1943_v3 = vadd.f32 %v1879_v27, %v9147_v8  ;;  %v9169_v49 = vor.u32 %v4630_v12, %v4627_v56  ;;  %v1944_v44 = vadd.f32 %v1880_v19, %v9150_v5  ;;  %v10894_v10 = vld [vmem:[#allocation147_spill] sm:$0xff]  ;;  %v10897_v12 = vld [vmem:[#allocation44_spill] sm:$0xff] }
 0x3aa   : > { %v1945_v50 = vadd.f32 %v1881_v14, %v9153_v59  ;;  %v1946_v34 = vadd.f32 %v1882_v47, %v9156_v58  ;;  %v2516_v25 = vsub.f32 %v10875_v1, %v1940_v20  ;;  %v2517_v33 = vsub.f32 %v10876_v39, %v1941_v16  ;;  %v10896_v56 = vld [vmem:[#allocation39_spill] sm:$0xff]  ;;  %v10898_v47 = vld [vmem:[#allocation53_spill] sm:$0xff]  ;;  %v10899_v16 = vld [vmem:[#allocation56_spill] sm:$0xff] }
 0x3ab   : > { %v2518_v57 = vsub.f32 %v10877_v0, %v1942_v46  ;;  %v2519_v29 = vsub.f32 %v10878_v11, %v1943_v3  ;;  %v4632_v6 = vsel %vm4581_vm7, %v4623_v62, %v9169_v49  ;;  %v2520_v54 = vsub.f32 %v10879_v43, %v1944_v44  ;;  %v10890_v62 = vld [vmem:[#allocation128_spill] sm:$0xff]  ;;  %v10900_v3 = vld [vmem:[#allocation65_spill] sm:$0xff] }
 0x3ac   : > { %v2521_v52 = vsub.f32 %v10880_v13, %v1945_v50  ;;  %v2522_v32 = vsub.f32 %v10881_v17, %v1946_v34  ;;  %4968 = vmatmul.mubr.bf16.vlgmr.msra.gmra.mrb[60].mxu1 %v4632_v6  ;;  %v10882_v55 = vrot.slane %v10868_v42, 7  ;;  %v10883_v4 = vrot.slane %v10869_v37, 7  ;;  %v10889_v42 = vld [vmem:[#allocation120_spill] sm:$0xff]  ;;  %v10901_v50 = vld [vmem:[#allocation69_spill] sm:$0xff] }
 0x3ad   : > { %v10884_v38 = vrot.slane %v10870_v60, 7  ;;  %v10885_v9 = vrot.slane %v10871_v51, 7  ;;  %v10886_v2 = vrot.slane %v10872_v24, 7  ;;  %v10887_v18 = vrot.slane %v10873_v48, 7  ;;  %v10892_v60 = vld [vmem:[#allocation138_spill] sm:$0xff]  ;;  %v10895_v24 = vld [vmem:[#allocation149_spill] sm:$0xff] }
 0x3ae   : > { %v2644_v7 = vsub.f32 %v2516_v25, %v10882_v55  ;;  %v2645_v36 = vsub.f32 %v2517_v33, %v10883_v4  ;;  %v10888_v31 = vrot.slane %v10874_v45, 7  ;;  %v3124_v28 = vrot.slane %v10889_v42, 2  ;;  %v10902_v25 = vld [vmem:[#allocation77_spill] sm:$0xff] }
 0x3af   : > { %v2646_v21 = vsub.f32 %v2518_v57, %v10884_v38  ;;  %v2647_v63 = vsub.f32 %v2519_v29, %v10885_v9  ;;  %v2648_v35 = vsub.f32 %v2520_v54, %v10886_v2  ;;  %v2649_v30 = vsub.f32 %v2521_v52, %v10887_v18 }
 0x3b0   : > { %v2650_v40 = vsub.f32 %v2522_v32, %v10888_v31  ;;  %v3125_v37 = vrot.slane %v10890_v62, 2  ;;  %v3126_v53 = vrot.slane %v10891_v26, 2  ;;  %v3127_v61 = vrot.slane %v10892_v60, 2 }
 0x3b1   : > { %v3128_v51 = vrot.slane %v10893_v15, 2  ;;  %v3129_v27 = vrot.slane %v10894_v10, 2  ;;  %v3130_v19 = vrot.slane %v10895_v24, 2  ;;  %v9205_v48 = vadd.f32 %v3124_v28, %v10896_v56 }
 0x3b2   : > { %v3316_v45 = vrot.slane %v10889_v42, 3  ;;  %v9209_v14 = vadd.f32 %v3125_v37, %v10897_v12  ;;  %v9212_v20 = vadd.f32 %v3126_v53, %v10898_v47  ;;  %v9215_v46 = vadd.f32 %v3127_v61, %v10899_v16  ;;  %v10903_v37 = vld [vmem:[#allocation136_spill] sm:$0xff]  ;;  %v10904_v61 = vld [vmem:[#allocation255_spill] sm:$0xff]  ;;  %v10908_v47 = vld [vmem:[#allocation21_spill] sm:$0xff] }
 0x3b3   : > { %v9218_v44 = vadd.f32 %v3128_v51, %v10900_v3  ;;  %v9221_v34 = vadd.f32 %v3129_v27, %v10901_v50  ;;  %v9224_v33 = vadd.f32 %v3130_v19, %v10902_v25  ;;  %v3317_v57 = vrot.slane %v10890_v62, 3  ;;  %v10905_v27 = vld [vmem:[#allocation206_spill] sm:$0xff]  ;;  %v10909_v3 = vld [vmem:[#allocation28_spill] sm:$0xff]  ;;  %v9250_v25 = vpop.f32.mrb[52].mxu1 }
 0x3b4   : > { %v3318_v29 = vrot.slane %v10891_v26, 3  ;;  %v3319_v6 = vrot.slane %v10892_v60, 3  ;;  %v3320_v54 = vrot.slane %v10893_v15, 3  ;;  %v3321_v52 = vrot.slane %v10894_v10, 3 }
 0x3b5   : > { %v3322_v32 = vrot.slane %v10895_v24, 3  ;;  %v3380_v55 = vadd.f32 %v3316_v45, %v9205_v48  ;;  %v3381_v4 = vadd.f32 %v3317_v57, %v9209_v14  ;;  %v2356_v9 = vsub.f32 %v10875_v1, %v9138_v41  ;;  %v10906_v45 = vld [vmem:[#allocation204_spill] sm:$0xff]  ;;  %v10907_v41 = vld [vmem:[#allocation18_spill] sm:$0xff] }
 0x3b6   : > { %v3382_v38 = vadd.f32 %v3318_v29, %v9212_v20  ;;  %v3383_v2 = vadd.f32 %v3319_v6, %v9215_v46  ;;  %v3384_v18 = vadd.f32 %v3320_v54, %v9218_v44  ;;  %v3385_v31 = vadd.f32 %v3321_v52, %v9221_v34  ;;  %v9254_v52 = vpop.f32.mrb[53].mxu1 }
 0x3b7   : > { %v3386_v28 = vadd.f32 %v3322_v32, %v9224_v33  ;;  %v3892_v53 = vsub.f32 %v10903_v37, %v3380_v55  ;;  %v3893_v51 = vsub.f32 %v10904_v61, %v3381_v4  ;;  %v2357_v56 = vsub.f32 %v10876_v39, %v9141_v22  ;;  %v9256_v4 = vpop.f32.mrb[54].mxu1 }
 0x3b8   : > { %v3894_v19 = vsub.f32 %v10905_v27, %v3382_v38  ;;  %v3895_v12 = vsub.f32 %v10906_v45, %v3383_v2  ;;  %v3896_v1 = vsub.f32 %v10907_v41, %v3384_v18  ;;  %v3897_v16 = vsub.f32 %v10908_v47, %v3385_v31 }
 0x3b9   : > { %v3898_v50 = vsub.f32 %v10909_v3, %v3386_v28  ;;  %v4116_v57 = vadd.f32 %v3892_v53, %v2644_v7  ;;  %v4117_v29 = vadd.f32 %v3893_v51, %v2645_v36  ;;  %v2358_v54 = vsub.f32 %v10877_v0, %v9144_v23  ;;  %v5297_v36 = vpop.f32.mrb[55].mxu1  ;;  %v10913_v51 = vld [vmem:[#allocation108_spill] sm:$0xff] }
 0x3ba   : > { %v4118_v6 = vadd.f32 %v3894_v19, %v2646_v21  ;;  %v4119_v32 = vadd.f32 %v3895_v12, %v2647_v63  ;;  %v4120_v22 = vadd.f32 %v3896_v1, %v2648_v35  ;;  %v4121_v39 = vadd.f32 %v3897_v16, %v2649_v30  ;;  %v10914_v1 = vld [vmem:[#allocation112_spill] sm:$0xff] }
 0x3bb   : > { %v4122_v55 = vadd.f32 %v3898_v50, %v2650_v40  ;;  %v4481_v38 = vrot.slane %v4117_v29, 7  ;;  %v2359_v18 = vsub.f32 %v10878_v11, %v9147_v8  ;;  %v2360_v7 = vsub.f32 %v10879_v43, %v9150_v5  ;;  %v10910_v40 = vld [vmem:[#allocation90_spill] sm:$0xff]  ;;  %v10911_v11 = vld [vmem:[#allocation96_spill] sm:$0xff]  ;;  %v10915_v50 = vld [vmem:[#allocation121_spill] sm:$0xff] }
 0x3bc   : > { %v4483_v2 = vrot.slane %v4118_v6, 6  ;;  %v4485_v21 = vrot.slane %v4119_v32, 5  ;;  %v4487_v31 = vrot.slane %v4120_v22, 4  ;;  %v4489_v23 = vrot.slane %v4121_v39, 3  ;;  %v10912_v5 = vld [vmem:[#allocation100_spill] sm:$0xff] }
 0x3bd   : > { %v4491_v0 = vrot.slane %v4122_v55, 2  ;;  %v4482_v63 = vsel %vm4157_vm0, %v4481_v38, %v4116_v57  ;;  %v2361_v35 = vsub.f32 %v10880_v13, %v9153_v59  ;;  %v2362_v30 = vsub.f32 %v10881_v17, %v9156_v58  ;;  %v10916_v59 = vld [vmem:[#allocation127_spill] sm:$0xff] }
 0x3be   : > { %v2420_v28 = vrot.slane %v10910_v40, 7  ;;  %v4484_v8 = vsel %vm4160_vm1, %v4483_v2, %v4482_v63  ;;  %v2421_v53 = vrot.slane %v10911_v11, 7  ;;  %v2422_v43 = vrot.slane %v10912_v5, 7 }
 0x3bf   : > { %v2423_v19 = vrot.slane %v10913_v51, 7  ;;  %v4486_v12 = vsel %vm4163_vm2, %v4485_v21, %v4484_v8  ;;  %v2424_v16 = vrot.slane %v10914_v1, 7  ;;  %v2425_v57 = vrot.slane %v10915_v50, 7  ;;  %v10924_v51 = vld [vmem:[#allocation89_spill] sm:$0xff] }
 0x3c0   : > { %v2426_v13 = vrot.slane %v10916_v59, 7  ;;  %v4488_v58 = vsel %vm4166_vm3, %v4487_v31, %v4486_v12  ;;  %v2484_v17 = vsub.f32 %v2356_v9, %v2420_v28  ;;  %v2485_v29 = vsub.f32 %v2357_v56, %v2421_v53 }
 0x3c1   : > { %v2486_v6 = vsub.f32 %v2358_v54, %v2422_v43  ;;  %v4490_v32 = vsel %vm4169_vm4, %v4489_v23, %v4488_v58  ;;  %v2487_v22 = vsub.f32 %v2359_v18, %v2423_v19  ;;  %v2488_v39 = vsub.f32 %v2360_v7, %v2424_v16 }
 0x3c2   : > { %v2489_v55 = vsub.f32 %v2361_v35, %v2425_v57  ;;  %v4492_v38 = vsel %vm4172_vm5, %v4491_v0, %v4490_v32  ;;  %v2490_v2 = vsub.f32 %v2362_v30, %v2426_v13  ;;  %v3732_v21 = vsub.f32 %v10903_v37, %v9205_v48 }
 0x3c3   : > { %v3733_v63 = vsub.f32 %v10904_v61, %v9209_v14  ;;  %v4509_v40 = vpack.c.bf16 %v4492_v38, %v4492_v38  ;;  %v3734_v9 = vsub.f32 %v10905_v27, %v9212_v20  ;;  %v3735_v56 = vsub.f32 %v10906_v45, %v9215_v46 }
 0x3c4   : > { %v3736_v54 = vsub.f32 %v10907_v41, %v9218_v44  ;;  %v3737_v18 = vsub.f32 %v10908_v47, %v9221_v34  ;;  %v3738_v7 = vsub.f32 %v10909_v3, %v9224_v33  ;;  %v10917_v48 = vrot.slane %v10889_v42, 7 }
 0x3c5   : > { %v10918_v14 = vrot.slane %v10890_v62, 7  ;;  %v4678_v31 = vshrl.u32 %v4509_v40, 16  ;;  %v4681_v20 = vshll.u32 %v4509_v40, 16  ;;  %v10919_v27 = vrot.slane %v10891_v26, 7 }
 0x3c6   : > { %v3860_v37 = vsub.f32 %v3732_v21, %v10917_v48  ;;  %v10920_v45 = vrot.slane %v10892_v60, 7  ;;  %v10921_v41 = vrot.slane %v10893_v15, 7  ;;  %v10922_v47 = vrot.slane %v10894_v10, 7  ;;  %v5236_v21 = vld [vmem:[%s9377_s3] ss:$0 sm:$0xff] }
 0x3c7   : > { %v3861_v61 = vsub.f32 %v3733_v63, %v10918_v14  ;;  %v3862_v46 = vsub.f32 %v3734_v9, %v10919_v27  ;;  %v10923_v42 = vrot.slane %v10895_v24, 7  ;;  %v4680_v62 = vrot.slane %v4678_v31, 3 }
 0x3c8   : > { %v3863_v44 = vsub.f32 %v3735_v56, %v10920_v45  ;;  %v3864_v34 = vsub.f32 %v3736_v54, %v10921_v41  ;;  %v3865_v33 = vsub.f32 %v3737_v18, %v10922_v47  ;;  %v4084_v23 = vadd.f32 %v3860_v37, %v2484_v17 }
 0x3c9   : > { %v3866_v3 = vsub.f32 %v3738_v7, %v10923_v42  ;;  %v4683_v0 = vrot.slane %v4681_v20, 4  ;;  %v4085_v35 = vadd.f32 %v3861_v61, %v2485_v29  ;;  %v4086_v30 = vadd.f32 %v3862_v46, %v2486_v6 }
 0x3ca   : > { %v4087_v28 = vadd.f32 %v3863_v44, %v2487_v22  ;;  %v4088_v26 = vadd.f32 %v3864_v34, %v2488_v39  ;;  %v4089_v8 = vadd.f32 %v3865_v33, %v2489_v55  ;;  %v5295_v15 = vadd.f32 %v9254_v52, %v9250_v25 }
 0x3cb   : > { %v4090_v11 = vadd.f32 %v3866_v3, %v2490_v2  ;;  %v4684_v60 = vor.u32 %v4683_v0, %v4680_v62  ;;  %v4389_v53 = vrot.slane %v4085_v35, 7  ;;  %v4391_v5 = vrot.slane %v4086_v30, 6 }
 0x3cc   : > { %v4393_v10 = vrot.slane %v4087_v28, 5  ;;  %v4395_v43 = vrot.slane %v4088_v26, 4  ;;  %v4397_v12 = vrot.slane %v4089_v8, 3  ;;  %v5298_v1 = vadd.f32 %v5297_v36, %v9256_v4 }
 0x3cd   : > { %v4685_v24 = vsel %vm4581_vm7, %v10924_v51, %v4684_v60  ;;  %v4390_v19 = vsel %vm4157_vm0, %v4389_v53, %v4084_v23  ;;  %v4399_v50 = vrot.slane %v4090_v11, 2  ;;  %v4921_v9 = vadd.f32 %v5295_v15, %v5236_v21 }
 0x3ce   : > { %4975 = vmatprep.mubr.bf16.mxu1 %v4685_v24  ;;  %v4392_v16 = vsel %vm4160_vm1, %v4391_v5, %v4390_v19 }
 0x3cf   : > { %v4394_v57 = vsel %vm4163_vm2, %v4393_v10, %v4392_v16 }
 0x3d0   : > { %v4396_v59 = vsel %vm4166_vm3, %v4395_v43, %v4394_v57 }
 0x3d1   : > { %v4398_v25 = vsel %vm4169_vm4, %v4397_v12, %v4396_v59 }
 0x3d2   : > { %v4400_v52 = vsel %vm4172_vm5, %v4399_v50, %v4398_v25 }
 0x3d3   : > { %v4508_v13 = vpack.c.bf16 %v4400_v52, %v4400_v52 }
 0x3d5   : > { %v4669_v58 = vshrl.u32 %v4508_v13, 16  ;;  %v4672_v17 = vshll.u32 %v4508_v13, 16 }
 0x3d7   : > { %v4671_v29 = vrot.slane %v4669_v58, 3  ;;  %v4674_v6 = vrot.slane %v4672_v17, 4 }
 0x3d9   : > { %v4675_v32 = vor.u32 %v4674_v6, %v4671_v29 }
 0x3db   : > { %v4676_v4 = vsel %vm4581_vm7, %v9169_v49, %v4675_v32  ;;  %v4924_v49 = vadd.f32 %v5298_v1, %v5236_v21 }
 0x3dc   : > { %4976 = vmatmul.mubr.bf16.gmra.mrb[64].mxu1 %v4676_v4 }
 0x3f4   : > { %v5299_v36 = vpop.f32.mrb[56].mxu1 }
 0x3f5   : > { %v5300_v22 = vpop.f32.mrb[57].mxu1 }
 0x3f6   : > { %v5301_v39 = vadd.f32 %v5300_v22, %v5299_v36  ;;  %v5302_v55 = vpop.f32.mrb[58].mxu1 }
 0x3f7   : > { %v5303_v38 = vpop.f32.mrb[59].mxu1 }
 0x3f8   : > { %v5304_v2 = vadd.f32 %v5303_v38, %v5302_v55  ;;  %v4929_v31 = vadd.f32 %v5301_v39, %v5236_v21 }
 0x3fa   : > { %v4932_v45 = vadd.f32 %v5304_v2, %v5236_v21 }
 0x47f   : > { %v5321_v63 = vpop.f32.mrb[60].mxu1 }
 0x480   : > { %v5322_v40 = vpop.f32.mrb[61].mxu1 }
 0x481   : > { %v5323_v56 = vadd.f32 %v5322_v40, %v5321_v63  ;;  %v5324_v54 = vpop.f32.mrb[62].mxu1 }
 0x482   : > { %v5325_v18 = vpop.f32.mrb[63].mxu1 }
 0x483   : > { %v4970_v7 = vadd.f32 %v5323_v56, %v4921_v9  ;;  %v5326_v48 = vadd.f32 %v5325_v18, %v5324_v54 }
 0x485   : > { %4984 = vst [vmem:[%s245_s6] sm:$0xff] %v4970_v7  ;;  %v4973_v37 = vadd.f32 %v5326_v48, %v4924_v49 }
 0x487   : > { %4985 = vst [vmem:[%s245_s6 + $0x8] sm:$0xff] %v4973_v37 }
 0x4af   : > { %v5327_v14 = vpop.f32.mrb[64].mxu1 }
 0x4b0   : > { %v5328_v61 = vpop.f32.mrb[65].mxu1 }
 0x4b1   : > { %v5329_v20 = vadd.f32 %v5328_v61, %v5327_v14  ;;  %v5330_v27 = vpop.f32.mrb[66].mxu1 }
 0x4b2   : > { %v5331_v46 = vpop.f32.mrb[67].mxu1 }
 0x4b3   : > { %v4978_v44 = vadd.f32 %v5329_v20, %v4929_v31  ;;  %v5332_v41 = vadd.f32 %v5331_v46, %v5330_v27 }
 0x4b5   : > { %4986 = vst [vmem:[%s245_s6 + $0x10] sm:$0xff] %v4978_v44  ;;  %v4981_v34 = vadd.f32 %v5332_v41, %v4932_v45 }
 0x4b7   : > { %4987 = vst [vmem:[%s245_s6 + $0x18] sm:$0xff] %v4981_v34 }
 0x4b8   : > { %5827 = shalt.err (!%p5824_p2)
}
 0x4b9   : > { %s5828_s10 = scalar_lea.hbm %s9330_s28, 512  ;;  %s5832_s21 = scalar_lea.hbm %s9378_s4, 1024 }
 0x4ba   : > { %p5829_p13 = scmp.ne.s32.totalorder %s9330_s28, %s5828_s10  ;;  %p5833_p4 = scmp.lt.u32.totalorder %s9330_s28, %s9378_s4 }
 0x4bb   : > { %p5834_p7 = scmp.lt.u32.totalorder %s5832_s21, %s5828_s10  ;;  %p5836_p11 = scmp.lt.u32.totalorder %s5828_s10, %s9330_s28 }
 0x4bc   : > { %p5830_p6 = pnand %p5829_p13, %p10925_p0 }
 0x4bd   : > { %p5835_p8 = por %p5834_p7, %p5833_p4 }
 0x4be   : > { %p5831_p10 = pneg %p5830_p6 }
 0x4bf   : > { %p5837_p1 = por %p5836_p11, %p5835_p8 }
 0x4c1   : > { %p5838_p3 = pnand %p5837_p1, %p5831_p10 }
 0x4c3   : > { %5841 = shalt.err (!%p5838_p3)
}
 0x4c4   : > { %s5896_s6 = smov 128   ;;  %s5897_s7 = smov 8  }
 0x4c5   : > { %5439 = dma.vmem_to_hbm [thread:$0]  (%p10925_p0), %s9325_s25, 512, %s9330_s28, %s4989_s27, %s5896_s6, %s5896_s6, %s5897_s7  }
 0x4c6 PF: > { %s5017_s24 = sand.u32 1, %s5872_s15   ;;  %p10926_p5 = scmp.ne.s32.totalorder %s9837_s22, 0 }
 0x4c7   : > { %p10927_p9 = scmp.ge.s32.totalorder %s5884_s18, 2  ;;  %s5018_s26 = scalar_lea.sflag [#allocation4], %s5017_s24 }
 0x4c9   : > { %p5453_p12 = pnand %p10927_p9, %p10926_p5 }
 0x4cb   : > { %5867 = dma.done.wait (!%p5453_p12), %s5018_s26, 512  }
 0x4cc   : > { %5869 = vsyncadd (!%p5453_p12), %s5018_s26, 4294966784  ;;  %p18_p2 = scmp.ge.s32.totalorder %s6033_s11, 4   ;;  %s10928_s15 = smov %s5876_s16 }
 0x4cd   : > { %s10929_s16 = smov %s5880_s17  ;;  %s10930_s17 = smov %s6042_s14 }
 0x4ce   : > { %s10931_s18 = smov %s6033_s11  ;;  %20 = sbr.rel (!%p18_p2) target bundleno = 6 (0x6), region = 89 }
 0x4d5   :  { %5023 = vsyncpa [#allocation3], 1 }
 0x4d6   :  { %5025 = vsyncpa [#allocation3 + $0x1], 1 }
 0x4d7   :  { %5026 = vsyncpa [#allocation6], 1 }
 0x4d8   :  { %5027 = vsyncpa [#allocation4], 1 }
 0x4d9   :  { %5029 = vsyncpa [#allocation4 + $0x1], 1 }

</bundles_post_ra>
